<compile_context>
chip_gen: v5e
topology: v5e:2x2
jax: 0.10.0
libtpu: 0.0.40
codegen_flags: <defaults>
</compile_context>

<pallas_src>
import functools

import jax
import jax.numpy as jnp
from jax.experimental import pallas as pl
from jax.experimental.pallas import tpu as pltpu


# ----------------------------- Pallas kernel --------------------------------


def _block_kernel(x_ref,
                  g1_ref, b1_ref,
                  wqkv_ref,
                  wproj_ref, bproj_ref,
                  g2_ref, b2_ref,
                  w1_ref, bfc1_ref,
                  w2_ref, bfc2_ref,
                  o_ref,
                  *, num_heads, n_tokens, eps, approx_gelu):
    x = x_ref[...].astype(jnp.float32)            # (R, C) slab, R = batches_per_step * N
    R, C = x.shape
    hd = C // num_heads
    nb = R // n_tokens                            # batches handled by this grid step

    def layer_norm(v, g, b):                      # f32 math, single-pass moments
        mu = jnp.mean(v, axis=-1, keepdims=True)
        msq = jnp.mean(v * v, axis=-1, keepdims=True)
        var = msq - mu * mu
        return (v - mu) * jax.lax.rsqrt(var + eps) * g + b

    # ---------------- attention branch: x + proj(attn(LN1(x))) ----------------
    xn = layer_norm(x, g1_ref[...], b1_ref[...]).astype(jnp.bfloat16)

    # Fused q|k|v matmul on the whole slab; the attention scale is pre-folded into the
    # q columns of wqkv by the wrapper.  Static lane slices pull q/k/v back out.
    qkv = jnp.dot(xn, wqkv_ref[...],
                  preferred_element_type=jnp.float32).astype(jnp.bfloat16)   # (R, 3C)
    q = qkv[:, :C]
    k = qkv[:, C:2 * C]
    v = qkv[:, 2 * C:]

    # Per-(batch, head) softmax attention on (N, N) tiles, kept in registers.
    ctx_rows = []
    for b in range(nb):                           # static unroll (small B)
        r0 = b * n_tokens
        heads = []
        for h in range(num_heads):                # static unroll
            c0 = h * hd
            qh = q[r0:r0 + n_tokens, c0:c0 + hd]
            kh = k[r0:r0 + n_tokens, c0:c0 + hd]
            vh = v[r0:r0 + n_tokens, c0:c0 + hd]
            # q @ k^T without an explicit transpose (trans_b form).
            s = jax.lax.dot_general(qh, kh, (((1,), (1,)), ((), ())),
                                    preferred_element_type=jnp.float32)   # (N, N)
            s = s - jnp.max(s, axis=-1, keepdims=True)
            p = jnp.exp(s)
            # approx reciprocal -> EUP slot; ~2^-12 rel. error, inside test tolerance.
            p = p * pl.reciprocal(jnp.sum(p, axis=-1, keepdims=True), approx=True)
            heads.append(jnp.dot(p.astype(jnp.bfloat16), vh,
                                 preferred_element_type=jnp.float32))     # (N, hd)
        ctx_rows.append(jnp.concatenate(heads, axis=-1))                  # (N, C)
    ctx = jnp.concatenate(ctx_rows, axis=0).astype(jnp.bfloat16)          # (R, C)

    x = x + (jnp.dot(ctx, wproj_ref[...], preferred_element_type=jnp.float32)
             + bproj_ref[...])

    # ---------------- MLP branch: x + fc2(gelu(fc1(LN2(x)))) ----------------
    xn2 = layer_norm(x, g2_ref[...], b2_ref[...]).astype(jnp.bfloat16)
    h1 = jnp.dot(xn2, w1_ref[...], preferred_element_type=jnp.float32) + bfc1_ref[...]
    # tanh GELU lowers to the EUP (own bundle slot); erf form is a long VALU polynomial.
    h1 = jax.nn.gelu(h1, approximate=approx_gelu)
    h2 = jnp.dot(h1.astype(jnp.bfloat16), w2_ref[...],
                 preferred_element_type=jnp.float32) + bfc2_ref[...]
    # NOTE: C=32 < 128 lanes -> masked stores; acceptable at this toy size.
    o_ref[...] = (x + h2).astype(o_ref.dtype)


# ------------------------------ wrapper --------------------------------------


def _num_row_blocks(batch, n_tokens):
    """Split across v7x's 2 TensorCores only when each core still gets >=256 rows
    (full MXU height); otherwise keep a single grid step (v5e/v6e have 1 TC)."""
    try:
        kind = jax.devices()[0].device_kind.lower()
    except Exception:
        return 1
    if "v7" in kind and batch % 2 == 0 and (batch * n_tokens) // 2 >= 256:
        return 2
    return 1


def block_forward(x, params, *, num_heads, eps=1e-5, approx_gelu=True):
    """x: (B, N, C) float32.  params: dict of weights (see init_params).

    approx_gelu=True uses the tanh GELU (EUP-friendly, <~3e-4 divergence from
    PyTorch nn.GELU's exact erf).  Set False for bit-faithful erf GELU.
    """
    B, N, C = x.shape
    assert C % num_heads == 0, f"dim {C} must be divisible by num_heads {num_heads}"
    hd = C // num_heads
    scale = hd ** -0.5

    G = _num_row_blocks(B, N)
    R = (B // G) * N                              # rows per grid step

    # Weight prep (free, outside the kernel): fold scale into the q columns, fuse
    # q|k|v into one (C, 3C) weight, cast matmul weights to bf16 (MXU-native).
    # Biases / LN params stay f32.
    wqkv = jnp.concatenate(
        [params["wq"] * scale, params["wkv"][:, :C], params["wkv"][:, C:]],
        axis=1).astype(jnp.bfloat16)              # (C, 3C)
    wproj = params["wproj"].astype(jnp.bfloat16)
    w1 = params["w1"].astype(jnp.bfloat16)
    w2 = params["w2"].astype(jnp.bfloat16)

    ordered = [
        params["g1"], params["b1"],
        wqkv,
        wproj, params["bproj"],
        params["g2"], params["b2"],
        w1, params["bfc1"],
        w2, params["bfc2"],
    ]

    def full_spec(p):
        nd = p.ndim
        return pl.BlockSpec(p.shape, lambda i, _nd=nd: (0,) * _nd)

    x2 = x.reshape(B * N, C)                      # fold batch into the matmul M dim

    in_specs = ([pl.BlockSpec((R, C), lambda i: (i, 0))]
                + [full_spec(p) for p in ordered])
    out_spec = pl.BlockSpec((R, C), lambda i: (i, 0))

    kernel = functools.partial(_block_kernel, num_heads=num_heads,
                               n_tokens=N, eps=eps, approx_gelu=approx_gelu)

    out2 = pl.pallas_call(
        kernel,
        out_shape=jax.ShapeDtypeStruct((B * N, C), x.dtype),
        grid_spec=pltpu.PrefetchScalarGridSpec(
            num_scalar_prefetch=0,
            grid=(G,),
            in_specs=in_specs,
            out_specs=out_spec,
        ),
        compiler_params=pltpu.CompilerParams(
            dimension_semantics=("parallel",),
            vmem_limit_bytes=32 * 1024 * 1024,
        ),
    )(x2, *ordered)
    return out2.reshape(B, N, C)


# --------------------------- parameter init ----------------------------------


def init_params(key, dim, num_heads, mlp_ratio=4.0):
    hidden = int(dim * mlp_ratio)
    ks = jax.random.split(key, 12)
    n = lambda k, shape, s=0.02: (s * jax.random.normal(k, shape)).astype(jnp.float32)
    return {
        # LayerNorm1
        "g1": (1.0 + n(ks[0], (1, dim), 0.1)),
        "b1": n(ks[1], (1, dim), 0.05),
        # Attention (weights stored input-major: y = x @ W + b)
        "wq": n(ks[2], (dim, dim)),
        "wkv": n(ks[3], (dim, 2 * dim)),
        "wproj": n(ks[4], (dim, dim)),
        "bproj": n(ks[5], (1, dim), 0.05),
        # LayerNorm2
        "g2": (1.0 + n(ks[6], (1, dim), 0.1)),
        "b2": n(ks[7], (1, dim), 0.05),
        # MLP
        "w1": n(ks[8], (dim, hidden)),
        "bfc1": n(ks[9], (1, hidden), 0.05),
        "w2": n(ks[10], (hidden, dim)),
        "bfc2": n(ks[11], (1, dim), 0.05),
    }


# --------------------------- pure-JAX reference -------------------------------


def block_reference(x, p, *, num_heads, eps=1e-5):
    """Matches PyTorch semantics: exact erf GELU, f32 everywhere."""
    B, N, C = x.shape
    hd = C // num_heads
    scale = hd ** -0.5

    def ln(v, g, b):
        mu = jnp.mean(v, axis=-1, keepdims=True)
        var = jnp.mean((v - mu) ** 2, axis=-1, keepdims=True)
        return (v - mu) / jnp.sqrt(var + eps) * g[0] + b[0]

    xn = ln(x, p["g1"], p["b1"])
    q = (xn @ p["wq"]).reshape(B, N, num_heads, hd).transpose(0, 2, 1, 3)
    kv = xn @ p["wkv"]
    k = kv[..., :C].reshape(B, N, num_heads, hd).transpose(0, 2, 1, 3)
    v = kv[..., C:].reshape(B, N, num_heads, hd).transpose(0, 2, 1, 3)
    attn = jnp.einsum("bhqd,bhkd->bhqk", q, k) * scale
    attn = jax.nn.softmax(attn, axis=-1)
    o = jnp.einsum("bhqk,bhkd->bhqd", attn, v).transpose(0, 2, 1, 3).reshape(B, N, C)
    x = x + (o @ p["wproj"] + p["bproj"][0])

    xn2 = ln(x, p["g2"], p["b2"])
    h = jax.nn.gelu(xn2 @ p["w1"] + p["bfc1"][0], approximate=False)
    x = x + (h @ p["w2"] + p["bfc2"][0])
    return x


# --------------------------------- main ---------------------------------------


if __name__ == "__main__":
    dim = 32
    num_heads = 4
    mlp_ratio = 4.0
    B, H, W = 2, 8, 8
    N = H * W

    key = jax.random.PRNGKey(0)
    k_x, k_p = jax.random.split(key)
    x = jax.random.normal(k_x, (B, N, dim), dtype=jnp.float32)
    params = init_params(k_p, dim, num_heads, mlp_ratio)

    out = block_forward(x, params, num_heads=num_heads)
    out = jax.block_until_ready(out)

    ref = block_reference(x, params, num_heads=num_heads)
    assert out.shape == (B, N, dim)
    assert jnp.allclose(out, ref, rtol=2e-3, atol=2e-3), (
        f"max abs err {jnp.max(jnp.abs(out - ref))}"
    )
    print("KERNEL_OK")
</pallas_src>

<mosaic_0001>
module attributes {stable_mosaic.version = 11 : i64} {
  func.func @_block_kernel(%arg0: i32, %arg1: memref<128x32xf32, #tpu.memory_space<vmem>>, %arg2: memref<1x32xf32, #tpu.memory_space<vmem>>, %arg3: memref<1x32xf32, #tpu.memory_space<vmem>>, %arg4: memref<32x96xbf16, #tpu.memory_space<vmem>>, %arg5: memref<32x32xbf16, #tpu.memory_space<vmem>>, %arg6: memref<1x32xf32, #tpu.memory_space<vmem>>, %arg7: memref<1x32xf32, #tpu.memory_space<vmem>>, %arg8: memref<1x32xf32, #tpu.memory_space<vmem>>, %arg9: memref<32x128xbf16, #tpu.memory_space<vmem>>, %arg10: memref<1x128xf32, #tpu.memory_space<vmem>>, %arg11: memref<128x32xbf16, #tpu.memory_space<vmem>>, %arg12: memref<1x32xf32, #tpu.memory_space<vmem>>, %arg13: memref<128x32xf32, #tpu.memory_space<vmem>>) attributes {dimension_semantics = [#tpu.dimension_semantics<parallel>], iteration_bounds = array<i64: 1>, scalar_prefetch = 0 : i64, scratch_operands = 0 : i64, tpu.core_type = #tpu.core_type<tc>, window_params = [{transform_indices = @transform_0, window_bounds = array<i64: 128, 32>}, {pipeline_mode = #tpu.pipeline_mode<synchronous>, transform_indices = @transform_1, window_bounds = array<i64: 1, 32>}, {pipeline_mode = #tpu.pipeline_mode<synchronous>, transform_indices = @transform_2, window_bounds = array<i64: 1, 32>}, {pipeline_mode = #tpu.pipeline_mode<synchronous>, transform_indices = @transform_3, window_bounds = array<i64: 32, 96>}, {pipeline_mode = #tpu.pipeline_mode<synchronous>, transform_indices = @transform_4, window_bounds = array<i64: 32, 32>}, {pipeline_mode = #tpu.pipeline_mode<synchronous>, transform_indices = @transform_5, window_bounds = array<i64: 1, 32>}, {pipeline_mode = #tpu.pipeline_mode<synchronous>, transform_indices = @transform_6, window_bounds = array<i64: 1, 32>}, {pipeline_mode = #tpu.pipeline_mode<synchronous>, transform_indices = @transform_7, window_bounds = array<i64: 1, 32>}, {pipeline_mode = #tpu.pipeline_mode<synchronous>, transform_indices = @transform_8, window_bounds = array<i64: 32, 128>}, {pipeline_mode = #tpu.pipeline_mode<synchronous>, transform_indices = @transform_9, window_bounds = array<i64: 1, 128>}, {pipeline_mode = #tpu.pipeline_mode<synchronous>, transform_indices = @transform_10, window_bounds = array<i64: 128, 32>}, {pipeline_mode = #tpu.pipeline_mode<synchronous>, transform_indices = @transform_11, window_bounds = array<i64: 1, 32>}, {transform_indices = @transform_12, window_bounds = array<i64: 128, 32>}]} {
    %c0 = arith.constant 0 : index
    %c0_0 = arith.constant 0 : index
    %0 = vector.load %arg1[%c0, %c0_0] : memref<128x32xf32, #tpu.memory_space<vmem>>, vector<128x32xf32>
    %c0_1 = arith.constant 0 : index
    %c0_2 = arith.constant 0 : index
    %1 = vector.load %arg2[%c0_1, %c0_2] : memref<1x32xf32, #tpu.memory_space<vmem>>, vector<1x32xf32>
    %c0_3 = arith.constant 0 : index
    %c0_4 = arith.constant 0 : index
    %2 = vector.load %arg3[%c0_3, %c0_4] : memref<1x32xf32, #tpu.memory_space<vmem>>, vector<1x32xf32>
    %cst = arith.constant dense<0.000000e+00> : vector<128xf32>
    %3 = vector.multi_reduction <add>, %0, %cst [1] : vector<128x32xf32> to vector<128xf32>
    %4 = vector.shape_cast %3 : vector<128xf32> to vector<128x1xf32>
    %cst_5 = arith.constant 3.200000e+01 : f32
    %5 = vector.broadcast %cst_5 : f32 to vector<128x1xf32>
    %6 = arith.divf %4, %5 : vector<128x1xf32>
    %7 = arith.mulf %0, %0 : vector<128x32xf32>
    %cst_6 = arith.constant dense<0.000000e+00> : vector<128xf32>
    %8 = vector.multi_reduction <add>, %7, %cst_6 [1] : vector<128x32xf32> to vector<128xf32>
    %9 = vector.shape_cast %8 : vector<128xf32> to vector<128x1xf32>
    %cst_7 = arith.constant 3.200000e+01 : f32
    %10 = vector.broadcast %cst_7 : f32 to vector<128x1xf32>
    %11 = arith.divf %9, %10 : vector<128x1xf32>
    %12 = arith.mulf %6, %6 : vector<128x1xf32>
    %13 = arith.subf %11, %12 : vector<128x1xf32>
    %14 = vector.broadcast %6 : vector<128x1xf32> to vector<128x32xf32>
    %15 = arith.subf %0, %14 : vector<128x32xf32>
    %cst_8 = arith.constant 9.99999974E-6 : f32
    %16 = vector.broadcast %cst_8 : f32 to vector<128x1xf32>
    %17 = arith.addf %13, %16 : vector<128x1xf32>
    %18 = math.rsqrt %17 : vector<128x1xf32>
    %19 = vector.broadcast %18 : vector<128x1xf32> to vector<128x32xf32>
    %20 = arith.mulf %15, %19 : vector<128x32xf32>
    %21 = vector.broadcast %1 : vector<1x32xf32> to vector<128x32xf32>
    %22 = arith.mulf %20, %21 : vector<128x32xf32>
    %23 = vector.broadcast %2 : vector<1x32xf32> to vector<128x32xf32>
    %24 = arith.addf %22, %23 : vector<128x32xf32>
    %25 = arith.truncf %24 : vector<128x32xf32> to vector<128x32xbf16>
    %c0_9 = arith.constant 0 : index
    %c0_10 = arith.constant 0 : index
    %26 = vector.load %arg4[%c0_9, %c0_10] : memref<32x96xbf16, #tpu.memory_space<vmem>>, vector<32x96xbf16>
    %cst_11 = arith.constant dense<0.000000e+00> : vector<128x96xf32>
    %27 = tpu.matmul %25, %26, %cst_11 {dimension_numbers = #tpu.dot_dimension_numbers<[1], [0], [0], [1], [0, 0, 1, 1], [], []>} : vector<128x32xbf16>, vector<32x96xbf16>, vector<128x96xf32> -> vector<128x96xf32>
    %28 = arith.truncf %27 : vector<128x96xf32> to vector<128x96xbf16>
    %29 = vector.extract_strided_slice %28 {offsets = [0, 0], sizes = [128, 32], strides = [1, 1]} : vector<128x96xbf16> to vector<128x32xbf16>
    %30 = vector.extract_strided_slice %28 {offsets = [0, 32], sizes = [128, 32], strides = [1, 1]} : vector<128x96xbf16> to vector<128x32xbf16>
    %31 = vector.extract_strided_slice %28 {offsets = [0, 64], sizes = [128, 32], strides = [1, 1]} : vector<128x96xbf16> to vector<128x32xbf16>
    %32 = vector.extract_strided_slice %29 {offsets = [0, 0], sizes = [64, 8], strides = [1, 1]} : vector<128x32xbf16> to vector<64x8xbf16>
    %33 = vector.extract_strided_slice %30 {offsets = [0, 0], sizes = [64, 8], strides = [1, 1]} : vector<128x32xbf16> to vector<64x8xbf16>
    %34 = vector.extract_strided_slice %31 {offsets = [0, 0], sizes = [64, 8], strides = [1, 1]} : vector<128x32xbf16> to vector<64x8xbf16>
    %cst_12 = arith.constant dense<0.000000e+00> : vector<64x64xf32>
    %35 = tpu.matmul %32, %33, %cst_12 {dimension_numbers = #tpu.dot_dimension_numbers<[1], [1], [0], [0], [0, 0, 1, 0], [], []>} : vector<64x8xbf16>, vector<64x8xbf16>, vector<64x64xf32> -> vector<64x64xf32>
    %cst_13 = arith.constant dense<0xFF800000> : vector<64xf32>
    %36 = vector.multi_reduction <maximumf>, %35, %cst_13 [1] : vector<64x64xf32> to vector<64xf32>
    %37 = vector.shape_cast %36 : vector<64xf32> to vector<64x1xf32>
    %38 = vector.broadcast %37 : vector<64x1xf32> to vector<64x64xf32>
    %39 = arith.subf %35, %38 : vector<64x64xf32>
    %40 = math.exp %39 : vector<64x64xf32>
    %cst_14 = arith.constant dense<0.000000e+00> : vector<64xf32>
    %41 = vector.multi_reduction <add>, %40, %cst_14 [1] : vector<64x64xf32> to vector<64xf32>
    %42 = vector.shape_cast %41 : vector<64xf32> to vector<64x1xf32>
    %43 = tpu.reciprocal %42 {approx = true} : vector<64x1xf32> -> vector<64x1xf32>
    %44 = vector.broadcast %43 : vector<64x1xf32> to vector<64x64xf32>
    %45 = arith.mulf %40, %44 : vector<64x64xf32>
    %46 = arith.truncf %45 : vector<64x64xf32> to vector<64x64xbf16>
    %cst_15 = arith.constant dense<0.000000e+00> : vector<64x8xf32>
    %47 = tpu.matmul %46, %34, %cst_15 {dimension_numbers = #tpu.dot_dimension_numbers<[1], [0], [0], [1], [0, 0, 1, 1], [], []>} : vector<64x64xbf16>, vector<64x8xbf16>, vector<64x8xf32> -> vector<64x8xf32>
    %48 = vector.extract_strided_slice %29 {offsets = [0, 8], sizes = [64, 8], strides = [1, 1]} : vector<128x32xbf16> to vector<64x8xbf16>
    %49 = vector.extract_strided_slice %30 {offsets = [0, 8], sizes = [64, 8], strides = [1, 1]} : vector<128x32xbf16> to vector<64x8xbf16>
    %50 = vector.extract_strided_slice %31 {offsets = [0, 8], sizes = [64, 8], strides = [1, 1]} : vector<128x32xbf16> to vector<64x8xbf16>
    %cst_16 = arith.constant dense<0.000000e+00> : vector<64x64xf32>
    %51 = tpu.matmul %48, %49, %cst_16 {dimension_numbers = #tpu.dot_dimension_numbers<[1], [1], [0], [0], [0, 0, 1, 0], [], []>} : vector<64x8xbf16>, vector<64x8xbf16>, vector<64x64xf32> -> vector<64x64xf32>
    %cst_17 = arith.constant dense<0xFF800000> : vector<64xf32>
    %52 = vector.multi_reduction <maximumf>, %51, %cst_17 [1] : vector<64x64xf32> to vector<64xf32>
    %53 = vector.shape_cast %52 : vector<64xf32> to vector<64x1xf32>
    %54 = vector.broadcast %53 : vector<64x1xf32> to vector<64x64xf32>
    %55 = arith.subf %51, %54 : vector<64x64xf32>
    %56 = math.exp %55 : vector<64x64xf32>
    %cst_18 = arith.constant dense<0.000000e+00> : vector<64xf32>
    %57 = vector.multi_reduction <add>, %56, %cst_18 [1] : vector<64x64xf32> to vector<64xf32>
    %58 = vector.shape_cast %57 : vector<64xf32> to vector<64x1xf32>
    %59 = tpu.reciprocal %58 {approx = true} : vector<64x1xf32> -> vector<64x1xf32>
    %60 = vector.broadcast %59 : vector<64x1xf32> to vector<64x64xf32>
    %61 = arith.mulf %56, %60 : vector<64x64xf32>
    %62 = arith.truncf %61 : vector<64x64xf32> to vector<64x64xbf16>
    %cst_19 = arith.constant dense<0.000000e+00> : vector<64x8xf32>
    %63 = tpu.matmul %62, %50, %cst_19 {dimension_numbers = #tpu.dot_dimension_numbers<[1], [0], [0], [1], [0, 0, 1, 1], [], []>} : vector<64x64xbf16>, vector<64x8xbf16>, vector<64x8xf32> -> vector<64x8xf32>
    %64 = vector.extract_strided_slice %29 {offsets = [0, 16], sizes = [64, 8], strides = [1, 1]} : vector<128x32xbf16> to vector<64x8xbf16>
    %65 = vector.extract_strided_slice %30 {offsets = [0, 16], sizes = [64, 8], strides = [1, 1]} : vector<128x32xbf16> to vector<64x8xbf16>
    %66 = vector.extract_strided_slice %31 {offsets = [0, 16], sizes = [64, 8], strides = [1, 1]} : vector<128x32xbf16> to vector<64x8xbf16>
    %cst_20 = arith.constant dense<0.000000e+00> : vector<64x64xf32>
    %67 = tpu.matmul %64, %65, %cst_20 {dimension_numbers = #tpu.dot_dimension_numbers<[1], [1], [0], [0], [0, 0, 1, 0], [], []>} : vector<64x8xbf16>, vector<64x8xbf16>, vector<64x64xf32> -> vector<64x64xf32>
    %cst_21 = arith.constant dense<0xFF800000> : vector<64xf32>
    %68 = vector.multi_reduction <maximumf>, %67, %cst_21 [1] : vector<64x64xf32> to vector<64xf32>
    %69 = vector.shape_cast %68 : vector<64xf32> to vector<64x1xf32>
    %70 = vector.broadcast %69 : vector<64x1xf32> to vector<64x64xf32>
    %71 = arith.subf %67, %70 : vector<64x64xf32>
    %72 = math.exp %71 : vector<64x64xf32>
    %cst_22 = arith.constant dense<0.000000e+00> : vector<64xf32>
    %73 = vector.multi_reduction <add>, %72, %cst_22 [1] : vector<64x64xf32> to vector<64xf32>
    %74 = vector.shape_cast %73 : vector<64xf32> to vector<64x1xf32>
    %75 = tpu.reciprocal %74 {approx = true} : vector<64x1xf32> -> vector<64x1xf32>
    %76 = vector.broadcast %75 : vector<64x1xf32> to vector<64x64xf32>
    %77 = arith.mulf %72, %76 : vector<64x64xf32>
    %78 = arith.truncf %77 : vector<64x64xf32> to vector<64x64xbf16>
    %cst_23 = arith.constant dense<0.000000e+00> : vector<64x8xf32>
    %79 = tpu.matmul %78, %66, %cst_23 {dimension_numbers = #tpu.dot_dimension_numbers<[1], [0], [0], [1], [0, 0, 1, 1], [], []>} : vector<64x64xbf16>, vector<64x8xbf16>, vector<64x8xf32> -> vector<64x8xf32>
    %80 = vector.extract_strided_slice %29 {offsets = [0, 24], sizes = [64, 8], strides = [1, 1]} : vector<128x32xbf16> to vector<64x8xbf16>
    %81 = vector.extract_strided_slice %30 {offsets = [0, 24], sizes = [64, 8], strides = [1, 1]} : vector<128x32xbf16> to vector<64x8xbf16>
    %82 = vector.extract_strided_slice %31 {offsets = [0, 24], sizes = [64, 8], strides = [1, 1]} : vector<128x32xbf16> to vector<64x8xbf16>
    %cst_24 = arith.constant dense<0.000000e+00> : vector<64x64xf32>
    %83 = tpu.matmul %80, %81, %cst_24 {dimension_numbers = #tpu.dot_dimension_numbers<[1], [1], [0], [0], [0, 0, 1, 0], [], []>} : vector<64x8xbf16>, vector<64x8xbf16>, vector<64x64xf32> -> vector<64x64xf32>
    %cst_25 = arith.constant dense<0xFF800000> : vector<64xf32>
    %84 = vector.multi_reduction <maximumf>, %83, %cst_25 [1] : vector<64x64xf32> to vector<64xf32>
    %85 = vector.shape_cast %84 : vector<64xf32> to vector<64x1xf32>
    %86 = vector.broadcast %85 : vector<64x1xf32> to vector<64x64xf32>
    %87 = arith.subf %83, %86 : vector<64x64xf32>
    %88 = math.exp %87 : vector<64x64xf32>
    %cst_26 = arith.constant dense<0.000000e+00> : vector<64xf32>
    %89 = vector.multi_reduction <add>, %88, %cst_26 [1] : vector<64x64xf32> to vector<64xf32>
    %90 = vector.shape_cast %89 : vector<64xf32> to vector<64x1xf32>
    %91 = tpu.reciprocal %90 {approx = true} : vector<64x1xf32> -> vector<64x1xf32>
    %92 = vector.broadcast %91 : vector<64x1xf32> to vector<64x64xf32>
    %93 = arith.mulf %88, %92 : vector<64x64xf32>
    %94 = arith.truncf %93 : vector<64x64xf32> to vector<64x64xbf16>
    %cst_27 = arith.constant dense<0.000000e+00> : vector<64x8xf32>
    %95 = tpu.matmul %94, %82, %cst_27 {dimension_numbers = #tpu.dot_dimension_numbers<[1], [0], [0], [1], [0, 0, 1, 1], [], []>} : vector<64x64xbf16>, vector<64x8xbf16>, vector<64x8xf32> -> vector<64x8xf32>
    %96 = tpu.concatenate %47, %63, %79, %95 in 1 : vector<64x8xf32>, vector<64x8xf32>, vector<64x8xf32>, vector<64x8xf32> -> vector<64x32xf32>
    %97 = vector.extract_strided_slice %29 {offsets = [64, 0], sizes = [64, 8], strides = [1, 1]} : vector<128x32xbf16> to vector<64x8xbf16>
    %98 = vector.extract_strided_slice %30 {offsets = [64, 0], sizes = [64, 8], strides = [1, 1]} : vector<128x32xbf16> to vector<64x8xbf16>
    %99 = vector.extract_strided_slice %31 {offsets = [64, 0], sizes = [64, 8], strides = [1, 1]} : vector<128x32xbf16> to vector<64x8xbf16>
    %cst_28 = arith.constant dense<0.000000e+00> : vector<64x64xf32>
    %100 = tpu.matmul %97, %98, %cst_28 {dimension_numbers = #tpu.dot_dimension_numbers<[1], [1], [0], [0], [0, 0, 1, 0], [], []>} : vector<64x8xbf16>, vector<64x8xbf16>, vector<64x64xf32> -> vector<64x64xf32>
    %cst_29 = arith.constant dense<0xFF800000> : vector<64xf32>
    %101 = vector.multi_reduction <maximumf>, %100, %cst_29 [1] : vector<64x64xf32> to vector<64xf32>
    %102 = vector.shape_cast %101 : vector<64xf32> to vector<64x1xf32>
    %103 = vector.broadcast %102 : vector<64x1xf32> to vector<64x64xf32>
    %104 = arith.subf %100, %103 : vector<64x64xf32>
    %105 = math.exp %104 : vector<64x64xf32>
    %cst_30 = arith.constant dense<0.000000e+00> : vector<64xf32>
    %106 = vector.multi_reduction <add>, %105, %cst_30 [1] : vector<64x64xf32> to vector<64xf32>
    %107 = vector.shape_cast %106 : vector<64xf32> to vector<64x1xf32>
    %108 = tpu.reciprocal %107 {approx = true} : vector<64x1xf32> -> vector<64x1xf32>
    %109 = vector.broadcast %108 : vector<64x1xf32> to vector<64x64xf32>
    %110 = arith.mulf %105, %109 : vector<64x64xf32>
    %111 = arith.truncf %110 : vector<64x64xf32> to vector<64x64xbf16>
    %cst_31 = arith.constant dense<0.000000e+00> : vector<64x8xf32>
    %112 = tpu.matmul %111, %99, %cst_31 {dimension_numbers = #tpu.dot_dimension_numbers<[1], [0], [0], [1], [0, 0, 1, 1], [], []>} : vector<64x64xbf16>, vector<64x8xbf16>, vector<64x8xf32> -> vector<64x8xf32>
    %113 = vector.extract_strided_slice %29 {offsets = [64, 8], sizes = [64, 8], strides = [1, 1]} : vector<128x32xbf16> to vector<64x8xbf16>
    %114 = vector.extract_strided_slice %30 {offsets = [64, 8], sizes = [64, 8], strides = [1, 1]} : vector<128x32xbf16> to vector<64x8xbf16>
    %115 = vector.extract_strided_slice %31 {offsets = [64, 8], sizes = [64, 8], strides = [1, 1]} : vector<128x32xbf16> to vector<64x8xbf16>
    %cst_32 = arith.constant dense<0.000000e+00> : vector<64x64xf32>
    %116 = tpu.matmul %113, %114, %cst_32 {dimension_numbers = #tpu.dot_dimension_numbers<[1], [1], [0], [0], [0, 0, 1, 0], [], []>} : vector<64x8xbf16>, vector<64x8xbf16>, vector<64x64xf32> -> vector<64x64xf32>
    %cst_33 = arith.constant dense<0xFF800000> : vector<64xf32>
    %117 = vector.multi_reduction <maximumf>, %116, %cst_33 [1] : vector<64x64xf32> to vector<64xf32>
    %118 = vector.shape_cast %117 : vector<64xf32> to vector<64x1xf32>
    %119 = vector.broadcast %118 : vector<64x1xf32> to vector<64x64xf32>
    %120 = arith.subf %116, %119 : vector<64x64xf32>
    %121 = math.exp %120 : vector<64x64xf32>
    %cst_34 = arith.constant dense<0.000000e+00> : vector<64xf32>
    %122 = vector.multi_reduction <add>, %121, %cst_34 [1] : vector<64x64xf32> to vector<64xf32>
    %123 = vector.shape_cast %122 : vector<64xf32> to vector<64x1xf32>
    %124 = tpu.reciprocal %123 {approx = true} : vector<64x1xf32> -> vector<64x1xf32>
    %125 = vector.broadcast %124 : vector<64x1xf32> to vector<64x64xf32>
    %126 = arith.mulf %121, %125 : vector<64x64xf32>
    %127 = arith.truncf %126 : vector<64x64xf32> to vector<64x64xbf16>
    %cst_35 = arith.constant dense<0.000000e+00> : vector<64x8xf32>
    %128 = tpu.matmul %127, %115, %cst_35 {dimension_numbers = #tpu.dot_dimension_numbers<[1], [0], [0], [1], [0, 0, 1, 1], [], []>} : vector<64x64xbf16>, vector<64x8xbf16>, vector<64x8xf32> -> vector<64x8xf32>
    %129 = vector.extract_strided_slice %29 {offsets = [64, 16], sizes = [64, 8], strides = [1, 1]} : vector<128x32xbf16> to vector<64x8xbf16>
    %130 = vector.extract_strided_slice %30 {offsets = [64, 16], sizes = [64, 8], strides = [1, 1]} : vector<128x32xbf16> to vector<64x8xbf16>
    %131 = vector.extract_strided_slice %31 {offsets = [64, 16], sizes = [64, 8], strides = [1, 1]} : vector<128x32xbf16> to vector<64x8xbf16>
    %cst_36 = arith.constant dense<0.000000e+00> : vector<64x64xf32>
    %132 = tpu.matmul %129, %130, %cst_36 {dimension_numbers = #tpu.dot_dimension_numbers<[1], [1], [0], [0], [0, 0, 1, 0], [], []>} : vector<64x8xbf16>, vector<64x8xbf16>, vector<64x64xf32> -> vector<64x64xf32>
    %cst_37 = arith.constant dense<0xFF800000> : vector<64xf32>
    %133 = vector.multi_reduction <maximumf>, %132, %cst_37 [1] : vector<64x64xf32> to vector<64xf32>
    %134 = vector.shape_cast %133 : vector<64xf32> to vector<64x1xf32>
    %135 = vector.broadcast %134 : vector<64x1xf32> to vector<64x64xf32>
    %136 = arith.subf %132, %135 : vector<64x64xf32>
    %137 = math.exp %136 : vector<64x64xf32>
    %cst_38 = arith.constant dense<0.000000e+00> : vector<64xf32>
    %138 = vector.multi_reduction <add>, %137, %cst_38 [1] : vector<64x64xf32> to vector<64xf32>
    %139 = vector.shape_cast %138 : vector<64xf32> to vector<64x1xf32>
    %140 = tpu.reciprocal %139 {approx = true} : vector<64x1xf32> -> vector<64x1xf32>
    %141 = vector.broadcast %140 : vector<64x1xf32> to vector<64x64xf32>
    %142 = arith.mulf %137, %141 : vector<64x64xf32>
    %143 = arith.truncf %142 : vector<64x64xf32> to vector<64x64xbf16>
    %cst_39 = arith.constant dense<0.000000e+00> : vector<64x8xf32>
    %144 = tpu.matmul %143, %131, %cst_39 {dimension_numbers = #tpu.dot_dimension_numbers<[1], [0], [0], [1], [0, 0, 1, 1], [], []>} : vector<64x64xbf16>, vector<64x8xbf16>, vector<64x8xf32> -> vector<64x8xf32>
    %145 = vector.extract_strided_slice %29 {offsets = [64, 24], sizes = [64, 8], strides = [1, 1]} : vector<128x32xbf16> to vector<64x8xbf16>
    %146 = vector.extract_strided_slice %30 {offsets = [64, 24], sizes = [64, 8], strides = [1, 1]} : vector<128x32xbf16> to vector<64x8xbf16>
    %147 = vector.extract_strided_slice %31 {offsets = [64, 24], sizes = [64, 8], strides = [1, 1]} : vector<128x32xbf16> to vector<64x8xbf16>
    %cst_40 = arith.constant dense<0.000000e+00> : vector<64x64xf32>
    %148 = tpu.matmul %145, %146, %cst_40 {dimension_numbers = #tpu.dot_dimension_numbers<[1], [1], [0], [0], [0, 0, 1, 0], [], []>} : vector<64x8xbf16>, vector<64x8xbf16>, vector<64x64xf32> -> vector<64x64xf32>
    %cst_41 = arith.constant dense<0xFF800000> : vector<64xf32>
    %149 = vector.multi_reduction <maximumf>, %148, %cst_41 [1] : vector<64x64xf32> to vector<64xf32>
    %150 = vector.shape_cast %149 : vector<64xf32> to vector<64x1xf32>
    %151 = vector.broadcast %150 : vector<64x1xf32> to vector<64x64xf32>
    %152 = arith.subf %148, %151 : vector<64x64xf32>
    %153 = math.exp %152 : vector<64x64xf32>
    %cst_42 = arith.constant dense<0.000000e+00> : vector<64xf32>
    %154 = vector.multi_reduction <add>, %153, %cst_42 [1] : vector<64x64xf32> to vector<64xf32>
    %155 = vector.shape_cast %154 : vector<64xf32> to vector<64x1xf32>
    %156 = tpu.reciprocal %155 {approx = true} : vector<64x1xf32> -> vector<64x1xf32>
    %157 = vector.broadcast %156 : vector<64x1xf32> to vector<64x64xf32>
    %158 = arith.mulf %153, %157 : vector<64x64xf32>
    %159 = arith.truncf %158 : vector<64x64xf32> to vector<64x64xbf16>
    %cst_43 = arith.constant dense<0.000000e+00> : vector<64x8xf32>
    %160 = tpu.matmul %159, %147, %cst_43 {dimension_numbers = #tpu.dot_dimension_numbers<[1], [0], [0], [1], [0, 0, 1, 1], [], []>} : vector<64x64xbf16>, vector<64x8xbf16>, vector<64x8xf32> -> vector<64x8xf32>
    %161 = tpu.concatenate %112, %128, %144, %160 in 1 : vector<64x8xf32>, vector<64x8xf32>, vector<64x8xf32>, vector<64x8xf32> -> vector<64x32xf32>
    %162 = tpu.concatenate %96, %161 in 0 : vector<64x32xf32>, vector<64x32xf32> -> vector<128x32xf32>
    %163 = arith.truncf %162 : vector<128x32xf32> to vector<128x32xbf16>
    %c0_44 = arith.constant 0 : index
    %c0_45 = arith.constant 0 : index
    %164 = vector.load %arg5[%c0_44, %c0_45] : memref<32x32xbf16, #tpu.memory_space<vmem>>, vector<32x32xbf16>
    %cst_46 = arith.constant dense<0.000000e+00> : vector<128x32xf32>
    %165 = tpu.matmul %163, %164, %cst_46 {dimension_numbers = #tpu.dot_dimension_numbers<[1], [0], [0], [1], [0, 0, 1, 1], [], []>} : vector<128x32xbf16>, vector<32x32xbf16>, vector<128x32xf32> -> vector<128x32xf32>
    %c0_47 = arith.constant 0 : index
    %c0_48 = arith.constant 0 : index
    %166 = vector.load %arg6[%c0_47, %c0_48] : memref<1x32xf32, #tpu.memory_space<vmem>>, vector<1x32xf32>
    %167 = vector.broadcast %166 : vector<1x32xf32> to vector<128x32xf32>
    %168 = arith.addf %165, %167 : vector<128x32xf32>
    %169 = arith.addf %0, %168 : vector<128x32xf32>
    %c0_49 = arith.constant 0 : index
    %c0_50 = arith.constant 0 : index
    %170 = vector.load %arg7[%c0_49, %c0_50] : memref<1x32xf32, #tpu.memory_space<vmem>>, vector<1x32xf32>
    %c0_51 = arith.constant 0 : index
    %c0_52 = arith.constant 0 : index
    %171 = vector.load %arg8[%c0_51, %c0_52] : memref<1x32xf32, #tpu.memory_space<vmem>>, vector<1x32xf32>
    %cst_53 = arith.constant dense<0.000000e+00> : vector<128xf32>
    %172 = vector.multi_reduction <add>, %169, %cst_53 [1] : vector<128x32xf32> to vector<128xf32>
    %173 = vector.shape_cast %172 : vector<128xf32> to vector<128x1xf32>
    %cst_54 = arith.constant 3.200000e+01 : f32
    %174 = vector.broadcast %cst_54 : f32 to vector<128x1xf32>
    %175 = arith.divf %173, %174 : vector<128x1xf32>
    %176 = arith.mulf %169, %169 : vector<128x32xf32>
    %cst_55 = arith.constant dense<0.000000e+00> : vector<128xf32>
    %177 = vector.multi_reduction <add>, %176, %cst_55 [1] : vector<128x32xf32> to vector<128xf32>
    %178 = vector.shape_cast %177 : vector<128xf32> to vector<128x1xf32>
    %cst_56 = arith.constant 3.200000e+01 : f32
    %179 = vector.broadcast %cst_56 : f32 to vector<128x1xf32>
    %180 = arith.divf %178, %179 : vector<128x1xf32>
    %181 = arith.mulf %175, %175 : vector<128x1xf32>
    %182 = arith.subf %180, %181 : vector<128x1xf32>
    %183 = vector.broadcast %175 : vector<128x1xf32> to vector<128x32xf32>
    %184 = arith.subf %169, %183 : vector<128x32xf32>
    %cst_57 = arith.constant 9.99999974E-6 : f32
    %185 = vector.broadcast %cst_57 : f32 to vector<128x1xf32>
    %186 = arith.addf %182, %185 : vector<128x1xf32>
    %187 = math.rsqrt %186 : vector<128x1xf32>
    %188 = vector.broadcast %187 : vector<128x1xf32> to vector<128x32xf32>
    %189 = arith.mulf %184, %188 : vector<128x32xf32>
    %190 = vector.broadcast %170 : vector<1x32xf32> to vector<128x32xf32>
    %191 = arith.mulf %189, %190 : vector<128x32xf32>
    %192 = vector.broadcast %171 : vector<1x32xf32> to vector<128x32xf32>
    %193 = arith.addf %191, %192 : vector<128x32xf32>
    %194 = arith.truncf %193 : vector<128x32xf32> to vector<128x32xbf16>
    %c0_58 = arith.constant 0 : index
    %c0_59 = arith.constant 0 : index
    %195 = vector.load %arg9[%c0_58, %c0_59] : memref<32x128xbf16, #tpu.memory_space<vmem>>, vector<32x128xbf16>
    %cst_60 = arith.constant dense<0.000000e+00> : vector<128x128xf32>
    %196 = tpu.matmul %194, %195, %cst_60 {dimension_numbers = #tpu.dot_dimension_numbers<[1], [0], [0], [1], [0, 0, 1, 1], [], []>} : vector<128x32xbf16>, vector<32x128xbf16>, vector<128x128xf32> -> vector<128x128xf32>
    %c0_61 = arith.constant 0 : index
    %c0_62 = arith.constant 0 : index
    %197 = vector.load %arg10[%c0_61, %c0_62] : memref<1x128xf32, #tpu.memory_space<vmem>>, vector<1x128xf32>
    %198 = vector.broadcast %197 : vector<1x128xf32> to vector<128x128xf32>
    %199 = arith.addf %196, %198 : vector<128x128xf32>
    %200 = arith.mulf %199, %199 : vector<128x128xf32>
    %201 = arith.mulf %199, %200 : vector<128x128xf32>
    %cst_63 = arith.constant 4.471500e-02 : f32
    %202 = vector.broadcast %cst_63 : f32 to vector<128x128xf32>
    %203 = arith.mulf %202, %201 : vector<128x128xf32>
    %204 = arith.addf %199, %203 : vector<128x128xf32>
    %cst_64 = arith.constant 0.797884583 : f32
    %205 = vector.broadcast %cst_64 : f32 to vector<128x128xf32>
    %206 = arith.mulf %205, %204 : vector<128x128xf32>
    %207 = math.tanh %206 : vector<128x128xf32>
    %cst_65 = arith.constant 1.000000e+00 : f32
    %208 = vector.broadcast %cst_65 : f32 to vector<128x128xf32>
    %209 = arith.addf %208, %207 : vector<128x128xf32>
    %cst_66 = arith.constant 5.000000e-01 : f32
    %210 = vector.broadcast %cst_66 : f32 to vector<128x128xf32>
    %211 = arith.mulf %210, %209 : vector<128x128xf32>
    %212 = arith.mulf %199, %211 : vector<128x128xf32>
    %213 = arith.truncf %212 : vector<128x128xf32> to vector<128x128xbf16>
    %c0_67 = arith.constant 0 : index
    %c0_68 = arith.constant 0 : index
    %214 = vector.load %arg11[%c0_67, %c0_68] : memref<128x32xbf16, #tpu.memory_space<vmem>>, vector<128x32xbf16>
    %cst_69 = arith.constant dense<0.000000e+00> : vector<128x32xf32>
    %215 = tpu.matmul %213, %214, %cst_69 {dimension_numbers = #tpu.dot_dimension_numbers<[1], [0], [0], [1], [0, 0, 1, 1], [], []>} : vector<128x128xbf16>, vector<128x32xbf16>, vector<128x32xf32> -> vector<128x32xf32>
    %c0_70 = arith.constant 0 : index
    %c0_71 = arith.constant 0 : index
    %216 = vector.load %arg12[%c0_70, %c0_71] : memref<1x32xf32, #tpu.memory_space<vmem>>, vector<1x32xf32>
    %217 = vector.broadcast %216 : vector<1x32xf32> to vector<128x32xf32>
    %218 = arith.addf %215, %217 : vector<128x32xf32>
    %219 = arith.addf %169, %218 : vector<128x32xf32>
    %c0_72 = arith.constant 0 : index
    %c0_73 = arith.constant 0 : index
    %220 = vector.load %arg13[%c0_72, %c0_73] : memref<128x32xf32, #tpu.memory_space<vmem>>, vector<128x32xf32>
    tpu.vector_store %arg13[%c0_72, %c0_73], %219 {strides = array<i32>} : memref<128x32xf32, #tpu.memory_space<vmem>>, vector<128x32xf32>,
    return
  }
  func.func @transform_0(%arg0: i32) -> (i32, i32) {
    %c0_i32 = arith.constant 0 : i32
    %c0_i32_0 = arith.constant 0 : i32
    return %arg0, %c0_i32 : i32, i32
  }
  func.func @transform_1(%arg0: i32) -> (i32, i32) {
    %c0_i32 = arith.constant 0 : i32
    %c0_i32_0 = arith.constant 0 : i32
    %c0_i32_1 = arith.constant 0 : i32
    return %c0_i32, %c0_i32_0 : i32, i32
  }
  func.func @transform_2(%arg0: i32) -> (i32, i32) {
    %c0_i32 = arith.constant 0 : i32
    %c0_i32_0 = arith.constant 0 : i32
    %c0_i32_1 = arith.constant 0 : i32
    return %c0_i32, %c0_i32_0 : i32, i32
  }
  func.func @transform_3(%arg0: i32) -> (i32, i32) {
    %c0_i32 = arith.constant 0 : i32
    %c0_i32_0 = arith.constant 0 : i32
    %c0_i32_1 = arith.constant 0 : i32
    return %c0_i32, %c0_i32_0 : i32, i32
  }
  func.func @transform_4(%arg0: i32) -> (i32, i32) {
    %c0_i32 = arith.constant 0 : i32
    %c0_i32_0 = arith.constant 0 : i32
    %c0_i32_1 = arith.constant 0 : i32
    return %c0_i32, %c0_i32_0 : i32, i32
  }
  func.func @transform_5(%arg0: i32) -> (i32, i32) {
    %c0_i32 = arith.constant 0 : i32
    %c0_i32_0 = arith.constant 0 : i32
    %c0_i32_1 = arith.constant 0 : i32
    return %c0_i32, %c0_i32_0 : i32, i32
  }
  func.func @transform_6(%arg0: i32) -> (i32, i32) {
    %c0_i32 = arith.constant 0 : i32
    %c0_i32_0 = arith.constant 0 : i32
    %c0_i32_1 = arith.constant 0 : i32
    return %c0_i32, %c0_i32_0 : i32, i32
  }
  func.func @transform_7(%arg0: i32) -> (i32, i32) {
    %c0_i32 = arith.constant 0 : i32
    %c0_i32_0 = arith.constant 0 : i32
    %c0_i32_1 = arith.constant 0 : i32
    return %c0_i32, %c0_i32_0 : i32, i32
  }
  func.func @transform_8(%arg0: i32) -> (i32, i32) {
    %c0_i32 = arith.constant 0 : i32
    %c0_i32_0 = arith.constant 0 : i32
    %c0_i32_1 = arith.constant 0 : i32
    return %c0_i32, %c0_i32_0 : i32, i32
  }
  func.func @transform_9(%arg0: i32) -> (i32, i32) {
    %c0_i32 = arith.constant 0 : i32
    %c0_i32_0 = arith.constant 0 : i32
    %c0_i32_1 = arith.constant 0 : i32
    return %c0_i32, %c0_i32_0 : i32, i32
  }
  func.func @transform_10(%arg0: i32) -> (i32, i32) {
    %c0_i32 = arith.constant 0 : i32
    %c0_i32_0 = arith.constant 0 : i32
    %c0_i32_1 = arith.constant 0 : i32
    return %c0_i32, %c0_i32_0 : i32, i32
  }
  func.func @transform_11(%arg0: i32) -> (i32, i32) {
    %c0_i32 = arith.constant 0 : i32
    %c0_i32_0 = arith.constant 0 : i32
    %c0_i32_1 = arith.constant 0 : i32
    return %c0_i32, %c0_i32_0 : i32, i32
  }
  func.func @transform_12(%arg0: i32) -> (i32, i32) {
    %c0_i32 = arith.constant 0 : i32
    %c0_i32_0 = arith.constant 0 : i32
    return %arg0, %c0_i32 : i32, i32
  }
}

</mosaic_0001>

<bundles_post_ra>
// kernel: tpu_custom_call.1
= control target key start
LH: loop header
LB: loop body
LE: loop exit
PB: predicated region body
PF: predicated region fallthrough
CT: control target
= control target key end

     0   :  { %vm60_vm0 = vcmask 261120   ;;  %v4200_v32 = vmov 32.0   ;;  %s4201_s22 = smov 120   ;;  %s4203_s23 = smov 96   ;;  %s6628_s0 = inlined_call_operand.vmem [shape: f32[128,32], index: 0, kind: input, shape index: {}]   ;;  %s6629_s1 = inlined_call_operand.vmem [shape: f32[1,32], index: 1, kind: input, shape index: {}]   ;;  %s6630_s2 = inlined_call_operand.vmem [shape: f32[1,32], index: 2, kind: input, shape index: {}]   ;;  %s6631_s3 = inlined_call_operand.vmem [shape: bf16[32,96], index: 3, kind: input, shape index: {}]   ;;  %s6632_s4 = inlined_call_operand.vmem [shape: bf16[32,32], index: 4, kind: input, shape index: {}]   ;;  %s6633_s5 = inlined_call_operand.vmem [shape: f32[1,32], index: 5, kind: input, shape index: {}]   ;;  %s6634_s6 = inlined_call_operand.vmem [shape: f32[1,32], index: 6, kind: input, shape index: {}]   ;;  %s6635_s7 = inlined_call_operand.vmem [shape: f32[1,32], index: 7, kind: input, shape index: {}]   ;;  %s6636_s8 = inlined_call_operand.vmem [shape: bf16[32,128], index: 8, kind: input, shape index: {}]   ;;  %s6637_s9 = inlined_call_operand.vmem [shape: f32[1,128], index: 9, kind: input, shape index: {}]   ;;  %s6638_s10 = inlined_call_operand.vmem [shape: bf16[128,32], index: 10, kind: input, shape index: {}]   ;;  %s6639_s11 = inlined_call_operand.vmem [shape: f32[1,32], index: 11, kind: input, shape index: {}]   ;;  %s6640_s12 = inlined_call_operand.vmem [shape: f32[128,32], index: 12, kind: output, shape index: {}]  }
   0x1   :  { %v4283_v0 = vld [vmem:[%s6628_s0] sm:$0xff]  ;;  %v4288_v1 = vld [vmem:[%s6628_s0 + $0x10] sm:$0xff]  ;;  %v4299_v5 = vld [vmem:[%s6628_s0 + $0x8] sm:$0xff]  ;;  %3830 = vrcp.f32 %v4200_v32  ;;  %s4204_s24 = smov 64   ;;  %s4205_s25 = smov 56  }
   0x2   :  { %v61_v2 = vsel %vm60_vm0, %v4283_v0, 0.0  ;;  %v67_v3 = vsel %vm60_vm0, %v4288_v1, 0.0  ;;  %v132_v4 = vmul.f32 %v4283_v0, %v4283_v0  ;;  %v4305_v7 = vld [vmem:[%s6628_s0 + $0x18] sm:$0xff]  ;;  %v133_v8 = vmul.f32 %v4299_v5, %v4299_v5  ;;  %v4319_v13 = vld [vmem:[%s6628_s0 + $0x20] sm:$0xff]  ;;  %v4329_v17 = vld [vmem:[%s6628_s0 + $0x28] sm:$0xff]  ;;  %s4206_s26 = smov 72  }
   0x3   :  { %62 = vadd.xlane.f32.xlu0 %v61_v2  ;;  %68 = vadd.xlane.f32.xlu2 %v67_v3  ;;  %v64_v9 = vsel %vm60_vm0, %v4299_v5, 0.0  ;;  %v70_v10 = vsel %vm60_vm0, %v4305_v7, 0.0  ;;  %v134_v12 = vmul.f32 %v4288_v1, %v4288_v1  ;;  %v135_v14 = vmul.f32 %v4305_v7, %v4305_v7  ;;  %v4343_v24 = vld [vmem:[%s6628_s0 + $0x30] sm:$0xff]  ;;  %v4350_v26 = vld [vmem:[%s6628_s0 + $0x38] sm:$0xff]  ;;  %v3675_v44 = vld [vmem:[%s6631_s3 + $0x8] sm:$0xff]  ;;  %s4209_s27 = smov 104  }
   0x4   :  { %v148_v6 = vsel %vm60_vm0, %v132_v4, 0.0  ;;  %v151_v11 = vsel %vm60_vm0, %v133_v8, 0.0  ;;  %v73_v16 = vsel %vm60_vm0, %v4319_v13, 0.0  ;;  %v137_v19 = vmul.f32 %v4329_v17, %v4329_v17  ;;  %544 = vmatpush.bf16.msra.mxu0 %v3675_v44  ;;  %v3674_v47 = vld [vmem:[%s6631_s3] sm:$0xff]  ;;  %s4202_s3 = smov 88   ;;  %s4210_s28 = smov 48  }
   0x5   :  { %149 = vadd.xlane.f32.xlu1 %v148_v6  ;;  %v154_v15 = vsel %vm60_vm0, %v134_v12, 0.0  ;;  %v157_v18 = vsel %vm60_vm0, %v135_v14, 0.0  ;;  %v136_v20 = vmul.f32 %v4319_v13, %v4319_v13  ;;  %v76_v21 = vsel %vm60_vm0, %v4329_v17, 0.0  ;;  %s4211_s29 = smov 40   ;;  %s4212_s30 = smov 8  }
   0x6   :  { %v163_v22 = vsel %vm60_vm0, %v137_v19, 0.0  ;;  %v138_v25 = vmul.f32 %v4343_v24, %v4343_v24  ;;  %v79_v27 = vsel %vm60_vm0, %v4343_v24, 0.0  ;;  %v82_v29 = vsel %vm60_vm0, %v4350_v26, 0.0  ;;  %s4213_s13 = smov 16   ;;  %s4214_s14 = smov 24  }
   0x7   :  { %v160_v23 = vsel %vm60_vm0, %v136_v20, 0.0  ;;  %v139_v30 = vmul.f32 %v4350_v26, %v4350_v26  ;;  %v3831_v33 = vpop.eup %3830 }
   0x8   :  { %v166_v28 = vsel %vm60_vm0, %v138_v25, 0.0  ;;  %v110_v34 = vmul.f32 32.0, %v3831_v33  ;;  %vm114_vm1 = vweird.f32 %v3831_v33  ;;  %545 = vmatpush.bf16.msra.mxu0 %v3674_v47 }
   0x9   :  { %v169_v31 = vsel %vm60_vm0, %v139_v30, 0.0 }
   0xa   :  { %v111_v35 = vsub.f32 1.0, %v110_v34 }
   0xb   :  { %65 = vadd.xlane.f32.xlu0 %v64_v9  ;;  %71 = vadd.xlane.f32.xlu2 %v70_v10 }
   0xc   :  { %v112_v36 = vmul.f32 %v3831_v33, %v111_v35 }
   0xd   :  { %152 = vadd.xlane.f32.xlu1 %v151_v11 }
   0xe   :  { %v113_v37 = vadd.f32 %v3831_v33, %v112_v36 }
  0x10   :  { %v4360_v38 = vsel %vm114_vm1, %v3831_v33, %v113_v37  ;;  %v4415_v33 = vld [vmem:[%s6628_s0 + $0x40] sm:$0xff] }
  0x11   :  { %6644 = vst [vmem:[#allocation2_spill] sm:$0xff] %v4360_v38 }
  0x13   :  { %155 = vadd.xlane.f32.xlu0 %v154_v15  ;;  %74 = vadd.xlane.f32.xlu2 %v73_v16 }
  0x15   :  { %158 = vadd.xlane.f32.xlu1 %v157_v18 }
  0x1b   :  { %77 = vadd.xlane.f32.xlu0 %v76_v21  ;;  %164 = vadd.xlane.f32.xlu2 %v163_v22 }
  0x1d   :  { %161 = vadd.xlane.f32.xlu1 %v160_v23 }
  0x23   :  { %80 = vadd.xlane.f32.xlu0 %v79_v27  ;;  %167 = vadd.xlane.f32.xlu2 %v166_v28 }
  0x25   :  { %83 = vadd.xlane.f32.xlu1 %v82_v29 }
  0x2b   :  { %170 = vadd.xlane.f32.xlu0 %v169_v31 }
  0x76   :  { %v63_v39 = vpop.xlane.xlu0 %62  ;;  %v69_v40 = vpop.xlane.xlu2 %68 }
  0x77   :  { %v4363_v41 = vmul.f32 %v4360_v38, %v63_v39  ;;  %v4378_v53 = vmul.f32 %v4360_v38, %v69_v40 }
  0x78   :  { %v150_v42 = vpop.xlane.xlu1 %149 }
  0x79   :  { %v212_v43 = vmul.f32 %v4363_v41, %v4363_v41  ;;  %v196_v45 = vmul.f32 %v150_v42, %v4360_v38  ;;  %v214_v58 = vmul.f32 %v4378_v53, %v4378_v53  ;;  %v244_v40 = vsub.f32 %v4283_v0, %v4363_v41  ;;  %v4435_v0 = vld [vmem:[%s6629_s1] ss:$0 sm:$0xff]  ;;  %s4207_s1 = smov 112  }
  0x7b   :  { %v228_v46 = vsub.f32 %v196_v45, %v212_v43  ;;  %v85_v43 = vsel %vm60_vm0, %v4415_v33, 0.0 }
  0x7c   :  { %86 = vadd.xlane.f32.xlu2 %v85_v43 }
  0x7d   :  { %v260_v48 = vadd.f32 1e-05, %v228_v46 }
  0x7e   :  { %v66_v49 = vpop.xlane.xlu0 %65  ;;  %v72_v50 = vpop.xlane.xlu2 %71 }
  0x7f   :  { %v4375_v51 = vmul.f32 %v4360_v38, %v66_v49  ;;  %3832 = vrsqrt.f32 %v260_v48  ;;  %v4384_v56 = vmul.f32 %v4360_v38, %v72_v50  ;;  %vm282_vm3 = vweird.f32 %v260_v48 }
  0x80   :  { %v153_v52 = vpop.xlane.xlu1 %152 }
  0x81   :  { %v213_v54 = vmul.f32 %v4375_v51, %v4375_v51  ;;  %v197_v55 = vmul.f32 %v153_v52, %v4360_v38  ;;  %v215_v3 = vmul.f32 %v4384_v56, %v4384_v56  ;;  %v245_v52 = vsub.f32 %v4299_v5, %v4375_v51 }
  0x83   :  { %v229_v57 = vsub.f32 %v197_v55, %v213_v54 }
  0x85   :  { %v3833_v59 = vpop.eup %3832  ;;  %v261_v60 = vadd.f32 1e-05, %v229_v57 }
  0x86   :  { %v156_v61 = vpop.xlane.xlu0 %155  ;;  %v75_v62 = vpop.xlane.xlu2 %74  ;;  %v277_v63 = vmul.f32 %v3833_v59, %v260_v48  ;;  %vm283_vm2 = vweird.f32 %v3833_v59 }
  0x87   :  { %v198_v2 = vmul.f32 %v156_v61, %v4360_v38  ;;  %3834 = vrsqrt.f32 %v261_v60  ;;  %v4395_v12 = vmul.f32 %v4360_v38, %v75_v62  ;;  %vm4408_vm4 = vmor %vm282_vm3, %vm283_vm2  ;;  %vm292_vm6 = vweird.f32 %v261_v60  ;;  %v4445_v61 = vld [vmem:[%s6630_s2] ss:$0 sm:$0xff]  ;;  %s4208_s2 = smov 80  }
  0x88   :  { %v159_v4 = vpop.xlane.xlu1 %158  ;;  %v278_v6 = vmul.f32 %v3833_v59, %v277_v63 }
  0x89   :  { %v230_v8 = vsub.f32 %v198_v2, %v214_v58  ;;  %v199_v9 = vmul.f32 %v159_v4, %v4360_v38  ;;  %v216_v23 = vmul.f32 %v4395_v12, %v4395_v12 }
  0x8a   :  { %v279_v10 = vmul.f32 0.5, %v278_v6 }
  0x8b   :  { %v4392_v11 = vadd.f32 1e-05, %v230_v8  ;;  %v231_v14 = vsub.f32 %v199_v9, %v215_v3 }
  0x8c   :  { %v280_v15 = vsub.f32 1.5, %v279_v10 }
  0x8d   :  { %3836 = vrsqrt.f32 %v4392_v11  ;;  %v3835_v16 = vpop.eup %3834  ;;  %v263_v18 = vadd.f32 1e-05, %v231_v14  ;;  %vm302_vm12 = vweird.f32 %v4392_v11 }
  0x8e   :  { %v78_v19 = vpop.xlane.xlu0 %77  ;;  %v165_v20 = vpop.xlane.xlu2 %164  ;;  %v281_v21 = vmul.f32 %v3833_v59, %v280_v15  ;;  %v287_v22 = vmul.f32 %v3835_v16, %v261_v60  ;;  %vm293_vm5 = vweird.f32 %v3835_v16 }
  0x8f   :  { %v4401_v25 = vmul.f32 %v4360_v38, %v78_v19  ;;  %3838 = vrsqrt.f32 %v263_v18  ;;  %v201_v27 = vmul.f32 %v165_v20, %v4360_v38  ;;  %vm294_vm7 = vmor %vm292_vm6, %vm293_vm5  ;;  %vm312_vm8 = vweird.f32 %v263_v18 }
  0x90   :  { %v162_v28 = vpop.xlane.xlu1 %161  ;;  %v288_v29 = vmul.f32 %v3835_v16, %v287_v22  ;;  %v285_v39 = vsel %vm4408_vm4, %v3833_v59, %v281_v21  ;;  %v247_v20 = vsub.f32 %v4305_v7, %v4384_v56  ;;  %v4479_v22 = vld [vmem:[%s6628_s0 + $0x48] sm:$0xff] }
  0x91   :  { %v217_v30 = vmul.f32 %v4401_v25, %v4401_v25  ;;  %v200_v31 = vmul.f32 %v162_v28, %v4360_v38  ;;  %v436_v49 = vmul.f32 %v285_v39, %v244_v40  ;;  %v246_v28 = vsub.f32 %v4288_v1, %v4378_v53  ;;  %v4505_v40 = vld [vmem:[%s6628_s0 + $0x50] sm:$0xff] }
  0x92   :  { %v289_v35 = vmul.f32 0.5, %v288_v29  ;;  %v88_v56 = vsel %vm60_vm0, %v4479_v22, 0.0  ;;  %v141_v29 = vmul.f32 %v4479_v22, %v4479_v22 }
  0x93   :  { %v4417_v34 = vpop.eup %3836  ;;  %v233_v36 = vsub.f32 %v201_v27, %v217_v30  ;;  %v232_v37 = vsub.f32 %v200_v31, %v216_v23  ;;  %v455_v59 = vmul.f32 %v4435_v0, %v436_v49  ;;  %89 = vadd.xlane.f32.xlu1 %v88_v56 }
  0x94   :  { %v297_v42 = vmul.f32 %v4417_v34, %v4392_v11  ;;  %v290_v44 = vsub.f32 1.5, %v289_v35  ;;  %vm303_vm10 = vweird.f32 %v4417_v34  ;;  %v140_v11 = vmul.f32 %v4415_v33, %v4415_v33 }
  0x95   :  { %v4427_v45 = vadd.f32 1e-05, %v233_v36  ;;  %v4429_v46 = vadd.f32 1e-05, %v232_v37  ;;  %v3839_v47 = vpop.eup %3838  ;;  %v474_v4 = vadd.f32 %v4445_v61, %v455_v59  ;;  %vm4471_vm13 = vmor %vm302_vm12, %vm303_vm10  ;;  %v175_v1 = vsel %vm60_vm0, %v141_v29, 0.0 }
  0x96   :  { %v298_v48 = vmul.f32 %v4417_v34, %v297_v42  ;;  %v291_v41 = vmul.f32 %v3835_v16, %v290_v44  ;;  %v307_v50 = vmul.f32 %v3839_v47, %v263_v18  ;;  %vm313_vm9 = vweird.f32 %v3839_v47  ;;  %v81_v23 = vpop.xlane.xlu0 %80  ;;  %176 = vadd.xlane.f32.xlu2 %v175_v1  ;;  %v4510_v42 = vld [vmem:[%s6628_s0 + $0x58] sm:$0xff] }
  0x97   :  { %3840 = vrsqrt.f32 %v4427_v45  ;;  %vm4460_vm11 = vmor %vm312_vm8, %vm313_vm9  ;;  %v172_v32 = vsel %vm60_vm0, %v140_v11, 0.0  ;;  %v4494_v35 = vmul.f32 %v4360_v38, %v81_v23  ;;  %vm332_vm14 = vweird.f32 %v4427_v45 }
  0x98   :  { %v299_v54 = vmul.f32 0.5, %v298_v48  ;;  %3842 = vrsqrt.f32 %v4429_v46  ;;  %v308_v55 = vmul.f32 %v3839_v47, %v307_v50  ;;  %v295_v57 = vsel %vm294_vm7, %v3835_v16, %v291_v41  ;;  %v84_v27 = vpop.xlane.xlu1 %83  ;;  %173 = vadd.xlane.f32.xlu0 %v172_v32 }
  0x99   :  { %v437_v58 = vmul.f32 %v295_v57, %v245_v52  ;;  %v4498_v53 = vmul.f32 %v4360_v38, %v84_v27  ;;  %v218_v39 = vmul.f32 %v4494_v35, %v4494_v35  ;;  %v142_v48 = vmul.f32 %v4505_v40, %v4505_v40 }
  0x9a   :  { %v300_v60 = vsub.f32 1.5, %v299_v54  ;;  %v309_v62 = vmul.f32 0.5, %v308_v55  ;;  %v91_v41 = vsel %vm60_vm0, %v4505_v40, 0.0  ;;  %v94_v54 = vsel %vm60_vm0, %v4510_v42, 0.0 }
  0x9b   :  { %v456_v63 = vmul.f32 %v4435_v0, %v437_v58  ;;  %v219_v50 = vmul.f32 %v4498_v53, %v4498_v53  ;;  %v178_v59 = vsel %vm60_vm0, %v142_v48, 0.0  ;;  %vm322_vm1 = vweird.f32 %v4429_v46  ;;  %92 = vadd.xlane.f32.xlu1 %v91_v41 }
  0x9c   :  { %v310_v5 = vsub.f32 1.5, %v309_v62  ;;  %v301_v8 = vmul.f32 %v4417_v34, %v300_v60 }
  0x9d   :  { %v4448_v2 = vpop.eup %3840  ;;  %v475_v6 = vadd.f32 %v4445_v61, %v456_v63 }
  0x9e   :  { %v4450_v51 = vpop.eup %3842  ;;  %v327_v3 = vmul.f32 %v4448_v2, %v4427_v45  ;;  %v311_v9 = vmul.f32 %v3839_v47, %v310_v5  ;;  %v305_v7 = vsel %vm4471_vm13, %v4417_v34, %v301_v8  ;;  %v168_v34 = vpop.xlane.xlu2 %167  ;;  %vm333_vm15 = vweird.f32 %v4448_v2  ;;  %179 = vadd.xlane.f32.xlu2 %v178_v59  ;;  %v4544_v45 = vld [vmem:[%s6628_s0 + $0x60] sm:$0xff] }
  0x9f   :  { %v317_v10 = vmul.f32 %v4450_v51, %v4429_v46  ;;  %v490_v16 = vpack.c.bf16 %v475_v6, %v474_v4  ;;  %v438_v37 = vmul.f32 %v305_v7, %v246_v28  ;;  %v171_v57 = vpop.xlane.xlu0 %170  ;;  %vm4532_vm2 = vmor %vm332_vm14, %vm333_vm15  ;;  %vm323_vm3 = vweird.f32 %v4450_v51  ;;  %v4575_v28 = vld [vmem:[%s6628_s0 + $0x70] sm:$0xff] }
  0xa0   :  { %v328_v15 = vmul.f32 %v4448_v2, %v327_v3  ;;  %v315_v19 = vsel %vm4460_vm11, %v3839_v47, %v311_v9  ;;  %v202_v47 = vmul.f32 %v168_v34, %v4360_v38  ;;  %v203_v58 = vmul.f32 %v171_v57, %v4360_v38  ;;  %95 = vadd.xlane.f32.xlu0 %v94_v54  ;;  %vm324_vm4 = vmor %vm322_vm1, %vm323_vm3  ;;  %v4597_v54 = vld [vmem:[%s6628_s0 + $0x78] sm:$0xff] }
  0xa1   :  { %v318_v18 = vmul.f32 %v4450_v51, %v317_v10  ;;  %3538 = vmatmul.msk.bf16.vlgmr.msra.gmra.mxu0 %vm60_vm0, %v490_v16  ;;  %v439_v31 = vmul.f32 %v315_v19, %v247_v20  ;;  %v457_v52 = vmul.f32 %v4435_v0, %v438_v37  ;;  %v143_v6 = vmul.f32 %v4510_v42, %v4510_v42 }
  0xa2   :  { %v329_v30 = vmul.f32 0.5, %v328_v15  ;;  %v234_v55 = vsub.f32 %v202_v47, %v218_v39  ;;  %v235_v4 = vsub.f32 %v203_v58, %v219_v50  ;;  %v4554_v15 = vld [vmem:[%s6628_s0 + $0x68] sm:$0xff]  ;;  %v249_v16 = vsub.f32 %v4329_v17, %v4401_v25 }
  0xa3   :  { %v319_v36 = vmul.f32 0.5, %v318_v18  ;;  %v458_v44 = vmul.f32 %v4435_v0, %v439_v31  ;;  %v476_v8 = vadd.f32 %v4445_v61, %v457_v52  ;;  %v181_v19 = vsel %vm60_vm0, %v143_v6, 0.0 }
  0xa4   :  { %v330_v43 = vsub.f32 1.5, %v329_v30  ;;  %v266_v63 = vadd.f32 1e-05, %v234_v55  ;;  %v267_v9 = vadd.f32 1e-05, %v235_v4  ;;  %v248_v46 = vsub.f32 %v4319_v13, %v4395_v12  ;;  %182 = vadd.xlane.f32.xlu1 %v181_v19 }
  0xa5   :  { %v320_v49 = vsub.f32 1.5, %v319_v36  ;;  %v477_v62 = vadd.f32 %v4445_v61, %v458_v44  ;;  %v100_v21 = vsel %vm60_vm0, %v4554_v15, 0.0  ;;  %v145_v25 = vmul.f32 %v4554_v15, %v4554_v15 }
  0xa6   :  { %v331_v60 = vmul.f32 %v4448_v2, %v330_v43  ;;  %3844 = vrsqrt.f32 %v266_v63  ;;  %101 = vadd.xlane.f32.xlu2 %v100_v21  ;;  %v144_v27 = vmul.f32 %v4544_v45, %v4544_v45  ;;  %vm342_vm5 = vweird.f32 %v266_v63 }
  0xa7   :  { %v321_v3 = vmul.f32 %v4450_v51, %v320_v49  ;;  %v491_v10 = vpack.c.bf16 %v477_v62, %v476_v8  ;;  %3846 = vrsqrt.f32 %v267_v9  ;;  %v187_v30 = vsel %vm60_vm0, %v145_v25, 0.0 }
  0xa8   :  { %v335_v14 = vsel %vm4532_vm2, %v4448_v2, %v331_v60  ;;  %v97_v2 = vsel %vm60_vm0, %v4544_v45, 0.0  ;;  %v103_v32 = vsel %vm60_vm0, %v4575_v28, 0.0  ;;  %v184_v34 = vsel %vm60_vm0, %v144_v27, 0.0 }
  0xa9   :  { %v325_v18 = vsel %vm324_vm4, %v4450_v51, %v321_v3  ;;  %v441_v20 = vmul.f32 %v335_v14, %v249_v16  ;;  %98 = vadd.xlane.f32.xlu0 %v97_v2  ;;  %vm352_vm8 = vweird.f32 %v267_v9  ;;  %v250_v47 = vsub.f32 %v4343_v24, %v4494_v35 }
  0xaa   :  { %v440_v23 = vmul.f32 %v325_v18, %v248_v46  ;;  %v251_v49 = vsub.f32 %v4350_v26, %v4498_v53  ;;  %v106_v57 = vsel %vm60_vm0, %v4597_v54, 0.0 }
  0xab   :  { %v460_v13 = vmul.f32 %v4435_v0, %v441_v20 }
  0xac   :  { %v3845_v11 = vpop.eup %3844  ;;  %v459_v7 = vmul.f32 %v4435_v0, %v440_v23  ;;  %188 = vadd.xlane.f32.xlu1 %v187_v30 }
  0xad   :  { %v337_v17 = vmul.f32 %v3845_v11, %v266_v63  ;;  %v3847_v51 = vpop.eup %3846  ;;  %vm343_vm6 = vweird.f32 %v3845_v11  ;;  %v479_v36 = vadd.f32 %v4445_v61, %v460_v13 }
  0xae   :  { %v347_v56 = vmul.f32 %v3847_v51, %v267_v9  ;;  %v478_v37 = vadd.f32 %v4445_v61, %v459_v7  ;;  %vm4584_vm7 = vmor %vm342_vm5, %vm343_vm6  ;;  %vm353_vm9 = vweird.f32 %v3847_v51  ;;  %185 = vadd.xlane.f32.xlu2 %v184_v34 }
  0xaf   :  { %v338_v12 = vmul.f32 %v3845_v11, %v337_v17  ;;  %vm354_vm10 = vmor %vm352_vm8, %vm353_vm9 }
  0xb0   :  { %v348_v31 = vmul.f32 %v3847_v51, %v347_v56  ;;  %v492_v50 = vpack.c.bf16 %v479_v36, %v478_v37 }
  0xb1   :  { %3539 = vmatmul.msk.bf16.gmra.mxu0 %vm60_vm0, %v491_v10  ;;  %v339_v29 = vmul.f32 0.5, %v338_v12  ;;  %104 = vadd.xlane.f32.xlu0 %v103_v32 }
  0xb2   :  { %v349_v43 = vmul.f32 0.5, %v348_v31 }
  0xb3   :  { %v340_v1 = vsub.f32 1.5, %v339_v29 }
  0xb4   :  { %v350_v48 = vsub.f32 1.5, %v349_v43 }
  0xb5   :  { %v341_v44 = vmul.f32 %v3845_v11, %v340_v1 }
  0xb6   :  { %v351_v52 = vmul.f32 %v3847_v51, %v350_v48  ;;  %107 = vadd.xlane.f32.xlu2 %v106_v57 }
  0xb7   :  { %v345_v41 = vsel %vm4584_vm7, %v3845_v11, %v341_v44 }
  0xb8   :  { %v355_v55 = vsel %vm354_vm10, %v3847_v51, %v351_v52  ;;  %v442_v24 = vmul.f32 %v345_v41, %v250_v47 }
  0xb9   :  { %v443_v35 = vmul.f32 %v355_v55, %v251_v49 }
  0xba   :  { %v461_v26 = vmul.f32 %v4435_v0, %v442_v24 }
  0xbb   :  { %v462_v53 = vmul.f32 %v4435_v0, %v443_v35 }
  0xbc   :  { %v480_v58 = vadd.f32 %v4445_v61, %v461_v26 }
  0xbd   :  { %v481_v59 = vadd.f32 %v4445_v61, %v462_v53 }
  0xbf   :  { %v493_v60 = vpack.c.bf16 %v481_v59, %v480_v58 }
  0xc1   :  { %3540 = vmatmul.msk.bf16.gmra.mxu0 %vm60_vm0, %v492_v50 }
  0xd1   :  { %3541 = vmatmul.msk.bf16.gmra.mxu0 %vm60_vm0, %v493_v60 }
  0xef   :  { %v87_v62 = vpop.xlane.xlu2 %86 }
  0xf0   :  { %v4608_v63 = vmul.f32 %v4360_v38, %v87_v62 }
  0xf2   :  { %v220_v5 = vmul.f32 %v4608_v63, %v4608_v63  ;;  %v252_v58 = vsub.f32 %v4415_v33, %v4608_v63 }
 0x106   :  { %v90_v3 = vpop.xlane.xlu1 %89 }
 0x107   :  { %v4613_v6 = vmul.f32 %v4360_v38, %v90_v3 }
 0x109   :  { %v177_v4 = vpop.xlane.xlu2 %176  ;;  %v221_v16 = vmul.f32 %v4613_v6, %v4613_v6  ;;  %v253_v59 = vsub.f32 %v4479_v22, %v4613_v6 }
 0x10a   :  { %v205_v8 = vmul.f32 %v177_v4, %v4360_v38 }
 0x10b   :  { %v174_v9 = vpop.xlane.xlu0 %173 }
 0x10c   :  { %v204_v10 = vmul.f32 %v174_v9, %v4360_v38  ;;  %v237_v19 = vsub.f32 %v205_v8, %v221_v16 }
 0x10e   :  { %v236_v18 = vsub.f32 %v204_v10, %v220_v5  ;;  %v269_v2 = vadd.f32 1e-05, %v237_v19  ;;  %v93_v20 = vpop.xlane.xlu1 %92 }
 0x10f   :  { %v4620_v23 = vmul.f32 %v4360_v38, %v93_v20 }
 0x110   :  { %v268_v46 = vadd.f32 1e-05, %v236_v18  ;;  %vm372_vm13 = vweird.f32 %v269_v2 }
 0x111   :  { %v222_v7 = vmul.f32 %v4620_v23, %v4620_v23  ;;  %v180_v31 = vpop.xlane.xlu2 %179 }
 0x112   :  { %3848 = vrsqrt.f32 %v268_v46  ;;  %v206_v1 = vmul.f32 %v180_v31, %v4360_v38  ;;  %vm362_vm11 = vweird.f32 %v268_v46 }
 0x113   :  { %3850 = vrsqrt.f32 %v269_v2  ;;  %v96_v30 = vpop.xlane.xlu0 %95 }
 0x114   :  { %v4627_v36 = vmul.f32 %v4360_v38, %v96_v30  ;;  %v238_v48 = vsub.f32 %v206_v1, %v222_v7 }
 0x116   :  { %v223_v47 = vmul.f32 %v4627_v36, %v4627_v36  ;;  %v4639_v50 = vadd.f32 1e-05, %v238_v48 }
 0x117   :  { %v183_v34 = vpop.xlane.xlu1 %182 }
 0x118   :  { %v3849_v25 = vpop.eup %3848  ;;  %v207_v39 = vmul.f32 %v183_v34, %v4360_v38  ;;  %3852 = vrsqrt.f32 %v4639_v50  ;;  %vm382_vm2 = vweird.f32 %v4639_v50 }
 0x119   :  { %v3851_v12 = vpop.eup %3850  ;;  %v357_v27 = vmul.f32 %v3849_v25, %v268_v46  ;;  %vm363_vm12 = vweird.f32 %v3849_v25  ;;  %v102_v53 = vpop.xlane.xlu2 %101 }
 0x11a   :  { %v367_v29 = vmul.f32 %v3851_v12, %v269_v2  ;;  %v239_v52 = vsub.f32 %v207_v39, %v223_v47  ;;  %vm373_vm14 = vweird.f32 %v3851_v12  ;;  %vm4644_vm15 = vmor %vm362_vm11, %vm363_vm12  ;;  %v4654_v60 = vmul.f32 %v4360_v38, %v102_v53 }
 0x11b   :  { %v358_v32 = vmul.f32 %v3849_v25, %v357_v27  ;;  %vm374_vm1 = vmor %vm372_vm13, %vm373_vm14 }
 0x11c   :  { %v368_v37 = vmul.f32 %v3851_v12, %v367_v29  ;;  %v4642_v24 = vadd.f32 1e-05, %v239_v52  ;;  %v225_v3 = vmul.f32 %v4654_v60, %v4654_v60  ;;  %v99_v8 = vpop.xlane.xlu0 %98 }
 0x11d   :  { %v359_v44 = vmul.f32 0.5, %v358_v32  ;;  %v4661_v22 = vmul.f32 %v4360_v38, %v99_v8 }
 0x11e   :  { %v547_v14 = vpop.f32.mrf.mxu0  ;;  %v369_v49 = vmul.f32 0.5, %v368_v37  ;;  %3854 = vrsqrt.f32 %v4642_v24  ;;  %v3853_v10 = vpop.eup %3852  ;;  %vm392_vm4 = vweird.f32 %v4642_v24 }
 0x11f   :  { %v587_v21 = vpack.c.bf16 %v547_v14, %v547_v14  ;;  %v360_v41 = vsub.f32 1.5, %v359_v44  ;;  %v189_v9 = vpop.xlane.xlu1 %188  ;;  %v377_v46 = vmul.f32 %v3853_v10, %v4639_v50  ;;  %v224_v20 = vmul.f32 %v4661_v22, %v4661_v22 }
 0x120   :  { %v370_v55 = vsub.f32 1.5, %v369_v49  ;;  %v209_v6 = vmul.f32 %v189_v9, %v4360_v38  ;;  %vm383_vm3 = vweird.f32 %v3853_v10  ;;  %v254_v50 = vsub.f32 %v4505_v40, %v4620_v23 }
 0x121   :  { %v611_v51 = vunpack.c.l.b16 %v587_v21  ;;  %v361_v57 = vmul.f32 %v3849_v25, %v360_v41  ;;  %vm4685_vm6 = vmor %vm382_vm2, %vm383_vm3 }
 0x122   :  { %v371_v35 = vmul.f32 %v3851_v12, %v370_v55  ;;  %v241_v21 = vsub.f32 %v209_v6, %v225_v3  ;;  %v255_v55 = vsub.f32 %v4510_v42, %v4627_v36 }
 0x123   :  { %v365_v33 = vsel %vm4644_vm15, %v3849_v25, %v361_v57  ;;  %v378_v25 = vmul.f32 %v3853_v10, %v377_v46 }
 0x124   :  { %v375_v63 = vsel %vm374_vm1, %v3851_v12, %v371_v35  ;;  %v444_v14 = vmul.f32 %v365_v33, %v252_v58  ;;  %v3855_v2 = vpop.eup %3854  ;;  %v4672_v27 = vadd.f32 1e-05, %v241_v21 }
 0x125   :  { %v445_v16 = vmul.f32 %v375_v63, %v253_v59  ;;  %v379_v30 = vmul.f32 0.5, %v378_v25  ;;  %vm393_vm5 = vweird.f32 %v3855_v2 }
 0x126   :  { %v549_v11 = vpop.f32.mrf.mxu0  ;;  %3856 = vrsqrt.f32 %v4672_v27  ;;  %vm394_vm7 = vmor %vm392_vm4, %vm393_vm5  ;;  %vm412_vm8 = vweird.f32 %v4672_v27  ;;  %vm631_vm5 = vcmask 64512  }
 0x127   :  { %v588_v17 = vpack.c.bf16 %v549_v11, %v549_v11  ;;  %v463_v11 = vmul.f32 %v4435_v0, %v444_v14  ;;  %v464_v7 = vmul.f32 %v4435_v0, %v445_v16  ;;  %v380_v37 = vsub.f32 1.5, %v379_v30 }
 0x129   :  { %v612_v13 = vunpack.c.l.b16 %v588_v17  ;;  %v482_v29 = vadd.f32 %v4445_v61, %v463_v11  ;;  %v483_v34 = vadd.f32 %v4445_v61, %v464_v7  ;;  %v381_v48 = vmul.f32 %v3853_v10, %v380_v37 }
 0x12a   :  { %v256_v11 = vsub.f32 %v4544_v45, %v4661_v22 }
 0x12b   :  { %v4624_v56 = vpack.c.b16 %v612_v13, %v611_v51  ;;  %v387_v51 = vmul.f32 %v3855_v2, %v4642_v24  ;;  %v186_v13 = vpop.xlane.xlu2 %185  ;;  %v494_v44 = vpack.c.bf16 %v483_v34, %v482_v29  ;;  %v385_v40 = vsel %vm4685_vm6, %v3853_v10, %v381_v48 }
 0x12c   :  { %v208_v12 = vmul.f32 %v186_v13, %v4360_v38  ;;  %v3857_v52 = vpop.eup %3856  ;;  %v446_v42 = vmul.f32 %v385_v40, %v254_v50  ;;  %v146_v29 = vmul.f32 %v4575_v28, %v4575_v28  ;;  %vm685_vm6 = vcmask 523264  }
 0x12d   :  { %831 = vrot.lane.b32.xlu0 %v4624_v56, %s4201_s22  ;;  %839 = vrot.lane.b32.xlu1 %v4624_v56, %s4202_s3  ;;  %v388_v31 = vmul.f32 %v3855_v2, %v387_v51  ;;  %v407_v24 = vmul.f32 %v3857_v52, %v4672_v27  ;;  %vm413_vm9 = vweird.f32 %v3857_v52 }
 0x12e   :  { %623 = vrot.lane.b32.xlu2 %v4624_v56, %s4203_s23  ;;  %v552_v43 = vpop.f32.mrf.mxu0  ;;  %v240_v1 = vsub.f32 %v208_v12, %v224_v20  ;;  %3542 = vmatmul.msk.bf16.gmra.mxu0 %vm60_vm0, %v494_v44  ;;  %v465_v3 = vmul.f32 %v4435_v0, %v446_v42  ;;  %vm414_vm12 = vmor %vm412_vm8, %vm413_vm9  ;;  %v257_v20 = vsub.f32 %v4554_v15, %v4654_v60  ;;  %v190_v30 = vsel %vm60_vm0, %v146_v29, 0.0 }
 0x12f   :  { %v589_v62 = vpack.c.bf16 %v552_v43, %v552_v43  ;;  %v389_v39 = vmul.f32 0.5, %v388_v31  ;;  %v408_v53 = vmul.f32 %v3857_v52, %v407_v24  ;;  %vm1586_vm8 = vcmask 195584  }
 0x130   :  { %v272_v43 = vadd.f32 1e-05, %v240_v1  ;;  %v484_v63 = vadd.f32 %v4445_v61, %v465_v3  ;;  %v105_v3 = vpop.xlane.xlu0 %104 }
 0x131   :  { %v613_v18 = vunpack.c.l.b16 %v589_v62  ;;  %v390_v47 = vsub.f32 1.5, %v389_v39  ;;  %v409_v33 = vmul.f32 0.5, %v408_v53 }
 0x132   :  { %3858 = vrsqrt.f32 %v272_v43  ;;  %vm402_vm10 = vweird.f32 %v272_v43 }
 0x133   :  { %v391_v41 = vmul.f32 %v3855_v2, %v390_v47 }
 0x135   :  { %v395_v23 = vsel %vm394_vm7, %v3855_v2, %v391_v41  ;;  %vm1577_vm7 = vcmask 130048  }
 0x136   :  { %v554_v5 = vpop.f32.mrf.mxu0  ;;  %v447_v36 = vmul.f32 %v395_v23, %v255_v55 }
 0x137   :  { %v590_v4 = vpack.c.bf16 %v554_v5, %v554_v5 }
 0x138   :  { %v3859_v58 = vpop.eup %3858 }
 0x139   :  { %v614_v19 = vunpack.c.l.b16 %v590_v4  ;;  %v397_v5 = vmul.f32 %v3859_v58, %v272_v43  ;;  %v466_v4 = vmul.f32 %v4435_v0, %v447_v36  ;;  %vm403_vm11 = vweird.f32 %v3859_v58  ;;  %v108_v43 = vpop.xlane.xlu2 %107 }
 0x13a   :  { %vm404_vm13 = vmor %vm402_vm10, %vm403_vm11  ;;  %v4798_v53 = vmul.f32 %v4360_v38, %v108_v43 }
 0x13b   :  { %v4668_v17 = vpack.c.b16 %v614_v19, %v613_v18  ;;  %v398_v9 = vmul.f32 %v3859_v58, %v397_v5  ;;  %v485_v6 = vadd.f32 %v4445_v61, %v466_v4  ;;  %v410_v18 = vsub.f32 1.5, %v409_v33 }
 0x13c   :  { %v147_v19 = vmul.f32 %v4597_v54, %v4597_v54  ;;  %v227_v23 = vmul.f32 %v4798_v53, %v4798_v53 }
 0x13d   :  { %841 = vrot.lane.b32.xlu2 %v4668_v17, %s4202_s3  ;;  %625 = vrot.lane.b32.xlu0 %v4668_v17, %s4203_s23  ;;  %v399_v10 = vmul.f32 0.5, %v398_v9  ;;  %v495_v14 = vpack.c.bf16 %v485_v6, %v484_v63  ;;  %v411_v2 = vmul.f32 %v3857_v52, %v410_v18 }
 0x13e   :  { %v557_v32 = vpop.f32.mrf.mxu0  ;;  %v193_v21 = vsel %vm60_vm0, %v147_v19, 0.0 }
 0x13f   :  { %v591_v35 = vpack.c.bf16 %v557_v32, %v557_v32  ;;  %v400_v16 = vsub.f32 1.5, %v399_v10  ;;  %3543 = vmatmul.msk.bf16.gmra.mxu0 %vm60_vm0, %v495_v14  ;;  %v415_v51 = vsel %vm414_vm12, %v3857_v52, %v411_v2 }
 0x140   :  { %v449_v12 = vmul.f32 %v415_v51, %v257_v20 }
 0x141   :  { %v615_v59 = vunpack.c.l.b16 %v591_v35  ;;  %v401_v46 = vmul.f32 %v3859_v58, %v400_v16  ;;  %v130_v16 = vmul.f32 %v4360_v38, %v105_v3 }
 0x142   :  { %v468_v7 = vmul.f32 %v4435_v0, %v449_v12 }
 0x143   :  { %v405_v25 = vsel %vm404_vm13, %v3859_v58, %v401_v46  ;;  %v226_v20 = vmul.f32 %v130_v16, %v130_v16 }
 0x144   :  { %v448_v13 = vmul.f32 %v405_v25, %v256_v11  ;;  %v487_v60 = vadd.f32 %v4445_v61, %v468_v7 }
 0x145   :  { %833 = vrot.lane.b32.xlu2 %v4668_v17, %s4201_s22  ;;  %780 = vrot.lane.b32.xlu0 %v4668_v17, %s4204_s24 }
 0x146   :  { %v559_v57 = vpop.f32.mrf.mxu0  ;;  %v467_v27 = vmul.f32 %v4435_v0, %v448_v13 }
 0x147   :  { %v592_v26 = vpack.c.bf16 %v559_v57, %v559_v57 }
 0x148   :  { %v486_v15 = vadd.f32 %v4445_v61, %v467_v27 }
 0x149   :  { %v616_v62 = vunpack.c.l.b16 %v592_v26 }
 0x14a   :  { %v496_v45 = vpack.c.bf16 %v487_v60, %v486_v15 }
 0x14b   :  { %v4702_v8 = vpack.c.b16 %v616_v62, %v615_v59 }
 0x14d   :  { %994 = vrot.lane.b32.xlu0 %v4668_v17, %s4205_s25  ;;  %627 = vrot.lane.b32.xlu2 %v4702_v8, %s4203_s23 }
 0x14e   :  { %v562_v22 = vpop.f32.mrf.mxu0 }
 0x14f   :  { %3544 = vmatmul.msk.bf16.gmra.mxu0 %vm60_vm0, %v496_v45  ;;  %v593_v32 = vpack.c.bf16 %v562_v22, %v562_v22 }
 0x151   :  { %v617_v34 = vunpack.c.l.b16 %v593_v32 }
 0x155   :  { %1269 = vrot.lane.b32.xlu0 %v4668_v17, %s4206_s26 }
 0x156   :  { %v564_v31 = vpop.f32.mrf.mxu0 }
 0x157   :  { %194 = vadd.xlane.f32.xlu1 %v193_v21  ;;  %v594_v1 = vpack.c.bf16 %v564_v31, %v564_v31 }
 0x159   :  { %v618_v37 = vunpack.c.l.b16 %v594_v1 }
 0x15b   :  { %v4745_v39 = vpack.c.b16 %v618_v37, %v617_v34 }
 0x15d   :  { %1267 = vrot.lane.b32.xlu0 %v4624_v56, %s4206_s26 }
 0x165   :  { %1045 = vrot.lane.b32.xlu0 %v4624_v56, %s4207_s1 }
 0x16d   :  { %843 = vrot.lane.b32.xlu0 %v4702_v8, %s4202_s3 }
 0x170   :  { %992 = vrot.lane.b32.xlu1 %v4624_v56, %s4205_s25 }
 0x175   :  { %1057 = vrot.lane.b32.xlu0 %v4702_v8, %s4208_s2 }
 0x176   :  { %191 = vadd.xlane.f32.xlu2 %v190_v30 }
 0x178   :  { %1053 = vrot.lane.b32.xlu1 %v4624_v56, %s4208_s2 }
 0x17d   :  { %1263 = vrot.lane.b32.xlu0 %v4702_v8, %s4209_s27 }
 0x180   :  { %1261 = vrot.lane.b32.xlu1 %v4668_v17, %s4209_s27 }
 0x185   :  { %837 = vrot.lane.b32.xlu0 %v4745_v39, %s4201_s22 }
 0x188   :  { %835 = vrot.lane.b32.xlu1 %v4702_v8, %s4201_s22  ;;  %v4783_v48 = vpop.permute.xlu2 %623 }
 0x18d   :  { %1273 = vrot.lane.b32.xlu0 %v4745_v39, %s4206_s26 }
 0x18e   :  { %778 = vrot.lane.b32.xlu2 %v4624_v56, %s4204_s24 }
 0x190   :  { %782 = vrot.lane.b32.xlu1 %v4702_v8, %s4204_s24 }
 0x195   :  { %1265 = vrot.lane.b32.xlu0 %v4745_v39, %s4209_s27 }
 0x196   :  { %1055 = vrot.lane.b32.xlu2 %v4668_v17, %s4208_s2 }
 0x197   :  { %v4789_v24 = vpop.permute.xlu2 %841 }
 0x198   :  { %1271 = vrot.lane.b32.xlu1 %v4702_v8, %s4206_s26 }
 0x19e   :  { %1259 = vrot.lane.b32.xlu2 %v4624_v56, %s4209_s27 }
 0x19f   :  { %v4785_v49 = vpop.permute.xlu1 %839  ;;  %v4807_v36 = vpop.permute.xlu2 %833 }
 0x1a0   :  { %1049 = vrot.lane.b32.xlu1 %v4702_v8, %s4207_s1  ;;  %v4824_v18 = vpop.permute.xlu0 %831 }
 0x1a6   :  { %1047 = vrot.lane.b32.xlu2 %v4668_v17, %s4207_s1 }
 0x1a7   :  { %v4819_v6 = vpop.permute.xlu2 %627 }
 0x1a8   :  { %629 = vrot.lane.b32.xlu1 %v4745_v39, %s4203_s23 }
 0x1ab   :  { %v567_v44 = vpop.f32.mrf.mxu0 }
 0x1ac   :  { %v595_v47 = vpack.c.bf16 %v567_v44, %v567_v44 }
 0x1ae   :  { %996 = vrot.lane.b32.xlu2 %v4702_v8, %s4205_s25  ;;  %v1603_v52 = vunpack.c.l.b16 %v595_v47 }
 0x1af   :  { %v4835_v7 = vpop.permute.xlu0 %625 }
 0x1b0   :  { %845 = vrot.lane.b32.xlu1 %v4745_v39, %s4202_s3 }
 0x1b3   :  { %v569_v41 = vpop.f32.mrf.mxu0 }
 0x1b4   :  { %v596_v50 = vpack.c.bf16 %v569_v41, %v569_v41 }
 0x1b6   :  { %784 = vrot.lane.b32.xlu2 %v4745_v39, %s4204_s24  ;;  %v1604_v55 = vunpack.c.l.b16 %v596_v50  ;;  %v259_v50 = vsub.f32 %v4597_v54, %v4798_v53 }
 0x1b7   :  { %v781_v1 = vpop.permute.xlu0 %780 }
 0x1b8   :  { %998 = vrot.lane.b32.xlu1 %v4745_v39, %s4205_s25  ;;  %v4787_v35 = vpack.c.b16 %v1604_v55, %v1603_v52 }
 0x1ba   :  { %1821 = vrot.lane.b32.xlu0 %v4787_v35, %s4201_s22 }
 0x1bc   :  { %v572_v26 = vpop.f32.mrf.mxu0 }
 0x1bd   :  { %v597_v42 = vpack.c.bf16 %v572_v26, %v572_v26 }
 0x1be   :  { %1059 = vrot.lane.b32.xlu2 %v4745_v39, %s4208_s2 }
 0x1bf   :  { %v1605_v62 = vunpack.c.l.b16 %v597_v42 }
 0x1c0   :  { %1051 = vrot.lane.b32.xlu1 %v4745_v39, %s4207_s1 }
 0x1c2   :  { %2035 = vrot.lane.b32.xlu0 %v4787_v35, %s4207_s1 }
 0x1c4   :  { %v574_v59 = vpop.f32.mrf.mxu0 }
 0x1c5   :  { %v598_v5 = vpack.c.bf16 %v574_v59, %v574_v59 }
 0x1c6   :  { %1829 = vrot.lane.b32.xlu2 %v4787_v35, %s4202_s3 }
 0x1c7   :  { %v1606_v9 = vunpack.c.l.b16 %v598_v5 }
 0x1c8   :  { %1615 = vrot.lane.b32.xlu1 %v4787_v35, %s4203_s23 }
 0x1c9   :  { %v4811_v33 = vpack.c.b16 %v1606_v9, %v1605_v62 }
 0x1ca   :  { %v195_v57 = vpop.xlane.xlu1 %194 }
 0x1cb   :  { %v211_v40 = vmul.f32 %v195_v57, %v4360_v38  ;;  %1831 = vrot.lane.b32.xlu0 %v4811_v33, %s4202_s3 }
 0x1cc   :  { %v577_v63 = vpop.f32.mrf.mxu0 }
 0x1cd   :  { %v243_v58 = vsub.f32 %v211_v40, %v227_v23  ;;  %v599_v19 = vpack.c.bf16 %v577_v63, %v577_v63  ;;  %v258_v40 = vsub.f32 %v4575_v28, %v130_v16  ;;  %v995_v23 = vpop.permute.xlu0 %994 }
 0x1ce   :  { %2257 = vrot.lane.b32.xlu2 %v4787_v35, %s4206_s26 }
 0x1cf   :  { %v275_v4 = vadd.f32 1e-05, %v243_v58  ;;  %v1607_v21 = vunpack.c.l.b16 %v599_v19 }
 0x1d0   :  { %2043 = vrot.lane.b32.xlu1 %v4787_v35, %s4208_s2 }
 0x1d1   :  { %3860 = vrsqrt.f32 %v275_v4  ;;  %vm432_vm15 = vweird.f32 %v275_v4 }
 0x1d3   :  { %2259 = vrot.lane.b32.xlu0 %v4811_v33, %s4206_s26 }
 0x1d4   :  { %v579_v2 = vpop.f32.mrf.mxu0 }
 0x1d5   :  { %v600_v11 = vpack.c.bf16 %v579_v2, %v579_v2  ;;  %v4866_v63 = vpop.permute.xlu0 %1269 }
 0x1d6   :  { %1617 = vrot.lane.b32.xlu2 %v4811_v33, %s4203_s23 }
 0x1d7   :  { %v3861_v14 = vpop.eup %3860  ;;  %v1608_v12 = vunpack.c.l.b16 %v600_v11 }
 0x1d8   :  { %2249 = vrot.lane.b32.xlu1 %v4787_v35, %s4209_s27  ;;  %v427_v46 = vmul.f32 %v3861_v14, %v275_v4  ;;  %vm433_vm14 = vweird.f32 %v3861_v14 }
 0x1d9   :  { %v4837_v60 = vpack.c.b16 %v1608_v12, %v1607_v21  ;;  %vm434_vm1 = vmor %vm432_vm15, %vm433_vm14  ;;  %v651_v21 = vsel %vm631_vm5, %v4819_v6, 0  ;;  %v648_v12 = vsel %vm631_vm5, %v4835_v7, 0  ;;  %v645_v6 = vsel %vm631_vm5, %v4783_v48, 0 }
 0x1da   :  { %v428_v27 = vmul.f32 %v3861_v14, %v427_v46 }
 0x1db   :  { %1825 = vrot.lane.b32.xlu0 %v4837_v60, %s4201_s22 }
 0x1dc   :  { %v429_v22 = vmul.f32 0.5, %v428_v27 }
 0x1dd   :  { %v4873_v19 = vpop.permute.xlu0 %1267 }
 0x1de   :  { %2037 = vrot.lane.b32.xlu2 %v4811_v33, %s4207_s1  ;;  %v430_v31 = vsub.f32 1.5, %v429_v22 }
 0x1e0   :  { %1823 = vrot.lane.b32.xlu1 %v4811_v33, %s4201_s22  ;;  %v431_v34 = vmul.f32 %v3861_v14, %v430_v31 }
 0x1e2   :  { %v4821_v10 = vpop.permute.xlu1 %992  ;;  %v435_v52 = vsel %vm434_vm1, %v3861_v14, %v431_v34 }
 0x1e3   :  { %2261 = vrot.lane.b32.xlu0 %v4837_v60, %s4206_s26  ;;  %v451_v57 = vmul.f32 %v435_v52, %v259_v50 }
 0x1e5   :  { %v470_v5 = vmul.f32 %v4435_v0, %v451_v57 }
 0x1e6   :  { %1833 = vrot.lane.b32.xlu2 %v4837_v60, %s4202_s3 }
 0x1e7   :  { %v489_v53 = vadd.f32 %v4445_v61, %v470_v5 }
 0x1e8   :  { %2045 = vrot.lane.b32.xlu1 %v4811_v33, %s4208_s2 }
 0x1e9   :  { %v192_v25 = vpop.xlane.xlu2 %191 }
 0x1ea   :  { %v210_v51 = vmul.f32 %v192_v25, %v4360_v38  ;;  %v4833_v13 = vpop.permute.xlu1 %1053 }
 0x1ec   :  { %v242_v15 = vsub.f32 %v210_v51, %v226_v20 }
 0x1ee   :  { %v274_v45 = vadd.f32 1e-05, %v242_v15  ;;  %2047 = vrot.lane.b32.xlu2 %v4837_v60, %s4208_s2 }
 0x1f0   :  { %3862 = vrsqrt.f32 %v274_v45  ;;  %1619 = vrot.lane.b32.xlu1 %v4837_v60, %s4203_s23  ;;  %vm422_vm3 = vweird.f32 %v274_v45 }
 0x1f1   :  { %v779_v29 = vpop.permute.xlu2 %778 }
 0x1f2   :  { %v4845_v30 = vpop.permute.xlu1 %1261 }
 0x1f6   :  { %v3863_v32 = vpop.eup %3862 }
 0x1f7   :  { %v417_v37 = vmul.f32 %v3863_v32, %v274_v45  ;;  %vm423_vm2 = vweird.f32 %v3863_v32  ;;  %v863_v45 = vsel %vm631_vm5, %v4789_v24, 0 }
 0x1f8   :  { %vm424_vm4 = vmor %vm422_vm3, %vm423_vm2 }
 0x1f9   :  { %v418_v43 = vmul.f32 %v3863_v32, %v417_v37  ;;  %v4853_v44 = vpop.permute.xlu2 %1055 }
 0x1fa   :  { %v4855_v47 = vpop.permute.xlu1 %835  ;;  %v1077_v24 = vsel %vm631_vm5, %v4853_v44, 0 }
 0x1fb   :  { %v419_v41 = vmul.f32 0.5, %v418_v43 }
 0x1fd   :  { %v420_v55 = vsub.f32 1.5, %v419_v41 }
 0x1ff   :  { %v421_v26 = vmul.f32 %v3863_v32, %v420_v55 }
 0x201   :  { %v4860_v58 = vpop.permute.xlu2 %1259  ;;  %v425_v42 = vsel %vm424_vm4, %v3863_v32, %v421_v26 }
 0x202   :  { %v783_v59 = vpop.permute.xlu1 %782  ;;  %v450_v62 = vmul.f32 %v425_v42, %v258_v40 }
 0x204   :  { %v469_v3 = vmul.f32 %v4435_v0, %v450_v62 }
 0x206   :  { %v488_v54 = vadd.f32 %v4445_v61, %v469_v3  ;;  %v1046_v61 = vpop.permute.xlu0 %1045 }
 0x208   :  { %v497_v4 = vpack.c.bf16 %v489_v53, %v488_v54 }
 0x209   :  { %v1048_v9 = vpop.permute.xlu2 %1047 }
 0x20a   :  { %v4868_v28 = vpop.permute.xlu1 %1271  ;;  %3545 = vmatmul.msk.bf16.gmra.mxu0 %vm60_vm0, %v497_v4 }
 0x20e   :  { %v844_v25 = vpop.permute.xlu0 %843 }
 0x20f   :  { %v866_v27 = vsel %vm631_vm5, %v844_v25, 0 }
 0x211   :  { %v997_v14 = vpop.permute.xlu2 %996 }
 0x212   :  { %v4871_v16 = vpop.permute.xlu1 %1049 }
 0x216   :  { %v1058_v7 = vpop.permute.xlu0 %1057 }
 0x217   :  { %v1080_v48 = vsel %vm631_vm5, %v1058_v7, 0 }
 0x219   :  { %v785_v46 = vpop.permute.xlu2 %784 }
 0x21a   :  { %806 = vmatpush.bf16.msra.mxu2 %v785_v46  ;;  %v630_v0 = vpop.permute.xlu1 %629 }
 0x21b   :  { %v654_v2 = vsel %vm631_vm5, %v630_v0, 0 }
 0x21c   :  { %660 = vmatpush.bf16.xpose.msra.mxu1 %v654_v2 }
 0x21e   :  { %807 = vmatpush.bf16.msra.mxu2 %v783_v59 }
 0x221   :  { %v1060_v15 = vpop.permute.xlu2 %1059 }
 0x222   :  { %v846_v20 = vpop.permute.xlu1 %845  ;;  %808 = vmatpush.bf16.msra.mxu2 %v781_v1  ;;  %v1083_v22 = vsel %vm631_vm5, %v1060_v15, 0 }
 0x223   :  { %v869_v11 = vsel %vm631_vm5, %v846_v20, 0 }
 0x224   :  { %661 = vmatpush.bf16.xpose.msra.mxu1 %v651_v21  ;;  %875 = vmatpush.bf16.xpose.msra.mxu3 %v869_v11 }
 0x226   :  { %809 = vmatpush.bf16.msra.mxu2 %v779_v29  ;;  %v860_v29 = vsel %vm631_vm5, %v4785_v49, 0  ;;  %v4907_v49 = vpop.permute.xlu0 %1263 }
 0x229   :  { %v4929_v44 = vpop.permute.xlu2 %1829 }
 0x22a   :  { %v999_v51 = vpop.permute.xlu1 %998 }
 0x22b   :  { %1020 = vmatpush.bf16.msrb.mxu2 %v999_v51 }
 0x22c   :  { %662 = vmatpush.bf16.xpose.msra.mxu1 %v648_v12  ;;  %876 = vmatpush.bf16.xpose.msra.mxu3 %v866_v27 }
 0x22f   :  { %1021 = vmatpush.bf16.msrb.mxu2 %v997_v14 }
 0x231   :  { %v4939_v55 = vpop.permute.xlu2 %2257 }
 0x232   :  { %v1052_v43 = vpop.permute.xlu1 %1051 }
 0x233   :  { %1022 = vmatpush.bf16.msrb.mxu2 %v995_v23 }
 0x234   :  { %663 = vmatpush.bf16.xpose.msra.mxu1 %v645_v6  ;;  %877 = vmatpush.bf16.xpose.msra.mxu3 %v863_v45 }
 0x237   :  { %1023 = vmatpush.bf16.msrb.mxu2 %v4821_v10  ;;  %v1074_v10 = vsel %vm631_vm5, %v4833_v13, 0 }
 0x239   :  { %v1618_v62 = vpop.permute.xlu2 %1617 }
 0x23a   :  { %v4943_v26 = vpop.permute.xlu1 %1615 }
 0x23b   :  { %3546 = vmatmul.msk.bf16.vlgmr.msra.gmra.mxu1 %vm631_vm5, %v4624_v56 }
 0x23c   :  { %1089 = vmatpush.bf16.xpose.msrb.mxu1 %v1083_v22  ;;  %878 = vmatpush.bf16.xpose.msra.mxu3 %v860_v29 }
 0x241   :  { %v4965_v14 = vpop.permute.xlu2 %2037 }
 0x242   :  { %v4957_v54 = vpop.permute.xlu1 %2043 }
 0x243   :  { %3554 = vmatmul.msk.bf16.vlgmr.msra.gmra.mxu3 %vm631_vm5, %v4824_v18  ;;  %v838_v18 = vpop.permute.xlu0 %837 }
 0x244   :  { %1090 = vmatpush.bf16.xpose.msrb.mxu1 %v1080_v48 }
 0x249   :  { %v1834_v21 = vpop.permute.xlu2 %1833 }
 0x24b   :  { %3547 = vmatmul.msk.bf16.gmra.mxu1 %vm631_vm5, %v4668_v17  ;;  %v4933_v41 = vpop.permute.xlu0 %1273 }
 0x24c   :  { %1091 = vmatpush.bf16.xpose.msrb.mxu1 %v1077_v24 }
 0x251   :  { %v2048_v29 = vpop.permute.xlu2 %2047 }
 0x253   :  { %3555 = vmatmul.msk.bf16.gmra.mxu3 %vm631_vm5, %v4807_v36  ;;  %v4947_v23 = vpop.permute.xlu0 %1265 }
 0x254   :  { %1092 = vmatpush.bf16.xpose.msrb.mxu1 %v1074_v10 }
 0x25b   :  { %3548 = vmatmul.msk.bf16.gmra.mxu1 %vm631_vm5, %v4702_v8  ;;  %v4955_v3 = vpop.permute.xlu0 %1821 }
 0x263   :  { %3556 = vmatmul.msk.bf16.gmra.mxu3 %vm631_vm5, %v4855_v47  ;;  %v4973_v2 = vpop.permute.xlu0 %2035 }
 0x26b   :  { %3549 = vmatmul.msk.bf16.gmra.mxu1 %vm631_vm5, %v4745_v39  ;;  %v1832_v27 = vpop.permute.xlu0 %1831 }
 0x273   :  { %3557 = vmatmul.msk.bf16.gmra.mxu3 %vm631_vm5, %v838_v18  ;;  %v2260_v48 = vpop.permute.xlu0 %2259 }
 0x27b   :  { %3562 = vmatmul.msk.bf16.vlgmr.msrb.gmra.mxu1 %vm631_vm5, %v1046_v61  ;;  %v4975_v61 = vpop.permute.xlu1 %2249 }
 0x283   :  { %v4987_v15 = vpop.permute.xlu1 %1823 }
 0x287   :  { %v582_v13 = vpop.f32.mrf.mxu0 }
 0x288   :  { %v601_v36 = vpack.c.bf16 %v582_v13, %v582_v13 }
 0x28a   :  { %v1609_v1 = vunpack.c.l.b16 %v601_v36 }
 0x28b   :  { %3563 = vmatmul.msk.bf16.gmra.mxu1 %vm631_vm5, %v1048_v9  ;;  %v2046_v24 = vpop.permute.xlu1 %2045 }
 0x28f   :  { %v584_v31 = vpop.f32.mrf.mxu0 }
 0x290   :  { %v602_v32 = vpack.c.bf16 %v584_v31, %v584_v31 }
 0x292   :  { %v1610_v34 = vunpack.c.l.b16 %v602_v32 }
 0x294   :  { %v4914_v37 = vpack.c.b16 %v1610_v34, %v1609_v1 }
 0x296   :  { %2263 = vrot.lane.b32.xlu1 %v4914_v37, %s4206_s26  ;;  %1835 = vrot.lane.b32.xlu0 %v4914_v37, %s4202_s3 }
 0x297   :  { %1621 = vrot.lane.b32.xlu2 %v4914_v37, %s4203_s23 }
 0x29b   :  { %3564 = vmatmul.msk.bf16.gmra.mxu1 %vm631_vm5, %v4871_v16 }
 0x29f   :  { %2049 = vrot.lane.b32.xlu2 %v4914_v37, %s4208_s2 }
 0x2a7   :  { %1827 = vrot.lane.b32.xlu2 %v4914_v37, %s4201_s22 }
 0x2ab   :  { %3565 = vmatmul.msk.bf16.gmra.mxu1 %vm631_vm5, %v1052_v43  ;;  %v5010_v43 = vpop.permute.xlu0 %1825 }
 0x2b8   :  { %v4931_v47 = vpop.f32.mrf.mxu1 }
 0x2b9   :  { %v686_v52 = vsel %vm685_vm6, %v4931_v47, -inf }
 0x2c0   :  { %687 = vmax.xlane.f32.xlu1 %v686_v52  ;;  %v4937_v50 = vpop.f32.mrf.mxu1  ;;  %v1620_v52 = vpop.permute.xlu1 %1619 }
 0x2c1   :  { %v689_v57 = vsel %vm685_vm6, %v4937_v50, -inf }
 0x2c2   :  { %690 = vmax.xlane.f32.xlu0 %v689_v57 }
 0x2c6   :  { %v4945_v40 = vpop.f32.mrf.mxu3 }
 0x2c7   :  { %v900_v53 = vsel %vm685_vm6, %v4945_v40, -inf }
 0x2c8   :  { %v4949_v42 = vpop.f32.mrf.mxu1 }
 0x2c9   :  { %v692_v59 = vsel %vm685_vm6, %v4949_v42, -inf }
 0x2ca   :  { %693 = vmax.xlane.f32.xlu1 %v692_v59  ;;  %v1642_v59 = vsel %vm631_vm5, %v1620_v52, 0 }
 0x2ce   :  { %v4953_v5 = vpop.f32.mrf.mxu3 }
 0x2cf   :  { %v903_v4 = vsel %vm685_vm6, %v4953_v5, -inf }
 0x2d0   :  { %901 = vmax.xlane.f32.xlu2 %v900_v53  ;;  %v4963_v9 = vpop.f32.mrf.mxu1  ;;  %904 = vmax.xlane.f32.xlu0 %v903_v4 }
 0x2d1   :  { %v695_v11 = vsel %vm685_vm6, %v4963_v9, -inf }
 0x2d6   :  { %v4967_v16 = vpop.f32.mrf.mxu3 }
 0x2d7   :  { %v906_v46 = vsel %vm685_vm6, %v4967_v16, -inf }
 0x2d8   :  { %v4971_v0 = vpop.f32.mrf.mxu1  ;;  %907 = vmax.xlane.f32.xlu0 %v906_v46  ;;  %v2262_v46 = vpop.permute.xlu0 %2261 }
 0x2d9   :  { %v698_v45 = vsel %vm685_vm6, %v4971_v0, -inf }
 0x2de   :  { %v4977_v20 = vpop.f32.mrf.mxu3 }
 0x2df   :  { %v909_v25 = vsel %vm685_vm6, %v4977_v20, -inf }
 0x2e0   :  { %v4983_v51 = vpop.f32.mrf.mxu1  ;;  %696 = vmax.xlane.f32.xlu0 %v695_v11  ;;  %910 = vmax.xlane.f32.xlu1 %v909_v25  ;;  %v1639_v11 = vsel %vm631_vm5, %v1618_v62, 0  ;;  %v2070_v62 = vsel %vm631_vm5, %v2048_v29, 0 }
 0x2e1   :  { %v701_v12 = vsel %vm685_vm6, %v4983_v51, -inf }
 0x2e2   :  { %702 = vmax.xlane.f32.xlu2 %v701_v12 }
 0x2e6   :  { %v4989_v6 = vpop.f32.mrf.mxu3 }
 0x2e7   :  { %v912_v22 = vsel %vm685_vm6, %v4989_v6, -inf }
 0x2e8   :  { %v4995_v7 = vpop.f32.mrf.mxu1  ;;  %699 = vmax.xlane.f32.xlu0 %v698_v45  ;;  %913 = vmax.xlane.f32.xlu1 %v912_v22  ;;  %v1636_v45 = vsel %vm631_vm5, %v4943_v26, 0  ;;  %v2067_v26 = vsel %vm631_vm5, %v2046_v24, 0 }
 0x2e9   :  { %v704_v18 = vsel %vm685_vm6, %v4995_v7, -inf }
 0x2ee   :  { %v4997_v10 = vpop.f32.mrf.mxu3 }
 0x2ef   :  { %v915_v13 = vsel %vm685_vm6, %v4997_v10, -inf }
 0x2f0   :  { %v5003_v36 = vpop.f32.mrf.mxu1  ;;  %705 = vmax.xlane.f32.xlu1 %v704_v18  ;;  %916 = vmax.xlane.f32.xlu2 %v915_v13  ;;  %v1856_v13 = vsel %vm631_vm5, %v1834_v21, 0  ;;  %v2064_v21 = vsel %vm631_vm5, %v4957_v54, 0 }
 0x2f1   :  { %v1622_v31 = vpop.permute.xlu2 %1621  ;;  %v707_v32 = vsel %vm685_vm6, %v5003_v36, -inf }
 0x2f2   :  { %v1645_v1 = vsel %vm631_vm5, %v1622_v31, 0  ;;  %708 = vmax.xlane.f32.xlu0 %v707_v32  ;;  %v1853_v31 = vsel %vm631_vm5, %v1832_v27, 0  ;;  %v2284_v27 = vsel %vm631_vm5, %v2262_v46, 0  ;;  %v2278_v46 = vsel %vm631_vm5, %v4939_v55, 0 }
 0x2f3   :  { %1651 = vmatpush.bf16.xpose.msra.mxu1 %v1645_v1  ;;  %v1850_v1 = vsel %vm631_vm5, %v4929_v44, 0  ;;  %v2281_v44 = vsel %vm631_vm5, %v2260_v48, 0 }
 0x2f6   :  { %v5008_v34 = vpop.f32.mrf.mxu3 }
 0x2f7   :  { %v918_v57 = vsel %vm685_vm6, %v5008_v34, -inf }
 0x2f8   :  { %919 = vmax.xlane.f32.xlu2 %v918_v57 }
 0x2f9   :  { %v2050_v25 = vpop.permute.xlu2 %2049 }
 0x2fa   :  { %v2073_v18 = vsel %vm631_vm5, %v2050_v25, 0 }
 0x2fb   :  { %1652 = vmatpush.bf16.xpose.msra.mxu1 %v1642_v59 }
 0x2fe   :  { %v5015_v53 = vpop.f32.mrf.mxu3 }
 0x2ff   :  { %v921_v4 = vsel %vm685_vm6, %v5015_v53, -inf }
 0x300   :  { %922 = vmax.xlane.f32.xlu0 %v921_v4 }
 0x303   :  { %1653 = vmatpush.bf16.xpose.msra.mxu1 %v1639_v11 }
 0x308   :  { %v1836_v12 = vpop.permute.xlu0 %1835  ;;  %v2264_v32 = vpop.permute.xlu1 %2263 }
 0x309   :  { %v1859_v22 = vsel %vm631_vm5, %v1836_v12, 0  ;;  %v2287_v52 = vsel %vm631_vm5, %v2264_v32, 0 }
 0x30a   :  { %1865 = vmatpush.bf16.xpose.msrb.mxu0 %v1859_v22 }
 0x30b   :  { %1654 = vmatpush.bf16.xpose.msra.mxu1 %v1636_v45 }
 0x312   :  { %3578 = vmatmul.msk.bf16.vlgmr.msra.gmra.mxu1 %vm631_vm5, %v4787_v35  ;;  %1866 = vmatpush.bf16.xpose.msrb.mxu0 %v1856_v13 }
 0x313   :  { %2079 = vmatpush.bf16.xpose.msrb.mxu1 %v2073_v18 }
 0x31a   :  { %1867 = vmatpush.bf16.xpose.msrb.mxu0 %v1853_v31 }
 0x31b   :  { %2080 = vmatpush.bf16.xpose.msrb.mxu1 %v2070_v62 }
 0x322   :  { %3579 = vmatmul.msk.bf16.gmra.mxu1 %vm631_vm5, %v4811_v33  ;;  %1868 = vmatpush.bf16.xpose.msrb.mxu0 %v1850_v1 }
 0x323   :  { %2081 = vmatpush.bf16.xpose.msrb.mxu1 %v2067_v26 }
 0x329   :  { %3586 = vmatmul.msk.bf16.vlgmr.msrb.gmra.mxu0 %vm631_vm5, %v4955_v3  ;;  %v1828_v3 = vpop.permute.xlu2 %1827 }
 0x32a   :  { %2293 = vmatpush.bf16.xpose.msra.mxu0 %v2287_v52 }
 0x32b   :  { %2082 = vmatpush.bf16.xpose.msrb.mxu1 %v2064_v21 }
 0x332   :  { %2294 = vmatpush.bf16.xpose.msra.mxu0 %v2284_v27  ;;  %3580 = vmatmul.msk.bf16.gmra.mxu1 %vm631_vm5, %v4837_v60  ;;  %v5085_v27 = vpop.f32.mrf.mxu1 }
 0x333   :  { %v688_v29 = vpop.xlane.xlu1 %687 }
 0x334   :  { %v710_v24 = vsub.f32 %v4931_v47, %v688_v29 }
 0x335   :  { %v691_v57 = vpop.xlane.xlu0 %690 }
 0x336   :  { %v718_v59 = vmul.f32 1.442695, %v710_v24  ;;  %v711_v54 = vsub.f32 %v4937_v50, %v691_v57 }
 0x338   :  { %3864 = vpow2.f32 %v718_v59  ;;  %v720_v4 = vmul.f32 1.442695, %v711_v54 }
 0x339   :  { %3587 = vmatmul.msk.bf16.gmra.mxu0 %vm631_vm5, %v4987_v15 }
 0x33a   :  { %2295 = vmatpush.bf16.xpose.msra.mxu0 %v2281_v44  ;;  %3866 = vpow2.f32 %v720_v4 }
 0x33e   :  { %v5049_v11 = vpop.eup %3864 }
 0x33f   :  { %v734_v47 = vsel %vm685_vm6, %v5049_v11, 0.0 }
 0x340   :  { %v5053_v48 = vpop.eup %3866  ;;  %735 = vadd.xlane.f32.xlu1 %v734_v47 }
 0x341   :  { %v737_v50 = vsel %vm685_vm6, %v5053_v48, 0.0 }
 0x342   :  { %2296 = vmatpush.bf16.xpose.msra.mxu0 %v2278_v46  ;;  %3581 = vmatmul.msk.bf16.gmra.mxu1 %vm631_vm5, %v4914_v37 }
 0x343   :  { %738 = vadd.xlane.f32.xlu0 %v737_v50  ;;  %v902_v15 = vpop.xlane.xlu2 %901 }
 0x344   :  { %v924_v25 = vsub.f32 %v4945_v40, %v902_v15  ;;  %v905_v40 = vpop.xlane.xlu0 %904 }
 0x346   :  { %v932_v55 = vmul.f32 1.442695, %v924_v25 }
 0x348   :  { %3868 = vpow2.f32 %v932_v55 }
 0x349   :  { %3588 = vmatmul.msk.bf16.gmra.mxu0 %vm631_vm5, %v5010_v43  ;;  %v694_v43 = vpop.xlane.xlu1 %693 }
 0x34a   :  { %v712_v18 = vsub.f32 %v4949_v42, %v694_v43 }
 0x34c   :  { %v908_v22 = vpop.xlane.xlu0 %907  ;;  %v722_v31 = vmul.f32 1.442695, %v712_v18 }
 0x34e   :  { %v5062_v12 = vpop.eup %3868 }
 0x34f   :  { %v948_v45 = vsel %vm685_vm6, %v5062_v12, 0.0 }
 0x350   :  { %949 = vadd.xlane.f32.xlu2 %v948_v45 }
 0x352   :  { %3594 = vmatmul.msk.bf16.vlgmr.msrb.gmra.mxu1 %vm631_vm5, %v4973_v2  ;;  %v925_v2 = vsub.f32 %v4953_v5, %v905_v40 }
 0x353   :  { %v911_v62 = vpop.xlane.xlu1 %910 }
 0x354   :  { %v934_v13 = vmul.f32 1.442695, %v925_v2  ;;  %v927_v26 = vsub.f32 %v4977_v20, %v911_v62  ;;  %v697_v1 = vpop.xlane.xlu0 %696 }
 0x355   :  { %v703_v52 = vpop.xlane.xlu2 %702  ;;  %v713_v29 = vsub.f32 %v4963_v9, %v697_v1 }
 0x356   :  { %3870 = vpow2.f32 %v934_v13  ;;  %v938_v32 = vmul.f32 1.442695, %v927_v26  ;;  %v715_v42 = vsub.f32 %v4983_v51, %v703_v52 }
 0x357   :  { %2251 = vrot.lane.b32.xlu0 %v4811_v33, %s4209_s27  ;;  %3872 = vpow2.f32 %v722_v31  ;;  %v724_v57 = vmul.f32 1.442695, %v713_v29 }
 0x358   :  { %3874 = vpow2.f32 %v938_v32  ;;  %v728_v44 = vmul.f32 1.442695, %v715_v42 }
 0x359   :  { %2039 = vrot.lane.b32.xlu1 %v4837_v60, %s4207_s1  ;;  %3589 = vmatmul.msk.bf16.gmra.mxu0 %vm631_vm5, %v1828_v3  ;;  %v5102_v3 = vpop.f32.mrf.mxu1 }
 0x35c   :  { %v5083_v21 = vpop.eup %3870  ;;  %v700_v54 = vpop.xlane.xlu0 %699 }
 0x35d   :  { %v5088_v5 = vpop.eup %3872  ;;  %v951_v20 = vsel %vm685_vm6, %v5083_v21, 0.0  ;;  %v714_v9 = vsub.f32 %v4971_v0, %v700_v54 }
 0x35e   :  { %v740_v24 = vsel %vm685_vm6, %v5088_v5, 0.0  ;;  %v5095_v59 = vpop.eup %3874 }
 0x35f   :  { %v957_v4 = vsel %vm685_vm6, %v5095_v59, 0.0  ;;  %v726_v47 = vmul.f32 1.442695, %v714_v9 }
 0x361   :  { %v5116_v43 = vpop.f32.mrf.mxu1 }
 0x362   :  { %3595 = vmatmul.msk.bf16.gmra.mxu1 %vm631_vm5, %v4965_v14  ;;  %v926_v14 = vsub.f32 %v4967_v16, %v908_v22  ;;  %v914_v16 = vpop.xlane.xlu1 %913  ;;  %v1117_v22 = vsel %vm685_vm6, %v5102_v3, -inf }
 0x363   :  { %v928_v0 = vsub.f32 %v4989_v6, %v914_v16  ;;  %v1114_v6 = vsel %vm685_vm6, %v5085_v27, -inf }
 0x365   :  { %v940_v18 = vmul.f32 1.442695, %v928_v0  ;;  %v709_v1 = vpop.xlane.xlu0 %708  ;;  %v1297_v0 = vsel %vm631_vm5, %v4933_v41, 0  ;;  %v1294_v41 = vsel %vm631_vm5, %v4868_v28, 0 }
 0x368   :  { %2253 = vrot.lane.b32.xlu2 %v4837_v60, %s4209_s27 }
 0x369   :  { %3602 = vmatmul.msk.bf16.vlgmr.msra.gmra.mxu0 %vm631_vm5, %v4975_v61  ;;  %v936_v61 = vmul.f32 1.442695, %v926_v14  ;;  %v5128_v31 = vpop.f32.mrf.mxu1 }
 0x36a   :  { %v706_v50 = vpop.xlane.xlu1 %705  ;;  %v1123_v29 = vsel %vm685_vm6, %v5128_v31, -inf }
 0x36b   :  { %3876 = vpow2.f32 %v936_v61  ;;  %v716_v55 = vsub.f32 %v4995_v7, %v706_v50  ;;  %v1120_v61 = vsel %vm685_vm6, %v5116_v43, -inf }
 0x36c   :  { %3878 = vpow2.f32 %v728_v44 }
 0x36d   :  { %3880 = vpow2.f32 %v724_v57  ;;  %v730_v2 = vmul.f32 1.442695, %v716_v55 }
 0x36e   :  { %3882 = vpow2.f32 %v726_v47 }
 0x36f   :  { %3884 = vpow2.f32 %v730_v2 }
 0x370   :  { %3886 = vpow2.f32 %v940_v18 }
 0x371   :  { %v5097_v51 = vpop.eup %3876  ;;  %v5136_v52 = vpop.f32.mrf.mxu1 }
 0x372   :  { %v954_v46 = vsel %vm685_vm6, %v5097_v51, 0.0  ;;  %v5106_v15 = vpop.eup %3878 }
 0x373   :  { %v5108_v25 = vpop.eup %3880  ;;  %v749_v45 = vsel %vm685_vm6, %v5106_v15, 0.0  ;;  %v5142_v42 = vpop.xlane.xlu0 %922 }
 0x374   :  { %v743_v40 = vsel %vm685_vm6, %v5108_v25, 0.0  ;;  %v5120_v7 = vpop.eup %3882 }
 0x375   :  { %v746_v13 = vsel %vm685_vm6, %v5120_v7, 0.0  ;;  %v5126_v62 = vpop.eup %3884 }
 0x376   :  { %v5130_v26 = vpop.eup %3886  ;;  %v752_v14 = vsel %vm685_vm6, %v5126_v62, 0.0 }
 0x377   :  { %v960_v32 = vsel %vm685_vm6, %v5130_v26, 0.0 }
 0x381   :  { %952 = vadd.xlane.f32.xlu0 %v951_v20  ;;  %v5146_v20 = vpop.f32.mrf.mxu1 }
 0x383   :  { %741 = vadd.xlane.f32.xlu1 %v740_v24  ;;  %v1129_v24 = vsel %vm685_vm6, %v5146_v20, -inf }
 0x389   :  { %958 = vadd.xlane.f32.xlu0 %v957_v4  ;;  %v5152_v54 = vpop.f32.mrf.mxu1  ;;  %v917_v4 = vpop.xlane.xlu2 %916 }
 0x38a   :  { %v1132_v50 = vsel %vm685_vm6, %v5152_v54, -inf }
 0x38b   :  { %955 = vadd.xlane.f32.xlu1 %v954_v46 }
 0x391   :  { %750 = vadd.xlane.f32.xlu0 %v749_v45  ;;  %744 = vadd.xlane.f32.xlu2 %v743_v40  ;;  %v5163_v45 = vpop.f32.mrf.mxu1 }
 0x392   :  { %v1135_v40 = vsel %vm685_vm6, %v5163_v45, -inf }
 0x393   :  { %1118 = vmax.xlane.f32.xlu1 %v1117_v22 }
 0x399   :  { %1115 = vmax.xlane.f32.xlu0 %v1114_v6  ;;  %747 = vadd.xlane.f32.xlu2 %v746_v13 }
 0x3a1   :  { %753 = vadd.xlane.f32.xlu0 %v752_v14  ;;  %961 = vadd.xlane.f32.xlu2 %v960_v32  ;;  %v717_v14 = vsub.f32 %v5003_v36, %v709_v1  ;;  %v1126_v36 = vsel %vm685_vm6, %v5136_v52, -inf }
 0x3a3   :  { %v732_v32 = vmul.f32 1.442695, %v717_v14 }
 0x3a9   :  { %1121 = vmax.xlane.f32.xlu0 %v1120_v61 }
 0x3ac   :  { %2041 = vrot.lane.b32.xlu1 %v4914_v37, %s4207_s1 }
 0x3b1   :  { %1124 = vmax.xlane.f32.xlu0 %v1123_v29 }
 0x3b3   :  { %v736_v16 = vpop.xlane.xlu1 %735 }
 0x3b4   :  { %3888 = vrcp.f32 %v736_v16  ;;  %v1288_v16 = vsel %vm631_vm5, %v4873_v19, 0 }
 0x3b6   :  { %v739_v44 = vpop.xlane.xlu0 %738 }
 0x3b7   :  { %3890 = vrcp.f32 %v739_v44 }
 0x3b9   :  { %1130 = vmax.xlane.f32.xlu0 %v1129_v24  ;;  %2255 = vrot.lane.b32.xlu2 %v4914_v37, %s4209_s27 }
 0x3ba   :  { %v3889_v57 = vpop.eup %3888 }
 0x3bb   :  { %v766_v46 = vmul.f32 %v3889_v57, %v5049_v11  ;;  %v929_v11 = vsub.f32 %v4997_v10, %v917_v4  ;;  %v1291_v10 = vsel %vm631_vm5, %v4866_v63, 0  ;;  %v5201_v57 = vpop.f32.mrf.mxu0 }
 0x3bd   :  { %v3891_v9 = vpop.eup %3890  ;;  %v942_v2 = vmul.f32 1.442695, %v929_v11 }
 0x3be   :  { %v767_v47 = vmul.f32 %v3891_v9, %v5053_v48  ;;  %v920_v48 = vpop.xlane.xlu2 %919 }
 0x3bf   :  { %3892 = vpow2.f32 %v942_v2  ;;  %v930_v61 = vsub.f32 %v5008_v34, %v920_v48  ;;  %v5191_v34 = vpop.f32.mrf.mxu1 }
 0x3c0   :  { %v774_v55 = vpack.c.bf16 %v767_v47, %v766_v46  ;;  %3894 = vpow2.f32 %v732_v32 }
 0x3c1   :  { %1133 = vmax.xlane.f32.xlu0 %v1132_v50  ;;  %1212 = vrot.lane.b32.xlu2 %v4745_v39, %s4210_s28  ;;  %v944_v63 = vmul.f32 1.442695, %v930_v61 }
 0x3c2   :  { %3550 = vmatmul.msk.bf16.vlgmr.msra.gmra.mxu2 %vm685_vm6, %v774_v55 }
 0x3c3   :  { %1303 = vmatpush.bf16.xpose.msra.mxu2 %v1297_v0  ;;  %3896 = vpow2.f32 %v944_v63  ;;  %v5205_v4 = vpop.f32.mrf.mxu0 }
 0x3c5   :  { %v5176_v13 = vpop.eup %3892 }
 0x3c6   :  { %v5172_v6 = vpop.xlane.xlu2 %949  ;;  %v963_v28 = vsel %vm685_vm6, %v5176_v13, 0.0  ;;  %v5189_v1 = vpop.eup %3894 }
 0x3c7   :  { %v755_v19 = vsel %vm685_vm6, %v5189_v1, 0.0  ;;  %v5203_v9 = vpop.f32.mrf.mxu1 }
 0x3c9   :  { %1136 = vmax.xlane.f32.xlu0 %v1135_v40  ;;  %v2252_v22 = vpop.permute.xlu0 %2251  ;;  %v5197_v44 = vpop.eup %3896 }
 0x3ca   :  { %3603 = vmatmul.msk.bf16.gmra.mxu0 %vm631_vm5, %v2252_v22  ;;  %v966_v24 = vsel %vm685_vm6, %v5197_v44, 0.0 }
 0x3cb   :  { %1304 = vmatpush.bf16.xpose.msra.mxu2 %v1294_v41  ;;  %v2040_v18 = vpop.permute.xlu1 %2039  ;;  %v5213_v50 = vpop.f32.mrf.mxu0 }
 0x3cc   :  { %3596 = vmatmul.msk.bf16.gmra.mxu1 %vm631_vm5, %v2040_v18 }
 0x3ce   :  { %v2254_v29 = vpop.permute.xlu2 %2253 }
 0x3cf   :  { %v5207_v46 = vpop.f32.mrf.mxu1 }
 0x3d3   :  { %1305 = vmatpush.bf16.xpose.msra.mxu2 %v1291_v10  ;;  %v5221_v2 = vpop.f32.mrf.mxu0 }
 0x3d6   :  { %964 = vadd.xlane.f32.xlu1 %v963_v28 }
 0x3d7   :  { %v5215_v0 = vpop.f32.mrf.mxu1 }
 0x3da   :  { %3604 = vmatmul.msk.bf16.gmra.mxu0 %vm631_vm5, %v2254_v29 }
 0x3db   :  { %1306 = vmatpush.bf16.xpose.msra.mxu2 %v1288_v16  ;;  %v5232_v61 = vpop.f32.mrf.mxu0  ;;  %v1896_v16 = vsel %vm685_vm6, %v5213_v50, -inf }
 0x3dd   :  { %1424 = vrot.lane.b32.xlu0 %v4702_v8, %s4211_s29 }
 0x3de   :  { %1127 = vmax.xlane.f32.xlu1 %v1126_v36  ;;  %v931_v36 = vsub.f32 %v5015_v53, %v5142_v42 }
 0x3df   :  { %v5223_v41 = vpop.f32.mrf.mxu1 }
 0x3e5   :  { %1420 = vrot.lane.b32.xlu0 %v4624_v56, %s4211_s29 }
 0x3e6   :  { %756 = vadd.xlane.f32.xlu1 %v755_v19 }
 0x3ea   :  { %967 = vadd.xlane.f32.xlu2 %v966_v24 }
 0x3f4   :  { %v5209_v47 = vpop.xlane.xlu0 %952 }
 0x3f6   :  { %v742_v55 = vpop.xlane.xlu1 %741 }
 0x3f7   :  { %3898 = vrcp.f32 %v742_v55  ;;  %v946_v55 = vmul.f32 1.442695, %v931_v36 }
 0x3fc   :  { %v5219_v48 = vpop.xlane.xlu0 %958 }
 0x3fd   :  { %v3899_v40 = vpop.eup %3898 }
 0x3fe   :  { %v768_v10 = vmul.f32 %v3899_v40, %v5088_v5  ;;  %v5238_v5 = vpop.f32.mrf.mxu1 }
 0x3ff   :  { %1426 = vrot.lane.b32.xlu1 %v4745_v39, %s4211_s29  ;;  %v5225_v39 = vpop.xlane.xlu1 %955 }
 0x402   :  { %1210 = vrot.lane.b32.xlu2 %v4702_v8, %s4210_s28  ;;  %v1679_v8 = vsel %vm685_vm6, %v5203_v9, -inf }
 0x404   :  { %v745_v11 = vpop.xlane.xlu2 %744  ;;  %v751_v32 = vpop.xlane.xlu0 %750 }
 0x405   :  { %3900 = vrcp.f32 %v745_v11 }
 0x406   :  { %v5252_v53 = vpop.f32.mrf.mxu1 }
 0x40b   :  { %v3901_v22 = vpop.eup %3900 }
 0x40c   :  { %v748_v18 = vpop.xlane.xlu2 %747  ;;  %v769_v14 = vmul.f32 %v3901_v22, %v5108_v25  ;;  %v5240_v25 = vpop.xlane.xlu1 %1118  ;;  %v1688_v22 = vsel %vm685_vm6, %v5223_v41, -inf }
 0x40d   :  { %3902 = vrcp.f32 %v748_v18  ;;  %v5249_v18 = vpop.f32.mrf.mxu0 }
 0x40e   :  { %v775_v28 = vpack.c.bf16 %v769_v14, %v768_v10  ;;  %3904 = vrcp.f32 %v751_v32  ;;  %v5263_v32 = vpop.f32.mrf.mxu1 }
 0x40f   :  { %1680 = vmax.xlane.f32.xlu0 %v1679_v8  ;;  %3906 = vpow2.f32 %v946_v55 }
 0x410   :  { %3551 = vmatmul.msk.bf16.gmra.mxu2 %vm685_vm6, %v775_v28 }
 0x413   :  { %v3903_v63 = vpop.eup %3902 }
 0x414   :  { %v5234_v29 = vpop.xlane.xlu2 %961  ;;  %v3905_v19 = vpop.eup %3904  ;;  %v770_v24 = vmul.f32 %v3903_v63, %v5120_v7  ;;  %v1697_v63 = vsel %vm685_vm6, %v5263_v32, -inf }
 0x415   :  { %v771_v40 = vmul.f32 %v3905_v19, %v5106_v15  ;;  %v5255_v42 = vpop.eup %3906  ;;  %v1905_v15 = vsel %vm685_vm6, %v5249_v18, -inf  ;;  %v5259_v8 = vpop.f32.mrf.mxu0  ;;  %v1893_v19 = vsel %vm685_vm6, %v5205_v4, -inf }
 0x416   :  { %v969_v28 = vsel %vm685_vm6, %v5255_v42, 0.0 }
 0x417   :  { %1897 = vmax.xlane.f32.xlu0 %v1896_v16  ;;  %v776_v14 = vpack.c.bf16 %v771_v40, %v770_v24  ;;  %v1890_v16 = vsel %vm685_vm6, %v5201_v57, -inf  ;;  %v1116_v24 = vpop.xlane.xlu0 %1115 }
 0x41c   :  { %v2256_v11 = vpop.permute.xlu2 %2255 }
 0x41d   :  { %3605 = vmatmul.msk.bf16.gmra.mxu0 %vm631_vm5, %v2256_v11  ;;  %v5269_v36 = vpop.f32.mrf.mxu0  ;;  %v1682_v11 = vsel %vm685_vm6, %v5207_v46, -inf }
 0x41e   :  { %v2042_v10 = vpop.permute.xlu1 %2041  ;;  %v1911_v55 = vsel %vm685_vm6, %v5269_v36, -inf }
 0x41f   :  { %1689 = vmax.xlane.f32.xlu0 %v1688_v22  ;;  %3597 = vmatmul.msk.bf16.gmra.mxu1 %vm631_vm5, %v2042_v10  ;;  %v754_v40 = vpop.xlane.xlu0 %753  ;;  %v1899_v22 = vsel %vm685_vm6, %v5221_v2, -inf }
 0x420   :  { %3552 = vmatmul.msk.bf16.gmra.mxu2 %vm685_vm6, %v776_v14  ;;  %3908 = vrcp.f32 %v754_v40  ;;  %v1138_v40 = vsub.f32 %v5085_v27, %v1116_v24 }
 0x424   :  { %v1213_v7 = vpop.permute.xlu2 %1212 }
 0x425   :  { %1234 = vmatpush.bf16.msrb.mxu3 %v1213_v7  ;;  %v1691_v7 = vsel %vm685_vm6, %v5238_v5, -inf }
 0x427   :  { %1906 = vmax.xlane.f32.xlu0 %v1905_v15  ;;  %v5281_v10 = vpop.xlane.xlu0 %1121 }
 0x429   :  { %970 = vadd.xlane.f32.xlu1 %v969_v28 }
 0x42b   :  { %1891 = vmax.xlane.f32.xlu2 %v1890_v16 }
 0x42f   :  { %1698 = vmax.xlane.f32.xlu0 %v1697_v63  ;;  %v5295_v28 = vpop.xlane.xlu0 %1124 }
 0x433   :  { %1894 = vmax.xlane.f32.xlu2 %v1893_v19 }
 0x437   :  { %1912 = vmax.xlane.f32.xlu0 %v1911_v55  ;;  %v5297_v63 = vpop.xlane.xlu0 %1130  ;;  %v3909_v55 = vpop.eup %3908 }
 0x43b   :  { %1683 = vmax.xlane.f32.xlu2 %v1682_v11 }
 0x442   :  { %1208 = vrot.lane.b32.xlu1 %v4668_v17, %s4210_s28 }
 0x443   :  { %1900 = vmax.xlane.f32.xlu2 %v1899_v22 }
 0x449   :  { %v965_v14 = vpop.xlane.xlu1 %964 }
 0x44a   :  { %1422 = vrot.lane.b32.xlu1 %v4668_v17, %s4211_s29  ;;  %v772_v17 = vmul.f32 %v3909_v55, %v5126_v62 }
 0x44b   :  { %1770 = vrot.lane.b32.xlu0 %v4811_v33, %s4204_s24  ;;  %1692 = vmax.xlane.f32.xlu2 %v1691_v7 }
 0x451   :  { %v5289_v15 = vpop.xlane.xlu1 %1127 }
 0x452   :  { %1206 = vrot.lane.b32.xlu1 %v4624_v56, %s4210_s28  ;;  %v5305_v56 = vpop.xlane.xlu0 %1133 }
 0x453   :  { %1982 = vrot.lane.b32.xlu0 %v4787_v35, %s4205_s25 }
 0x459   :  { %v757_v16 = vpop.xlane.xlu1 %756 }
 0x45a   :  { %3910 = vrcp.f32 %v757_v16  ;;  %v1146_v16 = vmul.f32 1.442695, %v1138_v40  ;;  %v1685_v40 = vsel %vm685_vm6, %v5215_v0, -inf }
 0x45b   :  { %3912 = vrcp.f32 %v5209_v47 }
 0x45c   :  { %3914 = vrcp.f32 %v5172_v6 }
 0x45d   :  { %v968_v19 = vpop.xlane.xlu2 %967  ;;  %3916 = vpow2.f32 %v1146_v16 }
 0x45e   :  { %3918 = vrcp.f32 %v5225_v39 }
 0x45f   :  { %3920 = vrcp.f32 %v5219_v48 }
 0x460   :  { %v3911_v11 = vpop.eup %3910  ;;  %3922 = vrcp.f32 %v965_v14 }
 0x461   :  { %v773_v22 = vmul.f32 %v3911_v11, %v5189_v1  ;;  %v3913_v62 = vpop.eup %3912  ;;  %3924 = vrcp.f32 %v5234_v29  ;;  %v1694_v29 = vsel %vm685_vm6, %v5252_v53, -inf }
 0x462   :  { %v3915_v1 = vpop.eup %3914  ;;  %v981_v55 = vmul.f32 %v3913_v62, %v5083_v21  ;;  %v1676_v21 = vsel %vm685_vm6, %v5191_v34, -inf  ;;  %v1902_v62 = vsel %vm685_vm6, %v5232_v61, -inf  ;;  %3926 = vrcp.f32 %v968_v19 }
 0x463   :  { %1774 = vrot.lane.b32.xlu2 %v4914_v37, %s4204_s24  ;;  %v777_v7 = vpack.c.bf16 %v773_v22, %v772_v17  ;;  %v980_v11 = vmul.f32 %v3915_v1, %v5062_v12  ;;  %v5313_v17 = vpop.xlane.xlu0 %1136  ;;  %v5317_v27 = vpop.eup %3916 }
 0x464   :  { %v1162_v12 = vsel %vm685_vm6, %v5317_v27, 0.0  ;;  %v3919_v24 = vpop.eup %3918 }
 0x465   :  { %v1211_v38 = vpop.permute.xlu2 %1210  ;;  %3553 = vmatmul.msk.bf16.gmra.mxu2 %vm685_vm6, %v777_v7  ;;  %v3921_v22 = vpop.eup %3920  ;;  %v982_v7 = vmul.f32 %v3919_v24, %v5097_v51 }
 0x466   :  { %1235 = vmatpush.bf16.msrb.mxu3 %v1211_v38  ;;  %v988_v38 = vpack.c.bf16 %v981_v55, %v980_v11  ;;  %v983_v39 = vmul.f32 %v3921_v22, %v5095_v59  ;;  %v3923_v1 = vpop.eup %3922  ;;  %v5332_v55 = vpop.f32.mrf.mxu0 }
 0x467   :  { %v3925_v16 = vpop.eup %3924  ;;  %v985_v59 = vmul.f32 %v3923_v1, %v5176_v13 }
 0x468   :  { %v989_v48 = vpack.c.bf16 %v983_v39, %v982_v7  ;;  %v984_v11 = vmul.f32 %v3925_v16, %v5130_v26  ;;  %v1908_v26 = vsel %vm685_vm6, %v5259_v8, -inf  ;;  %v3927_v22 = vpop.eup %3926  ;;  %v1139_v7 = vsub.f32 %v5102_v3, %v5240_v25 }
 0x469   :  { %v1140_v3 = vsub.f32 %v5116_v43, %v5281_v10  ;;  %v1143_v10 = vsub.f32 %v5146_v20, %v5297_v63 }
 0x46a   :  { %v990_v14 = vpack.c.bf16 %v985_v59, %v984_v11  ;;  %v1148_v1 = vmul.f32 1.442695, %v1139_v7 }
 0x46b   :  { %1772 = vrot.lane.b32.xlu2 %v4837_v60, %s4204_s24  ;;  %v1425_v6 = vpop.permute.xlu0 %1424  ;;  %v1156_v7 = vmul.f32 1.442695, %v1143_v10 }
 0x471   :  { %v1427_v47 = vpop.permute.xlu1 %1426 }
 0x473   :  { %v5335_v51 = vpop.permute.xlu0 %1420 }
 0x475   :  { %3558 = vmatmul.msk.bf16.vlgmr.msrb.gmra.mxu2 %vm685_vm6, %v988_v38  ;;  %v2318_v38 = vsel %vm685_vm6, %v5332_v55, -inf }
 0x476   :  { %1448 = vmatpush.bf16.msrb.mxu2 %v1427_v47  ;;  %v5343_v47 = vpop.f32.mrf.mxu0 }
 0x477   :  { %v2321_v13 = vsel %vm685_vm6, %v5343_v47, -inf }
 0x47a   :  { %1449 = vmatpush.bf16.msrb.mxu2 %v1425_v6 }
 0x47c   :  { %1677 = vmax.xlane.f32.xlu1 %v1676_v21 }
 0x47d   :  { %1163 = vadd.xlane.f32.xlu0 %v1162_v12 }
 0x482   :  { %v5345_v6 = vpop.xlane.xlu0 %1680 }
 0x484   :  { %1686 = vmax.xlane.f32.xlu1 %v1685_v40 }
 0x485   :  { %3559 = vmatmul.msk.bf16.gmra.mxu2 %vm685_vm6, %v989_v48  ;;  %v986_v48 = vmul.f32 %v3927_v22, %v5197_v44 }
 0x48a   :  { %v5354_v40 = vpop.xlane.xlu0 %1897 }
 0x48c   :  { %1903 = vmax.xlane.f32.xlu1 %v1902_v62 }
 0x492   :  { %v5366_v44 = vpop.xlane.xlu0 %1689 }
 0x494   :  { %2319 = vmax.xlane.f32.xlu2 %v2318_v38  ;;  %1695 = vmax.xlane.f32.xlu1 %v1694_v29  ;;  %v1150_v29 = vmul.f32 1.442695, %v1140_v3 }
 0x495   :  { %3560 = vmatmul.msk.bf16.gmra.mxu2 %vm685_vm6, %v990_v14 }
 0x49c   :  { %2322 = vmax.xlane.f32.xlu2 %v2321_v13  ;;  %1909 = vmax.xlane.f32.xlu1 %v1908_v26  ;;  %v971_v21 = vpop.xlane.xlu1 %970  ;;  %v1141_v13 = vsub.f32 %v5128_v31, %v5295_v28  ;;  %v5376_v26 = vpop.f32.mrf.mxu2 }
 0x49d   :  { %3928 = vrcp.f32 %v971_v21  ;;  %6659 = vst [vmem:[#allocation3_spill] sm:$0xff] %v5376_v26  ;;  %v5388_v31 = vpop.xlane.xlu0 %1906 }
 0x49e   :  { %v1892_v12 = vpop.xlane.xlu2 %1891 }
 0x49f   :  { %v1914_v24 = vsub.f32 %v5201_v57, %v1892_v12 }
 0x4a1   :  { %v1922_v39 = vmul.f32 1.442695, %v1914_v24  ;;  %v1152_v24 = vmul.f32 1.442695, %v1141_v13 }
 0x4a3   :  { %v3929_v19 = vpop.eup %3928  ;;  %3930 = vpow2.f32 %v1922_v39  ;;  %v1144_v39 = vsub.f32 %v5152_v54, %v5305_v56 }
 0x4a4   :  { %v987_v62 = vmul.f32 %v3929_v19, %v5255_v42  ;;  %3932 = vpow2.f32 %v1148_v1  ;;  %v5368_v42 = vpop.f32.mrf.mxu1  ;;  %v5400_v19 = vpop.f32.mrf.mxu2 }
 0x4a5   :  { %6660 = vst [vmem:[#allocation4_spill] sm:$0xff] %v5400_v19  ;;  %v5414_v56 = vpop.xlane.xlu0 %1698 }
 0x4a6   :  { %v1895_v16 = vpop.xlane.xlu2 %1894  ;;  %v991_v59 = vpack.c.bf16 %v987_v62, %v986_v48 }
 0x4a7   :  { %v1915_v11 = vsub.f32 %v5205_v4, %v1895_v16  ;;  %v1158_v16 = vmul.f32 1.442695, %v1144_v39  ;;  %v1142_v39 = vsub.f32 %v5136_v52, %v5289_v15 }
 0x4a8   :  { %3561 = vmatmul.msk.bf16.gmra.mxu2 %vm685_vm6, %v991_v59 }
 0x4a9   :  { %v5360_v57 = vpop.eup %3930  ;;  %v1924_v25 = vmul.f32 1.442695, %v1915_v11 }
 0x4aa   :  { %v1938_v38 = vsel %vm685_vm6, %v5360_v57, 0.0  ;;  %v5372_v14 = vpop.eup %3932 }
 0x4ab   :  { %3934 = vpow2.f32 %v1924_v25  ;;  %1939 = vadd.xlane.f32.xlu0 %v1938_v38  ;;  %v1165_v12 = vsel %vm685_vm6, %v5372_v14, 0.0 }
 0x4ac   :  { %3936 = vpow2.f32 %v1150_v29  ;;  %v5394_v63 = vpop.f32.mrf.mxu1  ;;  %v5417_v11 = vpop.f32.mrf.mxu2 }
 0x4ad   :  { %3938 = vpow2.f32 %v1152_v24  ;;  %v2107_v48 = vsel %vm685_vm6, %v5394_v63, -inf  ;;  %6661 = vst [vmem:[#allocation5_spill] sm:$0xff] %v5417_v11 }
 0x4ae   :  { %v5370_v4 = vpop.xlane.xlu2 %1683  ;;  %3940 = vpow2.f32 %v1156_v7 }
 0x4af   :  { %3942 = vpow2.f32 %v1158_v16  ;;  %v1154_v16 = vmul.f32 1.442695, %v1142_v39 }
 0x4b1   :  { %v5378_v43 = vpop.eup %3934 }
 0x4b2   :  { %v1941_v21 = vsel %vm685_vm6, %v5378_v43, 0.0  ;;  %v5392_v20 = vpop.eup %3936 }
 0x4b3   :  { %1942 = vadd.xlane.f32.xlu2 %v1941_v21  ;;  %1166 = vadd.xlane.f32.xlu0 %v1165_v12  ;;  %v1168_v62 = vsel %vm685_vm6, %v5392_v20, 0.0 }
 0x4b4   :  { %v1209_v22 = vpop.permute.xlu1 %1208  ;;  %v5433_v21 = vpop.f32.mrf.mxu2 }
 0x4b5   :  { %1988 = vrot.lane.b32.xlu1 %v4914_v37, %s4205_s25  ;;  %1236 = vmatpush.bf16.msrb.mxu3 %v1209_v22  ;;  %6662 = vst [vmem:[#allocation6_spill] sm:$0xff] %v5433_v21 }
 0x4b6   :  { %v5390_v28 = vpop.xlane.xlu2 %1900 }
 0x4b8   :  { %3570 = vmatmul.msk.bf16.vlgmr.msra.gmra.mxu2 %vm631_vm5, %v4860_v58  ;;  %v5408_v58 = vpop.eup %3938 }
 0x4b9   :  { %v5412_v54 = vpop.eup %3940  ;;  %v1171_v3 = vsel %vm685_vm6, %v5408_v58, 0.0 }
 0x4ba   :  { %v1177_v25 = vsel %vm685_vm6, %v5412_v54, 0.0  ;;  %v5425_v13 = vpop.eup %3942 }
 0x4bb   :  { %2108 = vmax.xlane.f32.xlu0 %v2107_v48  ;;  %1169 = vadd.xlane.f32.xlu2 %v1168_v62  ;;  %v1180_v10 = vsel %vm685_vm6, %v5425_v13, 0.0 }
 0x4bc   :  { %v1423_v1 = vpop.permute.xlu1 %1422  ;;  %v5437_v22 = vpop.f32.mrf.mxu2 }
 0x4bd   :  { %1986 = vrot.lane.b32.xlu1 %v4837_v60, %s4205_s25  ;;  %1450 = vmatpush.bf16.msrb.mxu2 %v1423_v1  ;;  %6663 = vst [vmem:[#allocation7_spill] sm:$0xff] %v5437_v22 }
 0x4be   :  { %v5410_v59 = vpop.xlane.xlu2 %1692 }
 0x4c1   :  { %1451 = vmatpush.bf16.msrb.mxu2 %v5335_v51  ;;  %v5429_v51 = vpop.xlane.xlu0 %1912 }
 0x4c3   :  { %1172 = vadd.xlane.f32.xlu2 %v1171_v3  ;;  %1178 = vadd.xlane.f32.xlu0 %v1177_v25  ;;  %v1701_v3 = vsub.f32 %v5203_v9, %v5345_v6  ;;  %v1145_v25 = vsub.f32 %v5163_v45, %v5313_v17  ;;  %v1916_v45 = vsub.f32 %v5213_v50, %v5354_v40 }
 0x4c4   :  { %v1207_v38 = vpop.permute.xlu1 %1206 }
 0x4c5   :  { %1984 = vrot.lane.b32.xlu1 %v4811_v33, %s4205_s25  ;;  %1237 = vmatpush.bf16.msrb.mxu3 %v1207_v38  ;;  %v1710_v38 = vmul.f32 1.442695, %v1701_v3 }
 0x4c6   :  { %v1775_v29 = vpop.permute.xlu2 %1774 }
 0x4c8   :  { %3571 = vmatmul.msk.bf16.gmra.mxu2 %vm631_vm5, %v4845_v30  ;;  %v5441_v30 = vpop.f32.mrf.mxu2 }
 0x4c9   :  { %1796 = vmatpush.bf16.msra.mxu3 %v1775_v29  ;;  %v1771_v24 = vpop.permute.xlu0 %1770  ;;  %6664 = vst [vmem:[#allocation8_spill] sm:$0xff] %v5441_v30 }
 0x4cb   :  { %1181 = vadd.xlane.f32.xlu2 %v1180_v10 }
 0x4cd   :  { %1768 = vrot.lane.b32.xlu1 %v4787_v35, %s4204_s24 }
 0x4ce   :  { %v1773_v12 = vpop.permute.xlu2 %1772 }
 0x4cf   :  { %1797 = vmatpush.bf16.msra.mxu3 %v1773_v12  ;;  %v1926_v12 = vmul.f32 1.442695, %v1916_v45 }
 0x4d3   :  { %1798 = vmatpush.bf16.msra.mxu3 %v1771_v24 }
 0x4d8   :  { %3572 = vmatmul.msk.bf16.gmra.mxu2 %vm631_vm5, %v4907_v49 }
 0x4e8   :  { %v5443_v7 = vpop.f32.mrf.mxu2  ;;  %3573 = vmatmul.msk.bf16.gmra.mxu2 %vm631_vm5, %v4947_v23  ;;  %v2104_v23 = vsel %vm685_vm6, %v5368_v42, -inf }
 0x4e9   :  { %6665 = vst [vmem:[#allocation9_spill] sm:$0xff] %v5443_v7 }
 0x4ef   :  { %v1678_v48 = vpop.xlane.xlu1 %1677 }
 0x4f0   :  { %v1700_v62 = vsub.f32 %v5191_v34, %v1678_v48  ;;  %v5450_v1 = vpop.f32.mrf.mxu2  ;;  %v1160_v34 = vmul.f32 1.442695, %v1145_v25 }
 0x4f1   :  { %6666 = vst [vmem:[#allocation10_spill] sm:$0xff] %v5450_v1 }
 0x4f2   :  { %v1708_v49 = vmul.f32 1.442695, %v1700_v62  ;;  %v5484_v62 = vpop.f32.mrf.mxu1 }
 0x4f4   :  { %3944 = vpow2.f32 %v1708_v49  ;;  %v1983_v49 = vpop.permute.xlu0 %1982 }
 0x4f5   :  { %3946 = vpow2.f32 %v1154_v16 }
 0x4f6   :  { %3948 = vpow2.f32 %v1710_v38 }
 0x4f7   :  { %2105 = vmax.xlane.f32.xlu1 %v2104_v23  ;;  %3950 = vpow2.f32 %v1160_v34  ;;  %v5474_v24 = vpop.xlane.xlu1 %1686 }
 0x4f8   :  { %v5458_v52 = vpop.f32.mrf.mxu2  ;;  %3952 = vpow2.f32 %v1926_v12 }
 0x4fa   :  { %v5460_v15 = vpop.eup %3944  ;;  %v5494_v23 = vpop.f32.mrf.mxu1 }
 0x4fb   :  { %v5462_v29 = vpop.eup %3946  ;;  %v1724_v9 = vsel %vm685_vm6, %v5460_v15, 0.0 }
 0x4fc   :  { %1725 = vadd.xlane.f32.xlu0 %v1724_v9  ;;  %v1174_v17 = vsel %vm685_vm6, %v5462_v29, 0.0  ;;  %v5470_v6 = vpop.eup %3948  ;;  %v1164_v45 = vpop.xlane.xlu0 %1163 }
 0x4fd   :  { %v5476_v39 = vpop.eup %3950  ;;  %v1727_v48 = vsel %vm685_vm6, %v5470_v6, 0.0 }
 0x4fe   :  { %v1183_v50 = vsel %vm685_vm6, %v5476_v39, 0.0  ;;  %v5486_v16 = vpop.eup %3952 }
 0x4ff   :  { %1175 = vadd.xlane.f32.xlu1 %v1174_v17  ;;  %v5488_v3 = vpop.xlane.xlu1 %1903  ;;  %v1944_v25 = vsel %vm685_vm6, %v5486_v16, 0.0  ;;  %v2113_v17 = vsel %vm685_vm6, %v5494_v23, -inf }
 0x500   :  { %v5472_v10 = vpop.f32.mrf.mxu2 }
 0x504   :  { %1728 = vadd.xlane.f32.xlu0 %v1727_v48 }
 0x507   :  { %1184 = vadd.xlane.f32.xlu1 %v1183_v50  ;;  %v5496_v34 = vpop.xlane.xlu2 %2319  ;;  %v5498_v9 = vpop.xlane.xlu1 %1695 }
 0x508   :  { %v5482_v40 = vpop.f32.mrf.mxu2 }
 0x509   :  { %6667 = vst [vmem:[#allocation11_spill] sm:$0xff] %v5482_v40 }
 0x50f   :  { %1945 = vadd.xlane.f32.xlu1 %v1944_v25  ;;  %v5504_v48 = vpop.xlane.xlu2 %2322  ;;  %v5506_v7 = vpop.xlane.xlu1 %1909 }
 0x510   :  { %v5492_v38 = vpop.f32.mrf.mxu2 }
 0x511   :  { %6668 = vst [vmem:[#allocation12_spill] sm:$0xff] %v5492_v38 }
 0x517   :  { %2114 = vmax.xlane.f32.xlu1 %v2113_v17 }
 0x518   :  { %v5502_v12 = vpop.f32.mrf.mxu2 }
 0x519   :  { %6669 = vst [vmem:[#allocation13_spill] sm:$0xff] %v5502_v12 }
 0x51e   :  { %v1940_v50 = vpop.xlane.xlu0 %1939 }
 0x51f   :  { %3954 = vrcp.f32 %v1940_v50 }
 0x520   :  { %v5508_v25 = vpop.f32.mrf.mxu2  ;;  %3956 = vrcp.f32 %v1164_v45 }
 0x521   :  { %6670 = vst [vmem:[#allocation14_spill] sm:$0xff] %v5508_v25 }
 0x525   :  { %v3955_v11 = vpop.eup %3954 }
 0x526   :  { %v1943_v1 = vpop.xlane.xlu2 %1942  ;;  %v1167_v22 = vpop.xlane.xlu0 %1166  ;;  %v5513_v38 = vmul.f32 %v3955_v11, %v5360_v57 }
 0x527   :  { %3958 = vrcp.f32 %v1943_v1  ;;  %v1989_v30 = vpop.permute.xlu1 %1988  ;;  %v3957_v17 = vpop.eup %3956 }
 0x528   :  { %3960 = vrcp.f32 %v1167_v22  ;;  %2010 = vmatpush.bf16.msra.mxu2 %v1989_v30  ;;  %6672 = vst [vmem:[#allocation16_spill] sm:$0xff] %v5513_v38  ;;  %v1194_v45 = vmul.f32 %v3957_v17, %v5317_v27 }
 0x52b   :  { %v5510_v21 = vpop.f32.mrf.mxu2 }
 0x52c   :  { %6671 = vst [vmem:[#allocation15_spill] sm:$0xff] %v5510_v21  ;;  %v1702_v21 = vsub.f32 %v5207_v46, %v5370_v4 }
 0x52d   :  { %v3959_v26 = vpop.eup %3958 }
 0x52e   :  { %v3961_v19 = vpop.eup %3960  ;;  %v5516_v40 = vmul.f32 %v3959_v26, %v5378_v43  ;;  %v1170_v50 = vpop.xlane.xlu2 %1169  ;;  %v1712_v43 = vmul.f32 1.442695, %v1702_v21 }
 0x52f   :  { %v1195_v1 = vmul.f32 %v3961_v19, %v5372_v14  ;;  %v1987_v25 = vpop.permute.xlu1 %1986  ;;  %3962 = vrcp.f32 %v1170_v50 }
 0x530   :  { %2011 = vmatpush.bf16.msra.mxu2 %v1987_v25 }
 0x531   :  { %v1202_v30 = vpack.c.bf16 %v1195_v1, %v1194_v45 }
 0x533   :  { %3566 = vmatmul.msk.bf16.vlgmr.msrb.gmra.mxu3 %vm685_vm6, %v1202_v30  ;;  %v5525_v57 = vpop.f32.mrf.mxu2 }
 0x534   :  { %6673 = vst [vmem:[#allocation17_spill] sm:$0xff] %v5525_v57 }
 0x535   :  { %v3963_v14 = vpop.eup %3962 }
 0x536   :  { %v1173_v26 = vpop.xlane.xlu2 %1172  ;;  %v1196_v46 = vmul.f32 %v3963_v14, %v5392_v20  ;;  %v1703_v20 = vsub.f32 %v5215_v0, %v5474_v24 }
 0x537   :  { %3964 = vrcp.f32 %v1173_v26  ;;  %v1985_v27 = vpop.permute.xlu1 %1984 }
 0x538   :  { %2012 = vmatpush.bf16.msra.mxu2 %v1985_v27  ;;  %3966 = vpow2.f32 %v1712_v43  ;;  %v1714_v26 = vmul.f32 1.442695, %v1703_v20  ;;  %v1917_v43 = vsub.f32 %v5221_v2, %v5390_v28 }
 0x53a   :  { %3968 = vpow2.f32 %v1714_v26  ;;  %v1928_v0 = vmul.f32 1.442695, %v1917_v43  ;;  %v5578_v43 = vpop.f32.mrf.mxu0 }
 0x53b   :  { %v5527_v19 = vpop.f32.mrf.mxu2 }
 0x53c   :  { %2013 = vmatpush.bf16.msra.mxu2 %v1983_v49  ;;  %v1328_v11 = vsel %vm685_vm6, %v5527_v19, -inf  ;;  %3970 = vpow2.f32 %v1928_v0 }
 0x53d   :  { %v3965_v25 = vpop.eup %3964  ;;  %1329 = vmax.xlane.f32.xlu2 %v1328_v11  ;;  %v2110_v11 = vsel %vm685_vm6, %v5484_v62, -inf }
 0x53e   :  { %v1197_v4 = vmul.f32 %v3965_v25, %v5408_v58  ;;  %v5533_v50 = vpop.eup %3966 }
 0x53f   :  { %v1769_v17 = vpop.permute.xlu1 %1768  ;;  %v1730_v49 = vsel %vm685_vm6, %v5533_v50, 0.0 }
 0x540   :  { %1799 = vmatpush.bf16.msra.mxu3 %v1769_v17  ;;  %v1203_v21 = vpack.c.bf16 %v1197_v4, %v1196_v46  ;;  %v5556_v24 = vpop.eup %3968  ;;  %v1705_v4 = vsub.f32 %v5238_v5, %v5410_v59 }
 0x541   :  { %v1733_v2 = vsel %vm685_vm6, %v5556_v24, 0.0 }
 0x542   :  { %v5564_v46 = vpop.eup %3970 }
 0x543   :  { %3567 = vmatmul.msk.bf16.gmra.mxu3 %vm685_vm6, %v1203_v21  ;;  %v5536_v45 = vpop.f32.mrf.mxu2  ;;  %v1704_v21 = vsub.f32 %v5223_v41, %v5366_v44  ;;  %v2324_v41 = vsel %vm685_vm6, %v5578_v43, -inf }
 0x544   :  { %v1331_v1 = vsel %vm685_vm6, %v5536_v45, -inf }
 0x545   :  { %1731 = vadd.xlane.f32.xlu2 %v1730_v49  ;;  %1332 = vmax.xlane.f32.xlu0 %v1331_v1  ;;  %v5572_v49 = vpop.xlane.xlu0 %2108  ;;  %v1947_v1 = vsel %vm685_vm6, %v5564_v46, 0.0  ;;  %v1716_v26 = vmul.f32 1.442695, %v1704_v21 }
 0x54b   :  { %v5544_v58 = vpop.f32.mrf.mxu2 }
 0x54c   :  { %v1334_v30 = vsel %vm685_vm6, %v5544_v58, -inf }
 0x54d   :  { %1335 = vmax.xlane.f32.xlu0 %v1334_v30  ;;  %v1718_v30 = vmul.f32 1.442695, %v1705_v4 }
 0x54f   :  { %3972 = vpow2.f32 %v1718_v30 }
 0x550   :  { %3974 = vpow2.f32 %v1716_v26 }
 0x553   :  { %v5550_v27 = vpop.f32.mrf.mxu2 }
 0x554   :  { %v1337_v14 = vsel %vm685_vm6, %v5550_v27, -inf }
 0x555   :  { %1338 = vmax.xlane.f32.xlu2 %v1337_v14  ;;  %2111 = vmax.xlane.f32.xlu0 %v2110_v11  ;;  %v1179_v14 = vpop.xlane.xlu0 %1178  ;;  %v5588_v11 = vpop.eup %3972 }
 0x556   :  { %3976 = vrcp.f32 %v1179_v14  ;;  %v5590_v0 = vpop.eup %3974  ;;  %v1739_v4 = vsel %vm685_vm6, %v5588_v11, 0.0 }
 0x55b   :  { %v5558_v25 = vpop.f32.mrf.mxu2 }
 0x55c   :  { %v1340_v28 = vsel %vm685_vm6, %v5558_v25, -inf }
 0x55d   :  { %1734 = vadd.xlane.f32.xlu2 %v1733_v2  ;;  %1341 = vmax.xlane.f32.xlu0 %v1340_v28 }
 0x563   :  { %v5568_v17 = vpop.f32.mrf.mxu2 }
 0x564   :  { %v1343_v20 = vsel %vm685_vm6, %v5568_v17, -inf }
 0x565   :  { %1948 = vadd.xlane.f32.xlu2 %v1947_v1  ;;  %1344 = vmax.xlane.f32.xlu0 %v1343_v20  ;;  %v1736_v1 = vsel %vm685_vm6, %v5590_v0, 0.0  ;;  %v3977_v20 = vpop.eup %3976 }
 0x56a   :  { %v5580_v5 = vpop.xlane.xlu1 %2105 }
 0x56b   :  { %v5582_v59 = vpop.f32.mrf.mxu2 }
 0x56c   :  { %v1346_v44 = vsel %vm685_vm6, %v5582_v59, -inf }
 0x56d   :  { %2325 = vmax.xlane.f32.xlu2 %v2324_v41  ;;  %1347 = vmax.xlane.f32.xlu1 %v1346_v44  ;;  %v1199_v41 = vmul.f32 %v3977_v20, %v5412_v54 }
 0x56f   :  { %v1726_v22 = vpop.xlane.xlu0 %1725 }
 0x572   :  { %v1176_v2 = vpop.xlane.xlu1 %1175 }
 0x573   :  { %3978 = vrcp.f32 %v1176_v2  ;;  %v5592_v28 = vpop.f32.mrf.mxu2  ;;  %v1182_v2 = vpop.xlane.xlu2 %1181 }
 0x574   :  { %v1349_v21 = vsel %vm685_vm6, %v5592_v28, -inf }
 0x575   :  { %1740 = vadd.xlane.f32.xlu2 %v1739_v4  ;;  %1350 = vmax.xlane.f32.xlu0 %v1349_v21 }
 0x576   :  { %1737 = vadd.xlane.f32.xlu1 %v1736_v1 }
 0x577   :  { %v1729_v12 = vpop.xlane.xlu0 %1728 }
 0x579   :  { %v3979_v30 = vpop.eup %3978 }
 0x57a   :  { %v1198_v26 = vmul.f32 %v3979_v30, %v5462_v29  ;;  %v1185_v44 = vpop.xlane.xlu1 %1184 }
 0x57b   :  { %3980 = vrcp.f32 %v1185_v44 }
 0x57c   :  { %v1204_v14 = vpack.c.bf16 %v1199_v41, %v1198_v26  ;;  %3982 = vrcp.f32 %v1182_v2 }
 0x57d   :  { %3984 = vrcp.f32 %v1729_v12 }
 0x57e   :  { %3568 = vmatmul.msk.bf16.gmra.mxu3 %vm685_vm6, %v1204_v14  ;;  %3986 = vrcp.f32 %v1726_v22 }
 0x581   :  { %v3981_v4 = vpop.eup %3980 }
 0x582   :  { %v3983_v21 = vpop.eup %3982  ;;  %v1201_v57 = vmul.f32 %v3981_v4, %v5476_v39 }
 0x583   :  { %v1200_v1 = vmul.f32 %v3983_v21, %v5425_v13  ;;  %v3985_v54 = vpop.eup %3984 }
 0x584   :  { %v3987_v29 = vpop.eup %3986  ;;  %v1757_v20 = vmul.f32 %v3985_v54, %v5470_v6  ;;  %v5615_v6 = vpop.f32.mrf.mxu0 }
 0x585   :  { %v1205_v38 = vpack.c.bf16 %v1201_v57, %v1200_v1  ;;  %v1756_v30 = vmul.f32 %v3987_v29, %v5460_v15  ;;  %v2327_v21 = vsel %vm685_vm6, %v5615_v6, -inf }
 0x587   :  { %v1764_v26 = vpack.c.bf16 %v1757_v20, %v1756_v30  ;;  %v5630_v30 = vpop.f32.mrf.mxu1 }
 0x58c   :  { %v5626_v54 = vpop.f32.mrf.mxu0 }
 0x58e   :  { %3569 = vmatmul.msk.bf16.gmra.mxu3 %vm685_vm6, %v1205_v38 }
 0x59e   :  { %3582 = vmatmul.msk.bf16.vlgmr.msra.gmra.mxu3 %vm685_vm6, %v1764_v26 }
 0x5b0   :  { %v1330_v41 = vpop.xlane.xlu2 %1329 }
 0x5b1   :  { %v1352_v39 = vsub.f32 %v5527_v19, %v1330_v41  ;;  %v1920_v41 = vsub.f32 %v5259_v8, %v5506_v7 }
 0x5b3   :  { %v1360_v44 = vmul.f32 1.442695, %v1352_v39 }
 0x5b5   :  { %3988 = vpow2.f32 %v1360_v44  ;;  %v2116_v44 = vsel %vm685_vm6, %v5630_v30, -inf }
 0x5b8   :  { %v1333_v13 = vpop.xlane.xlu0 %1332  ;;  %v1732_v15 = vpop.xlane.xlu2 %1731 }
 0x5b9   :  { %v1353_v57 = vsub.f32 %v5536_v45, %v1333_v13  ;;  %v1919_v45 = vsub.f32 %v5249_v18, %v5388_v31  ;;  %v1918_v18 = vsub.f32 %v5232_v61, %v5488_v3 }
 0x5bb   :  { %v5611_v38 = vpop.eup %3988  ;;  %v1362_v12 = vmul.f32 1.442695, %v1353_v57  ;;  %v1932_v29 = vmul.f32 1.442695, %v1919_v45  ;;  %v1946_v57 = vpop.xlane.xlu1 %1945 }
 0x5bc   :  { %v1376_v22 = vsel %vm685_vm6, %v5611_v38, 0.0 }
 0x5bd   :  { %3990 = vpow2.f32 %v1362_v12  ;;  %1377 = vadd.xlane.f32.xlu0 %v1376_v22  ;;  %v1934_v12 = vmul.f32 1.442695, %v1920_v41  ;;  %v5643_v22 = vpop.f32.mrf.mxu0 }
 0x5c0   :  { %v1336_v14 = vpop.xlane.xlu0 %1335 }
 0x5c1   :  { %v1354_v2 = vsub.f32 %v5544_v58, %v1336_v14 }
 0x5c3   :  { %v5618_v19 = vpop.eup %3990  ;;  %v1364_v4 = vmul.f32 1.442695, %v1354_v2  ;;  %v1707_v2 = vsub.f32 %v5263_v32, %v5414_v56  ;;  %v5662_v56 = vpop.xlane.xlu1 %2114 }
 0x5c4   :  { %v1379_v1 = vsel %vm685_vm6, %v5618_v19, 0.0 }
 0x5c5   :  { %3992 = vpow2.f32 %v1364_v4  ;;  %2328 = vmax.xlane.f32.xlu0 %v2327_v21  ;;  %1380 = vadd.xlane.f32.xlu2 %v1379_v1  ;;  %v1722_v32 = vmul.f32 1.442695, %v1707_v2 }
 0x5c6   :  { %3994 = vpow2.f32 %v1932_v29  ;;  %v5658_v29 = vpop.f32.mrf.mxu1 }
 0x5c8   :  { %v1339_v20 = vpop.xlane.xlu2 %1338  ;;  %v5628_v58 = vpop.xlane.xlu0 %2111 }
 0x5c9   :  { %v1355_v26 = vsub.f32 %v5550_v27, %v1339_v20  ;;  %v1930_v27 = vmul.f32 1.442695, %v1918_v18 }
 0x5cb   :  { %v5635_v31 = vpop.eup %3992  ;;  %v1366_v39 = vmul.f32 1.442695, %v1355_v26 }
 0x5cc   :  { %v1382_v13 = vsel %vm685_vm6, %v5635_v31, 0.0  ;;  %v5645_v8 = vpop.eup %3994 }
 0x5cd   :  { %3996 = vpow2.f32 %v1366_v39  ;;  %2117 = vmax.xlane.f32.xlu2 %v2116_v44  ;;  %1383 = vadd.xlane.f32.xlu1 %v1382_v13  ;;  %v1953_v21 = vsel %vm685_vm6, %v5645_v8, 0.0 }
 0x5ce   :  { %3998 = vrcp.f32 %v1732_v15  ;;  %v2333_v15 = vsel %vm685_vm6, %v5643_v22, -inf }
 0x5d0   :  { %v1735_v61 = vpop.xlane.xlu2 %1734  ;;  %v1342_v3 = vpop.xlane.xlu0 %1341 }
 0x5d1   :  { %4000 = vrcp.f32 %v1735_v61  ;;  %v1356_v14 = vsub.f32 %v5558_v25, %v1342_v3  ;;  %v2330_v61 = vsel %vm685_vm6, %v5626_v54, -inf }
 0x5d2   :  { %4002 = vpow2.f32 %v1930_v27  ;;  %v1706_v27 = vsub.f32 %v5252_v53, %v5498_v9  ;;  %v5678_v9 = vpop.f32.mrf.mxu1 }
 0x5d3   :  { %v5647_v7 = vpop.eup %3996  ;;  %4004 = vpow2.f32 %v1934_v12  ;;  %v1368_v25 = vmul.f32 1.442695, %v1356_v14 }
 0x5d4   :  { %v1385_v4 = vsel %vm685_vm6, %v5647_v7, 0.0  ;;  %v3999_v45 = vpop.eup %3998  ;;  %4006 = vrcp.f32 %v1946_v57  ;;  %v1720_v3 = vmul.f32 1.442695, %v1706_v27 }
 0x5d5   :  { %1386 = vadd.xlane.f32.xlu0 %v1385_v4  ;;  %2334 = vmax.xlane.f32.xlu2 %v2333_v15  ;;  %v1758_v18 = vmul.f32 %v3999_v45, %v5533_v50 }
 0x5d6   :  { %1954 = vadd.xlane.f32.xlu1 %v1953_v21 }
 0x5d7   :  { %v4001_v1 = vpop.eup %4000 }
 0x5d8   :  { %v5660_v20 = vpop.eup %4002  ;;  %v1949_v26 = vpop.xlane.xlu2 %1948  ;;  %v1759_v41 = vmul.f32 %v4001_v1, %v5556_v24 }
 0x5d9   :  { %v5666_v39 = vpop.eup %4004  ;;  %4008 = vrcp.f32 %v1949_v26  ;;  %v1345_v44 = vpop.xlane.xlu0 %1344  ;;  %v1950_v12 = vsel %vm685_vm6, %v5660_v20, 0.0 }
 0x5da   :  { %v1765_v13 = vpack.c.bf16 %v1759_v41, %v1758_v18  ;;  %4010 = vpow2.f32 %v1368_v25  ;;  %v1357_v57 = vsub.f32 %v5568_v17, %v1345_v44  ;;  %v1956_v50 = vsel %vm685_vm6, %v5666_v39, 0.0  ;;  %v4007_v24 = vpop.eup %4006 }
 0x5db   :  { %4012 = vpow2.f32 %v1722_v32  ;;  %v5681_v17 = vmul.f32 %v4007_v24, %v5486_v16  ;;  %v2119_v16 = vsel %vm685_vm6, %v5658_v29, -inf }
 0x5dc   :  { %3583 = vmatmul.msk.bf16.gmra.mxu3 %vm685_vm6, %v1765_v13  ;;  %v1370_v2 = vmul.f32 1.442695, %v1357_v57  ;;  %4014 = vpow2.f32 %v1720_v3  ;;  %v5703_v13 = vpop.f32.mrf.mxu1 }
 0x5dd   :  { %1951 = vadd.xlane.f32.xlu0 %v1950_v12  ;;  %1957 = vadd.xlane.f32.xlu2 %v1956_v50  ;;  %v1921_v12 = vsub.f32 %v5269_v36, %v5429_v51 }
 0x5de   :  { %2331 = vmax.xlane.f32.xlu1 %v2330_v61  ;;  %4016 = vpow2.f32 %v1370_v2  ;;  %v2125_v61 = vsel %vm685_vm6, %v5703_v13, -inf }
 0x5df   :  { %v4009_v53 = vpop.eup %4008  ;;  %v1936_v3 = vmul.f32 1.442695, %v1921_v12 }
 0x5e0   :  { %v5684_v14 = vmul.f32 %v4009_v53, %v5564_v46  ;;  %v5686_v4 = vpop.xlane.xlu2 %2325  ;;  %v1348_v15 = vpop.xlane.xlu1 %1347 }
 0x5e1   :  { %v5688_v45 = vpop.eup %4010  ;;  %v1358_v25 = vsub.f32 %v5582_v59, %v1348_v15  ;;  %v5716_v15 = vpop.f32.mrf.mxu0 }
 0x5e2   :  { %v5690_v21 = vpop.eup %4012  ;;  %v1979_v1 = vpack.c.bf16 %v5684_v14, %v5681_v17  ;;  %v1388_v46 = vsel %vm685_vm6, %v5688_v45, 0.0 }
 0x5e3   :  { %v1745_v32 = vsel %vm685_vm6, %v5690_v21, 0.0  ;;  %v1372_v26 = vmul.f32 1.442695, %v1358_v25  ;;  %v5701_v44 = vpop.eup %4014 }
 0x5e4   :  { %v5706_v57 = vpop.eup %4016  ;;  %v1742_v24 = vsel %vm685_vm6, %v5701_v44, 0.0 }
 0x5e5   :  { %2120 = vmax.xlane.f32.xlu0 %v2119_v16  ;;  %1389 = vadd.xlane.f32.xlu2 %v1388_v46 }
 0x5e6   :  { %1746 = vadd.xlane.f32.xlu1 %v1745_v32  ;;  %v2128_v32 = vsub.f32 %v5368_v42, %v5580_v5  ;;  %v2129_v42 = vsub.f32 %v5394_v63, %v5572_v49 }
 0x5e8   :  { %v1741_v18 = vpop.xlane.xlu2 %1740  ;;  %v1351_v41 = vpop.xlane.xlu0 %1350 }
 0x5e9   :  { %4018 = vrcp.f32 %v1741_v18  ;;  %v1738_v59 = vpop.xlane.xlu1 %1737  ;;  %v1359_v27 = vsub.f32 %v5592_v28, %v1351_v41  ;;  %v1391_v28 = vsel %vm685_vm6, %v5706_v57, 0.0 }
 0x5ea   :  { %4020 = vrcp.f32 %v1738_v59  ;;  %v5735_v59 = vpop.f32.mrf.mxu0 }
 0x5eb   :  { %4022 = vpow2.f32 %v1372_v26  ;;  %v1374_v50 = vmul.f32 1.442695, %v1359_v27  ;;  %v2336_v27 = vsel %vm685_vm6, %v5716_v15, -inf  ;;  %v2339_v12 = vsel %vm685_vm6, %v5735_v59, -inf }
 0x5ed   :  { %4024 = vpow2.f32 %v1374_v50  ;;  %1743 = vadd.xlane.f32.xlu0 %v1742_v24  ;;  %2126 = vmax.xlane.f32.xlu2 %v2125_v61  ;;  %v2138_v50 = vmul.f32 1.442695, %v2129_v42  ;;  %v2342_v61 = vsub.f32 %v5332_v55, %v5496_v34  ;;  %v2343_v34 = vsub.f32 %v5343_v47, %v5504_v48 }
 0x5ee   :  { %1392 = vadd.xlane.f32.xlu1 %v1391_v28  ;;  %4026 = vpow2.f32 %v1936_v3  ;;  %v2130_v42 = vsub.f32 %v5484_v62, %v5628_v58  ;;  %v2131_v58 = vsub.f32 %v5494_v23, %v5662_v56 }
 0x5ef   :  { %v4019_v53 = vpop.eup %4018  ;;  %v2350_v49 = vmul.f32 1.442695, %v2342_v61 }
 0x5f0   :  { %v4021_v2 = vpop.eup %4020  ;;  %v1761_v36 = vmul.f32 %v4019_v53, %v5588_v11  ;;  %v2122_v11 = vsel %vm685_vm6, %v5678_v9, -inf  ;;  %v2142_v23 = vmul.f32 1.442695, %v2131_v58 }
 0x5f1   :  { %v5719_v51 = vpop.eup %4022  ;;  %v1760_v25 = vmul.f32 %v4021_v2, %v5590_v0  ;;  %v2136_v0 = vmul.f32 1.442695, %v2128_v32 }
 0x5f2   :  { %v1394_v26 = vsel %vm685_vm6, %v5719_v51, 0.0 }
 0x5f3   :  { %v5722_v16 = vpop.eup %4024  ;;  %v1766_v46 = vpack.c.bf16 %v1761_v36, %v1760_v25  ;;  %4028 = vpow2.f32 %v2136_v0  ;;  %v2344_v36 = vsub.f32 %v5578_v43, %v5686_v4 }
 0x5f4   :  { %v1397_v18 = vsel %vm685_vm6, %v5722_v16, 0.0  ;;  %v5733_v41 = vpop.eup %4026  ;;  %4030 = vpow2.f32 %v2138_v50 }
 0x5f5   :  { %3584 = vmatmul.msk.bf16.gmra.mxu3 %vm685_vm6, %v1766_v46  ;;  %1395 = vadd.xlane.f32.xlu0 %v1394_v26  ;;  %v1959_v5 = vsel %vm685_vm6, %v5733_v41, 0.0  ;;  %4032 = vpow2.f32 %v2350_v49 }
 0x5f6   :  { %2123 = vmax.xlane.f32.xlu1 %v2122_v11  ;;  %1398 = vadd.xlane.f32.xlu2 %v1397_v18 }
 0x5f9   :  { %v5745_v24 = vpop.eup %4028 }
 0x5fa   :  { %v2152_v63 = vsel %vm685_vm6, %v5745_v24, 0.0  ;;  %v5751_v28 = vpop.eup %4030 }
 0x5fb   :  { %v2155_v53 = vsel %vm685_vm6, %v5751_v28, 0.0  ;;  %v5757_v3 = vpop.eup %4032 }
 0x5fc   :  { %v2366_v55 = vsel %vm685_vm6, %v5757_v3, 0.0 }
 0x5fd   :  { %1960 = vadd.xlane.f32.xlu0 %v1959_v5 }
 0x5fe   :  { %2337 = vmax.xlane.f32.xlu1 %v2336_v27  ;;  %2340 = vmax.xlane.f32.xlu2 %v2339_v12 }
 0x606   :  { %2153 = vadd.xlane.f32.xlu2 %v2152_v63 }
 0x60e   :  { %2156 = vadd.xlane.f32.xlu2 %v2155_v53 }
 0x611   :  { %2202 = vrot.lane.b32.xlu0 %v4914_v37, %s4210_s28 }
 0x616   :  { %2367 = vadd.xlane.f32.xlu2 %v2366_v55 }
 0x617   :  { %2416 = vrot.lane.b32.xlu1 %v4914_v37, %s4211_s29  ;;  %v2352_v37 = vmul.f32 1.442695, %v2343_v34 }
 0x619   :  { %2200 = vrot.lane.b32.xlu0 %v4837_v60, %s4210_s28 }
 0x61f   :  { %2414 = vrot.lane.b32.xlu1 %v4837_v60, %s4211_s29 }
 0x627   :  { %2412 = vrot.lane.b32.xlu1 %v4811_v33, %s4211_s29 }
 0x62e   :  { %2198 = vrot.lane.b32.xlu2 %v4811_v33, %s4210_s28  ;;  %v2354_v33 = vmul.f32 1.442695, %v2344_v36 }
 0x62f   :  { %2196 = vrot.lane.b32.xlu1 %v4787_v35, %s4210_s28 }
 0x630   :  { %v1378_v2 = vpop.xlane.xlu0 %1377 }
 0x631   :  { %4034 = vrcp.f32 %v1378_v2 }
 0x632   :  { %4036 = vpow2.f32 %v2352_v37 }
 0x637   :  { %2410 = vrot.lane.b32.xlu1 %v4787_v35, %s4211_s29  ;;  %v4035_v25 = vpop.eup %4034 }
 0x638   :  { %v1381_v60 = vpop.xlane.xlu2 %1380  ;;  %v2329_v46 = vpop.xlane.xlu0 %2328  ;;  %v1408_v47 = vmul.f32 %v4035_v25, %v5611_v38 }
 0x639   :  { %4038 = vrcp.f32 %v1381_v60  ;;  %v5779_v32 = vpop.eup %4036  ;;  %v2345_v18 = vsub.f32 %v5615_v6, %v2329_v46 }
 0x63a   :  { %4040 = vpow2.f32 %v2354_v33  ;;  %v2369_v43 = vsel %vm685_vm6, %v5779_v32, 0.0 }
 0x63b   :  { %v2356_v4 = vmul.f32 1.442695, %v2345_v18 }
 0x63f   :  { %v4039_v26 = vpop.eup %4038 }
 0x640   :  { %v1409_v48 = vmul.f32 %v4039_v26, %v5618_v19  ;;  %v2118_v11 = vpop.xlane.xlu2 %2117  ;;  %v1384_v35 = vpop.xlane.xlu1 %1383  ;;  %v2140_v19 = vmul.f32 1.442695, %v2130_v42 }
 0x641   :  { %v5789_v5 = vpop.eup %4040  ;;  %4042 = vrcp.f32 %v1384_v35  ;;  %v2132_v27 = vsub.f32 %v5630_v30, %v2118_v11 }
 0x642   :  { %v1416_v0 = vpack.c.bf16 %v1409_v48, %v1408_v47  ;;  %4044 = vpow2.f32 %v2356_v4  ;;  %v2372_v50 = vsel %vm685_vm6, %v5789_v5, 0.0 }
 0x643   :  { %2370 = vadd.xlane.f32.xlu0 %v2369_v43  ;;  %v2144_v63 = vmul.f32 1.442695, %v2132_v27 }
 0x644   :  { %3574 = vmatmul.msk.bf16.vlgmr.msrb.gmra.mxu2 %vm685_vm6, %v1416_v0 }
 0x647   :  { %v4043_v61 = vpop.eup %4042 }
 0x648   :  { %v2335_v38 = vpop.xlane.xlu2 %2334  ;;  %v1387_v6 = vpop.xlane.xlu0 %1386  ;;  %v1410_v53 = vmul.f32 %v4043_v61, %v5635_v31 }
 0x649   :  { %v1955_v12 = vpop.xlane.xlu1 %1954  ;;  %4046 = vrcp.f32 %v1387_v6  ;;  %v5794_v49 = vpop.eup %4044  ;;  %v2347_v42 = vsub.f32 %v5643_v22, %v2335_v38 }
 0x64a   :  { %4048 = vpow2.f32 %v2140_v19  ;;  %v2375_v60 = vsel %vm685_vm6, %v5794_v49, 0.0 }
 0x64b   :  { %2373 = vadd.xlane.f32.xlu0 %v2372_v50  ;;  %4050 = vrcp.f32 %v1955_v12 }
 0x64c   :  { %4052 = vpow2.f32 %v2144_v63 }
 0x64f   :  { %v4047_v62 = vpop.eup %4046 }
 0x650   :  { %v1411_v30 = vmul.f32 %v4047_v62, %v5647_v7  ;;  %v5800_v55 = vpop.xlane.xlu2 %1957  ;;  %v1952_v34 = vpop.xlane.xlu0 %1951 }
 0x651   :  { %v2332_v2 = vpop.xlane.xlu1 %2331  ;;  %4054 = vrcp.f32 %v1952_v34  ;;  %v5805_v25 = vpop.eup %4048 }
 0x652   :  { %v2346_v37 = vsub.f32 %v5626_v54, %v2332_v2  ;;  %v1417_v36 = vpack.c.bf16 %v1411_v30, %v1410_v53  ;;  %v4051_v7 = vpop.eup %4050  ;;  %v2158_v56 = vsel %vm685_vm6, %v5805_v25, 0.0 }
 0x653   :  { %2376 = vadd.xlane.f32.xlu0 %v2375_v60  ;;  %v5810_v33 = vpop.eup %4052  ;;  %v5813_v47 = vmul.f32 %v4051_v7, %v5645_v8 }
 0x654   :  { %v2358_v31 = vmul.f32 1.442695, %v2346_v37  ;;  %3575 = vmatmul.msk.bf16.gmra.mxu2 %vm685_vm6, %v1417_v36  ;;  %v2164_v35 = vsel %vm685_vm6, %v5810_v33, 0.0 }
 0x656   :  { %4056 = vpow2.f32 %v2358_v31  ;;  %v1239_v31 = vpop.f32.mrf.mxu3 }
 0x657   :  { %4058 = vpow2.f32 %v2142_v23  ;;  %2159 = vadd.xlane.f32.xlu2 %v2158_v56  ;;  %v4055_v54 = vpop.eup %4054 }
 0x658   :  { %v1390_v46 = vpop.xlane.xlu2 %1389  ;;  %v2121_v26 = vpop.xlane.xlu0 %2120  ;;  %v5816_v48 = vmul.f32 %v4055_v54, %v5660_v20 }
 0x659   :  { %v1747_v18 = vpop.xlane.xlu1 %1746  ;;  %v2133_v11 = vsub.f32 %v5658_v29, %v2121_v26  ;;  %v2360_v29 = vmul.f32 1.442695, %v2347_v42 }
 0x65a   :  { %v1980_v43 = vpack.c.bf16 %v5813_v47, %v5816_v48 }
 0x65b   :  { %v2146_v0 = vmul.f32 1.442695, %v2133_v11  ;;  %2165 = vadd.xlane.f32.xlu0 %v2164_v35 }
 0x65c   :  { %v5823_v4 = vpop.eup %4056 }
 0x65d   :  { %v5826_v8 = vpop.eup %4058  ;;  %4060 = vpow2.f32 %v2146_v0  ;;  %v2378_v20 = vsel %vm685_vm6, %v5823_v4, 0.0 }
 0x65e   :  { %4062 = vrcp.f32 %v1747_v18  ;;  %v2161_v19 = vsel %vm685_vm6, %v5826_v8, 0.0  ;;  %v1241_v42 = vpop.f32.mrf.mxu3 }
 0x65f   :  { %2379 = vadd.xlane.f32.xlu2 %v2378_v20  ;;  %4064 = vrcp.f32 %v1390_v46 }
 0x660   :  { %v2127_v6 = vpop.xlane.xlu2 %2126  ;;  %v1744_v27 = vpop.xlane.xlu0 %1743 }
 0x661   :  { %v2135_v12 = vsub.f32 %v5703_v13, %v2127_v6  ;;  %2162 = vadd.xlane.f32.xlu1 %v2161_v19  ;;  %v1393_v50 = vpop.xlane.xlu1 %1392  ;;  %4066 = vrcp.f32 %v1744_v27 }
 0x662   :  { %4068 = vrcp.f32 %v1393_v50 }
 0x663   :  { %v5833_v22 = vpop.eup %4060  ;;  %v2150_v38 = vmul.f32 1.442695, %v2135_v12  ;;  %4070 = vpow2.f32 %v2360_v29 }
 0x664   :  { %v2167_v61 = vsel %vm685_vm6, %v5833_v22, 0.0  ;;  %v4063_v63 = vpop.eup %4062 }
 0x665   :  { %4072 = vpow2.f32 %v2150_v38  ;;  %2168 = vadd.xlane.f32.xlu0 %v2167_v61  ;;  %v4065_v62 = vpop.eup %4064  ;;  %v1763_v34 = vmul.f32 %v4063_v63, %v5690_v21 }
 0x666   :  { %v1412_v2 = vmul.f32 %v4065_v62, %v5688_v45  ;;  %v1244_v63 = vpop.f32.mrf.mxu3 }
 0x667   :  { %v4067_v58 = vpop.eup %4066 }
 0x668   :  { %v4069_v53 = vpop.eup %4068  ;;  %v1396_v30 = vpop.xlane.xlu0 %1395  ;;  %v1762_v13 = vmul.f32 %v4067_v58, %v5701_v44 }
 0x669   :  { %v1413_v37 = vmul.f32 %v4069_v53, %v5706_v57  ;;  %v2124_v60 = vpop.xlane.xlu1 %2123  ;;  %v1399_v36 = vpop.xlane.xlu2 %1398  ;;  %4074 = vrcp.f32 %v1396_v30 }
 0x66a   :  { %v5841_v23 = vpop.eup %4070  ;;  %v2134_v7 = vsub.f32 %v5678_v9, %v2124_v60  ;;  %v1767_v56 = vpack.c.bf16 %v1763_v34, %v1762_v13  ;;  %4076 = vrcp.f32 %v1399_v36 }
 0x66b   :  { %v5844_v54 = vpop.eup %4072  ;;  %v1418_v46 = vpack.c.bf16 %v1413_v37, %v1412_v2  ;;  %v2381_v21 = vsel %vm685_vm6, %v5841_v23, 0.0  ;;  %v6674_v37 = vld [vmem:[#allocation16_spill] sm:$0xff] }
 0x66c   :  { %v2148_v26 = vmul.f32 1.442695, %v2134_v7  ;;  %3585 = vmatmul.msk.bf16.gmra.mxu3 %vm685_vm6, %v1767_v56  ;;  %v2173_v45 = vsel %vm685_vm6, %v5844_v54, 0.0  ;;  %v6675_v60 = vpack.c.bf16 %v5516_v40, %v6674_v37  ;;  %v6676_v7 = vld [vmem:[#allocation13_spill] sm:$0xff]  ;;  %v6677_v56 = vld [vmem:[#allocation14_spill] sm:$0xff]  ;;  %v6679_v40 = vld [vmem:[#allocation12_spill] sm:$0xff] }
 0x66d   :  { %3576 = vmatmul.msk.bf16.gmra.mxu2 %vm685_vm6, %v1418_v46  ;;  %2174 = vadd.xlane.f32.xlu2 %v2173_v45  ;;  %v3733_v46 = vpack.i.bf16 %v6677_v56, %v6676_v7 }
 0x66e   :  { %4078 = vpow2.f32 %v2148_v26  ;;  %2382 = vadd.xlane.f32.xlu0 %v2381_v21  ;;  %v1246_v53 = vpop.f32.mrf.mxu3  ;;  %v6678_v26 = vld [vmem:[#allocation11_spill] sm:$0xff] }
 0x66f   :  { %v4075_v57 = vpop.eup %4074  ;;  %v3723_v34 = vpack.i.bf16 %v1246_v53, %v1244_v63  ;;  %v3718_v45 = vpack.i.bf16 %v6679_v40, %v6678_v26 }
 0x670   :  { %v4077_v35 = vpop.eup %4076  ;;  %v1414_v27 = vmul.f32 %v4075_v57, %v5719_v51 }
 0x671   :  { %v2338_v9 = vpop.xlane.xlu1 %2337  ;;  %v2341_v44 = vpop.xlane.xlu2 %2340  ;;  %v1415_v19 = vmul.f32 %v4077_v35, %v5722_v16  ;;  %v3703_v16 = vpack.i.bf16 %v5472_v10, %v5458_v52  ;;  %v3708_v52 = vpack.i.bf16 %v1241_v42, %v1239_v31  ;;  %v6680_v31 = vld [vmem:[#allocation15_spill] sm:$0xff] }
 0x672   :  { %v2348_v18 = vsub.f32 %v5716_v15, %v2338_v9  ;;  %v2349_v11 = vsub.f32 %v5735_v59, %v2341_v44  ;;  %v1961_v15 = vpop.xlane.xlu0 %1960  ;;  %v6681_v9 = vld [vmem:[#allocation17_spill] sm:$0xff] }
 0x673   :  { %v1419_v50 = vpack.c.bf16 %v1415_v19, %v1414_v27  ;;  %v3748_v44 = vpack.i.bf16 %v6681_v9, %v6680_v31 }
 0x674   :  { %v5854_v0 = vpop.eup %4078  ;;  %v2362_v20 = vmul.f32 1.442695, %v2348_v18  ;;  %v2364_v29 = vmul.f32 1.442695, %v2349_v11 }
 0x675   :  { %v2170_v6 = vsel %vm685_vm6, %v5854_v0, 0.0 }
 0x676   :  { %4080 = vpow2.f32 %v2362_v20  ;;  %2171 = vadd.xlane.f32.xlu1 %v2170_v6 }
 0x677   :  { %4082 = vpow2.f32 %v2364_v29 }
 0x679   :  { %v2154_v12 = vpop.xlane.xlu2 %2153 }
 0x67c   :  { %v5860_v59 = vpop.eup %4080 }
 0x67d   :  { %v5862_v38 = vpop.eup %4082  ;;  %3577 = vmatmul.msk.bf16.gmra.mxu2 %vm685_vm6, %v1419_v50  ;;  %v2384_v61 = vsel %vm685_vm6, %v5860_v59, 0.0 }
 0x67e   :  { %v2387_v62 = vsel %vm685_vm6, %v5862_v38, 0.0  ;;  %2385 = vadd.xlane.f32.xlu0 %v2384_v61 }
 0x67f   :  { %2388 = vadd.xlane.f32.xlu1 %v2387_v62 }
 0x681   :  { %v2157_v51 = vpop.xlane.xlu2 %2156 }
 0x682   :  { %4084 = vrcp.f32 %v2157_v51 }
 0x683   :  { %v2203_v58 = vpop.permute.xlu0 %2202  ;;  %4086 = vrcp.f32 %v2154_v12 }
 0x684   :  { %2224 = vmatpush.bf16.msrb.mxu3 %v2203_v58  ;;  %4088 = vrcp.f32 %v1961_v15 }
 0x685   :  { %3704 = vrot.lane.b32.xlu2 %v3703_v16, %s4212_s30  ;;  %4090 = vrcp.f32 %v5800_v55 }
 0x688   :  { %v4085_v57 = vpop.eup %4084 }
 0x689   :  { %v2417_v30 = vpop.permute.xlu1 %2416  ;;  %v2368_v13 = vpop.xlane.xlu2 %2367  ;;  %v2185_v11 = vmul.f32 %v4085_v57, %v5751_v28 }
 0x68a   :  { %2438 = vmatpush.bf16.msrb.mxu2 %v2417_v30  ;;  %v4087_v18 = vpop.eup %4086  ;;  %v1249_v28 = vpop.f32.mrf.mxu3 }
 0x68b   :  { %v2201_v2 = vpop.permute.xlu0 %2200  ;;  %v2184_v35 = vmul.f32 %v4087_v18, %v5745_v24  ;;  %v4089_v17 = vpop.eup %4088 }
 0x68c   :  { %2225 = vmatpush.bf16.msrb.mxu3 %v2201_v2  ;;  %v4091_v14 = vpop.eup %4090  ;;  %v1977_v24 = vmul.f32 %v4089_v17, %v5733_v41 }
 0x68d   :  { %3590 = vmatmul.msk.bf16.vlgmr.msra.gmra.mxu2 %vm685_vm6, %v6675_v60  ;;  %3724 = vrot.lane.b32.xlu2 %v3723_v34, %s4213_s13  ;;  %v2192_v20 = vpack.c.bf16 %v2185_v11, %v2184_v35  ;;  %v1976_v6 = vmul.f32 %v4091_v14, %v5666_v39 }
 0x68f   :  { %v1981_v19 = vpack.c.bf16 %v1977_v24, %v1976_v6 }
 0x691   :  { %v2415_v10 = vpop.permute.xlu1 %2414  ;;  %v2199_v36 = vpop.permute.xlu2 %2198 }
 0x692   :  { %2439 = vmatpush.bf16.msrb.mxu2 %v2415_v10  ;;  %3709 = vrot.lane.b32.xlu0 %v3708_v52, %s4213_s13  ;;  %v1251_v47 = vpop.f32.mrf.mxu3 }
 0x693   :  { %2226 = vmatpush.bf16.msrb.mxu3 %v2199_v36 }
 0x695   :  { %3734 = vrot.lane.b32.xlu2 %v3733_v46, %s4212_s30 }
 0x699   :  { %v2413_v21 = vpop.permute.xlu1 %2412 }
 0x69a   :  { %2440 = vmatpush.bf16.msrb.mxu2 %v2413_v21  ;;  %3719 = vrot.lane.b32.xlu0 %v3718_v45, %s4212_s30  ;;  %v1254_v41 = vpop.f32.mrf.mxu3 }
 0x69d   :  { %3591 = vmatmul.msk.bf16.gmra.mxu2 %vm685_vm6, %v1979_v1  ;;  %3749 = vrot.lane.b32.xlu2 %v3748_v44, %s4212_s30 }
 0x6a1   :  { %v2197_v42 = vpop.permute.xlu1 %2196 }
 0x6a2   :  { %2227 = vmatpush.bf16.msrb.mxu3 %v2197_v42  ;;  %v1256_v53 = vpop.f32.mrf.mxu3 }
 0x6a5   :  { %3598 = vmatmul.msk.bf16.vlgmr.msrb.gmra.mxu3 %vm685_vm6, %v2192_v20 }
 0x6a9   :  { %v2411_v29 = vpop.permute.xlu1 %2410 }
 0x6aa   :  { %2441 = vmatpush.bf16.msrb.mxu2 %v2411_v29  ;;  %v5912_v26 = vpop.f32.mrf.mxu3 }
 0x6ad   :  { %3592 = vmatmul.msk.bf16.gmra.mxu2 %vm685_vm6, %v1980_v43 }
 0x6b2   :  { %v5919_v57 = vpop.f32.mrf.mxu3 }
 0x6b6   :  { %v2371_v1 = vpop.xlane.xlu0 %2370 }
 0x6b7   :  { %4092 = vrcp.f32 %v2371_v1 }
 0x6b8   :  { %4094 = vrcp.f32 %v2368_v13  ;;  %v3738_v13 = vpack.i.bf16 %v1251_v47, %v1249_v28 }
 0x6ba   :  { %v5925_v17 = vpop.f32.mrf.mxu3 }
 0x6bd   :  { %3593 = vmatmul.msk.bf16.gmra.mxu2 %vm685_vm6, %v1981_v19  ;;  %v4093_v48 = vpop.eup %4092 }
 0x6be   :  { %v2374_v27 = vpop.xlane.xlu0 %2373  ;;  %v4095_v43 = vpop.eup %4094  ;;  %v2399_v55 = vmul.f32 %v4093_v48, %v5779_v32 }
 0x6bf   :  { %v2398_v50 = vmul.f32 %v4095_v43, %v5757_v3 }
 0x6c1   :  { %v2406_v61 = vpack.c.bf16 %v2399_v55, %v2398_v50 }
 0x6c2   :  { %v5931_v47 = vpop.f32.mrf.mxu3 }
 0x6c6   :  { %v2377_v12 = vpop.xlane.xlu0 %2376 }
 0x6c7   :  { %v1453_v15 = vpop.f32.mrf.mxu2  ;;  %4096 = vrcp.f32 %v2377_v12 }
 0x6c8   :  { %4098 = vrcp.f32 %v2374_v27 }
 0x6ca   :  { %v2160_v63 = vpop.xlane.xlu2 %2159 }
 0x6cb   :  { %4100 = vrcp.f32 %v2160_v63 }
 0x6cd   :  { %3606 = vmatmul.msk.bf16.vlgmr.msrb.gmra.mxu2 %vm685_vm6, %v2406_v61  ;;  %v4097_v16 = vpop.eup %4096 }
 0x6ce   :  { %v2166_v62 = vpop.xlane.xlu0 %2165  ;;  %v4099_v32 = vpop.eup %4098  ;;  %v2401_v3 = vmul.f32 %v4097_v16, %v5794_v49  ;;  %v3753_v49 = vpack.i.bf16 %v1256_v53, %v1254_v41 }
 0x6cf   :  { %v1455_v39 = vpop.f32.mrf.mxu2  ;;  %v2400_v37 = vmul.f32 %v4099_v32, %v5789_v5 }
 0x6d0   :  { %v3713_v51 = vpack.i.bf16 %v1455_v39, %v1453_v15  ;;  %v5936_v15 = vpop.f32.mrf.mxu3 }
 0x6d1   :  { %v4101_v2 = vpop.eup %4100  ;;  %v2407_v52 = vpack.c.bf16 %v2401_v3, %v2400_v37 }
 0x6d2   :  { %3714 = vrot.lane.b32.xlu1 %v3713_v51, %s4214_s14  ;;  %v2186_v10 = vmul.f32 %v4101_v2, %v5805_v25  ;;  %v2380_v7 = vpop.xlane.xlu2 %2379 }
 0x6d4   :  { %v2163_v58 = vpop.xlane.xlu1 %2162 }
 0x6d5   :  { %4102 = vrcp.f32 %v2163_v58  ;;  %v3676_v58 = vld [vmem:[%s6632_s4] sm:$0xff] }
 0x6d6   :  { %4104 = vrcp.f32 %v2380_v7 }
 0x6d7   :  { %v1458_v30 = vpop.f32.mrf.mxu2 }
 0x6d8   :  { %v2169_v34 = vpop.xlane.xlu0 %2168 }
 0x6d9   :  { %4106 = vrcp.f32 %v2169_v34 }
 0x6da   :  { %3739 = vrot.lane.b32.xlu1 %v3738_v13, %s4213_s13 }
 0x6db   :  { %v4103_v60 = vpop.eup %4102 }
 0x6dc   :  { %v2187_v36 = vmul.f32 %v4103_v60, %v5826_v8  ;;  %v4105_v25 = vpop.eup %4104 }
 0x6dd   :  { %3607 = vmatmul.msk.bf16.gmra.mxu2 %vm685_vm6, %v2407_v52  ;;  %v2402_v31 = vmul.f32 %v4105_v25, %v5823_v4 }
 0x6de   :  { %v2193_v56 = vpack.c.bf16 %v2187_v36, %v2186_v10 }
 0x6df   :  { %v1460_v46 = vpop.f32.mrf.mxu2  ;;  %v4107_v8 = vpop.eup %4106 }
 0x6e0   :  { %v3728_v40 = vpack.i.bf16 %v1460_v46, %v1458_v30  ;;  %3599 = vmatmul.msk.bf16.gmra.mxu3 %vm685_vm6, %v2193_v56  ;;  %v2189_v18 = vmul.f32 %v4107_v8, %v5833_v22  ;;  %v2175_v42 = vpop.xlane.xlu2 %2174  ;;  %v6682_v46 = vld [vmem:[#allocation4_spill] sm:$0xff] }
 0x6e1   :  { %v2383_v5 = vpop.xlane.xlu0 %2382 }
 0x6e2   :  { %4108 = vrcp.f32 %v2383_v5  ;;  %3754 = vrot.lane.b32.xlu1 %v3753_v49, %s4213_s13  ;;  %3729 = vrot.lane.b32.xlu0 %v3728_v40, %s4214_s14  ;;  %v6683_v40 = vld [vmem:[#allocation3_spill] sm:$0xff] }
 0x6e3   :  { %4110 = vrcp.f32 %v2166_v62  ;;  %v3677_v62 = vld [vmem:[%s6632_s4 + $0x8] sm:$0xff] }
 0x6e4   :  { %4112 = vrcp.f32 %v2175_v42  ;;  %2641 = vmatpush.bf16.msra.mxu1 %v3677_v62 }
 0x6e8   :  { %v4109_v45 = vpop.eup %4108  ;;  %2642 = vmatpush.bf16.msra.mxu1 %v3676_v58  ;;  %v3705_v2 = vpop.permute.xlu2 %3704 }
 0x6e9   :  { %v4111_v21 = vpop.eup %4110  ;;  %v2403_v9 = vmul.f32 %v4109_v45, %v5841_v23  ;;  %v2172_v44 = vpop.xlane.xlu1 %2171  ;;  %v3707_v52 = vunpack.i.h.bf16 %v3705_v2  ;;  %v3706_v10 = vunpack.i.l.bf16 %v3705_v2 }
 0x6ea   :  { %v2188_v35 = vmul.f32 %v4111_v21, %v5810_v33  ;;  %4114 = vrcp.f32 %v2172_v44  ;;  %v4113_v14 = vpop.eup %4112 }
 0x6eb   :  { %v2408_v11 = vpack.c.bf16 %v2403_v9, %v2402_v31  ;;  %v2191_v48 = vmul.f32 %v4113_v14, %v5844_v54  ;;  %v1570_v49 = vsel %vm631_vm5, %v6682_v46, %v3707_v52  ;;  %v1569_v5 = vsel %vm631_vm5, %v6683_v40, %v3706_v10 }
 0x6ec   :  { %v2194_v20 = vpack.c.bf16 %v2189_v18, %v2188_v35 }
 0x6ed   :  { %3608 = vmatmul.msk.bf16.gmra.mxu2 %vm685_vm6, %v2408_v11 }
 0x6f0   :  { %v1463_v29 = vpop.f32.mrf.mxu2  ;;  %3600 = vmatmul.msk.bf16.gmra.mxu3 %vm685_vm6, %v2194_v20  ;;  %v4115_v22 = vpop.eup %4114 }
 0x6f1   :  { %v2386_v4 = vpop.xlane.xlu0 %2385  ;;  %v2190_v19 = vmul.f32 %v4115_v22, %v5854_v0  ;;  %v5939_v0 = vpop.f32.mrf.mxu3  ;;  %v6685_v22 = vld [vmem:[#allocation5_spill] sm:$0xff] }
 0x6f2   :  { %v2389_v23 = vpop.xlane.xlu1 %2388  ;;  %4116 = vrcp.f32 %v2386_v4  ;;  %v3725_v4 = vpop.permute.xlu2 %3724 }
 0x6f3   :  { %4118 = vrcp.f32 %v2389_v23  ;;  %v2195_v12 = vpack.c.bf16 %v2191_v48, %v2190_v19  ;;  %v6684_v23 = vld [vmem:[#allocation6_spill] sm:$0xff] }
 0x6f8   :  { %v4117_v1 = vpop.eup %4116  ;;  %v1465_v24 = vpop.f32.mrf.mxu2 }
 0x6f9   :  { %v4119_v33 = vpop.eup %4118  ;;  %v2404_v28 = vmul.f32 %v4117_v1, %v5860_v59  ;;  %v3743_v6 = vpack.i.bf16 %v1465_v24, %v1463_v29  ;;  %v5941_v61 = vpop.f32.mrf.mxu3  ;;  %v3727_v24 = vunpack.i.h.bf16 %v3725_v4 }
 0x6fa   :  { %v2405_v27 = vmul.f32 %v4119_v33, %v5862_v38  ;;  %v3726_v33 = vunpack.i.l.bf16 %v3725_v4  ;;  %v6689_v4 = vld [vmem:[#allocation9_spill] sm:$0xff] }
 0x6fb   :  { %3744 = vrot.lane.b32.xlu0 %v3743_v6, %s4214_s14 }
 0x6fc   :  { %v2409_v43 = vpack.c.bf16 %v2405_v27, %v2404_v28 }
 0x6fe   :  { %3609 = vmatmul.msk.bf16.gmra.mxu2 %vm685_vm6, %v2409_v43 }
 0x700   :  { %v1468_v55 = vpop.f32.mrf.mxu2  ;;  %3601 = vmatmul.msk.bf16.gmra.mxu3 %vm685_vm6, %v2195_v12 }
 0x701   :  { %v5944_v39 = vpop.f32.mrf.mxu3 }
 0x704   :  { %v3710_v37 = vpop.permute.xlu0 %3709 }
 0x705   :  { %v3712_v36 = vunpack.i.h.bf16 %v3710_v37  ;;  %v3711_v7 = vunpack.i.l.bf16 %v3710_v37  ;;  %v6687_v37 = vld [vmem:[#allocation7_spill] sm:$0xff] }
 0x707   :  { %v1579_v45 = vsel %vm1577_vm7, %v1570_v49, %v3712_v36  ;;  %v1578_v21 = vsel %vm1577_vm7, %v1569_v5, %v3711_v7 }
 0x708   :  { %v1470_v59 = vpop.f32.mrf.mxu2 }
 0x709   :  { %v3758_v50 = vpack.i.bf16 %v1470_v59, %v1468_v55 }
 0x70b   :  { %3759 = vrot.lane.b32.xlu0 %v3758_v50, %s4214_s14 }
 0x70c   :  { %v3720_v35 = vpop.permute.xlu0 %3719 }
 0x70d   :  { %v3722_v42 = vunpack.i.h.bf16 %v3720_v35  ;;  %v3721_v20 = vunpack.i.l.bf16 %v3720_v35 }
 0x70f   :  { %v1572_v14 = vsel %vm631_vm5, %v6684_v23, %v3722_v42  ;;  %v1571_v1 = vsel %vm631_vm5, %v6685_v22, %v3721_v20  ;;  %v6688_v20 = vld [vmem:[#allocation10_spill] sm:$0xff] }
 0x710   :  { %v2015_v38 = vpop.f32.mrf.mxu2  ;;  %v1580_v27 = vsel %vm1577_vm7, %v1571_v1, %v3726_v33  ;;  %v1581_v48 = vsel %vm1577_vm7, %v1572_v14, %v3727_v24 }
 0x718   :  { %v2017_v41 = vpop.f32.mrf.mxu2 }
 0x719   :  { %v3763_v54 = vpack.i.bf16 %v2017_v41, %v2015_v38 }
 0x71b   :  { %3764 = vrot.lane.b32.xlu2 %v3763_v54, %s4212_s30  ;;  %v3735_v54 = vpop.permute.xlu2 %3734 }
 0x71c   :  { %v3736_v58 = vunpack.i.l.bf16 %v3735_v54 }
 0x720   :  { %v2020_v63 = vpop.f32.mrf.mxu2 }
 0x728   :  { %v2022_v51 = vpop.f32.mrf.mxu2  ;;  %v2229_v16 = vpop.f32.mrf.mxu3 }
 0x729   :  { %v3778_v32 = vpack.i.bf16 %v2022_v51, %v2020_v63 }
 0x72b   :  { %3779 = vrot.lane.b32.xlu2 %v3778_v32, %s4212_s30 }
 0x730   :  { %v2025_v53 = vpop.f32.mrf.mxu2  ;;  %v2231_v3 = vpop.f32.mrf.mxu3 }
 0x731   :  { %v3768_v30 = vpack.i.bf16 %v2231_v3, %v2229_v16  ;;  %v3737_v16 = vunpack.i.h.bf16 %v3735_v54 }
 0x733   :  { %3769 = vrot.lane.b32.xlu1 %v3768_v30, %s4213_s13 }
 0x738   :  { %v2027_v13 = vpop.f32.mrf.mxu2 }
 0x739   :  { %v3793_v34 = vpack.i.bf16 %v2027_v13, %v2025_v53 }
 0x73b   :  { %3794 = vrot.lane.b32.xlu2 %v3793_v34, %s4212_s30  ;;  %v6686_v34 = vld [vmem:[#allocation8_spill] sm:$0xff] }
 0x73c   :  { %v1574_v2 = vsel %vm631_vm5, %v6686_v34, %v3737_v16 }
 0x740   :  { %v2030_v60 = vpop.f32.mrf.mxu2 }
 0x744   :  { %v3715_v56 = vpop.permute.xlu1 %3714 }
 0x745   :  { %v3717_v25 = vunpack.i.h.bf16 %v3715_v56  ;;  %v3716_v8 = vunpack.i.l.bf16 %v3715_v56 }
 0x747   :  { %v1587_v31 = vsel %vm1586_vm8, %v1578_v21, %v3716_v8  ;;  %v1588_v9 = vsel %vm1586_vm8, %v1579_v45, %v3717_v25  ;;  %v3750_v25 = vpop.permute.xlu2 %3749 }
 0x748   :  { %v2583_v44 = vpack.c.bf16 %v1588_v9, %v1587_v31  ;;  %v2032_v18 = vpop.f32.mrf.mxu2  ;;  %v3752_v31 = vunpack.i.h.bf16 %v3750_v25  ;;  %v3751_v9 = vunpack.i.l.bf16 %v3750_v25 }
 0x749   :  { %v3808_v11 = vpack.i.bf16 %v2032_v18, %v2030_v60  ;;  %v1573_v60 = vsel %vm631_vm5, %v6687_v37, %v3736_v58 }
 0x74a   :  { %3618 = vmatmul.msk.bf16.vlgmr.msra.gmra.mxu1 %vm60_vm0, %v2583_v44  ;;  %v1575_v23 = vsel %vm631_vm5, %v6689_v4, %v3751_v9 }
 0x74b   :  { %3809 = vrot.lane.b32.xlu2 %v3808_v11, %s4212_s30 }
 0x74c   :  { %v3740_v63 = vpop.permute.xlu1 %3739 }
 0x74d   :  { %v3742_v32 = vunpack.i.h.bf16 %v3740_v63  ;;  %v3741_v53 = vunpack.i.l.bf16 %v3740_v63 }
 0x74f   :  { %v1583_v36 = vsel %vm1577_vm7, %v1574_v2, %v3742_v32  ;;  %v1582_v7 = vsel %vm1577_vm7, %v1573_v60, %v3741_v53 }
 0x750   :  { %v2443_v29 = vpop.f32.mrf.mxu2 }
 0x754   :  { %v3730_v28 = vpop.permute.xlu0 %3729  ;;  %v3755_v8 = vpop.permute.xlu1 %3754 }
 0x755   :  { %v3732_v6 = vunpack.i.h.bf16 %v3730_v28  ;;  %v3731_v19 = vunpack.i.l.bf16 %v3730_v28  ;;  %v3757_v44 = vunpack.i.h.bf16 %v3755_v8  ;;  %v3756_v18 = vunpack.i.l.bf16 %v3755_v8 }
 0x757   :  { %v1589_v43 = vsel %vm1586_vm8, %v1580_v27, %v3731_v19  ;;  %v1590_v12 = vsel %vm1586_vm8, %v1581_v48, %v3732_v6  ;;  %v1584_v24 = vsel %vm1577_vm7, %v1575_v23, %v3756_v18 }
 0x758   :  { %v2584_v55 = vpack.c.bf16 %v1590_v12, %v1589_v43  ;;  %v2445_v59 = vpop.f32.mrf.mxu2 }
 0x759   :  { %v3773_v50 = vpack.i.bf16 %v2445_v59, %v2443_v29  ;;  %v1576_v29 = vsel %vm631_vm5, %v6688_v20, %v3752_v31  ;;  %v6002_v59 = vld [vmem:[%s6633_s5] ss:$0 sm:$0xff]  ;;  %v4186_v31 = vld [vmem:[%s6628_s0 + $0x10] sm:$0xff] }
 0x75a   :  { %3619 = vmatmul.msk.bf16.gmra.mxu1 %vm60_vm0, %v2584_v55  ;;  %v1585_v1 = vsel %vm1577_vm7, %v1576_v29, %v3757_v44 }
 0x75b   :  { %3774 = vrot.lane.b32.xlu0 %v3773_v50, %s4214_s14 }
 0x760   :  { %v2448_v38 = vpop.f32.mrf.mxu2 }
 0x763   :  { %v2234_v41 = vpop.f32.mrf.mxu3 }
 0x768   :  { %v2450_v62 = vpop.f32.mrf.mxu2 }
 0x769   :  { %v3788_v51 = vpack.i.bf16 %v2450_v62, %v2448_v38 }
 0x76b   :  { %v2236_v3 = vpop.f32.mrf.mxu3  ;;  %3789 = vrot.lane.b32.xlu0 %v3788_v51, %s4214_s14  ;;  %v4184_v51 = vld [vmem:[%s6628_s0] sm:$0xff] }
 0x76c   :  { %v3783_v30 = vpack.i.bf16 %v2236_v3, %v2234_v41 }
 0x76d   :  { %v3745_v13 = vpop.permute.xlu0 %3744 }
 0x76e   :  { %v3747_v52 = vunpack.i.h.bf16 %v3745_v13  ;;  %v3746_v10 = vunpack.i.l.bf16 %v3745_v13  ;;  %3784 = vrot.lane.b32.xlu1 %v3783_v30, %s4213_s13 }
 0x770   :  { %v1592_v56 = vsel %vm1586_vm8, %v1583_v36, %v3747_v52  ;;  %v1591_v46 = vsel %vm1586_vm8, %v1582_v7, %v3746_v10  ;;  %v2453_v49 = vpop.f32.mrf.mxu2 }
 0x771   :  { %v2585_v40 = vpack.c.bf16 %v1592_v56, %v1591_v46 }
 0x773   :  { %v2239_v5 = vpop.f32.mrf.mxu3  ;;  %3620 = vmatmul.msk.bf16.gmra.mxu1 %vm60_vm0, %v2585_v40 }
 0x775   :  { %v3765_v50 = vpop.permute.xlu2 %3764 }
 0x776   :  { %v3767_v63 = vunpack.i.h.bf16 %v3765_v50  ;;  %v3766_v62 = vunpack.i.l.bf16 %v3765_v50 }
 0x778   :  { %v2455_v45 = vpop.f32.mrf.mxu2  ;;  %v2560_v30 = vsel %vm631_vm5, %v5919_v57, %v3767_v63  ;;  %v2559_v34 = vsel %vm631_vm5, %v5912_v26, %v3766_v62  ;;  %v4185_v26 = vld [vmem:[%s6628_s0 + $0x8] sm:$0xff] }
 0x779   :  { %v3803_v21 = vpack.i.bf16 %v2455_v45, %v2453_v49 }
 0x77b   :  { %v2241_v11 = vpop.f32.mrf.mxu3  ;;  %3804 = vrot.lane.b32.xlu0 %v3803_v21, %s4214_s14 }
 0x77c   :  { %v3798_v35 = vpack.i.bf16 %v2241_v11, %v2239_v5 }
 0x77d   :  { %v3760_v42 = vpop.permute.xlu0 %3759 }
 0x77e   :  { %v3762_v14 = vunpack.i.h.bf16 %v3760_v42  ;;  %v3761_v22 = vunpack.i.l.bf16 %v3760_v42  ;;  %3799 = vrot.lane.b32.xlu1 %v3798_v35, %s4213_s13 }
 0x780   :  { %v1594_v33 = vsel %vm1586_vm8, %v1585_v1, %v3762_v14  ;;  %v1593_v28 = vsel %vm1586_vm8, %v1584_v24, %v3761_v22 }
 0x781   :  { %v2586_v6 = vpack.c.bf16 %v1594_v33, %v1593_v28  ;;  %v2458_v19 = vpop.f32.mrf.mxu2 }
 0x783   :  { %v2244_v27 = vpop.f32.mrf.mxu3  ;;  %3621 = vmatmul.msk.bf16.gmra.mxu1 %vm60_vm0, %v2586_v6  ;;  %v4187_v6 = vld [vmem:[%s6628_s0 + $0x18] sm:$0xff] }
 0x785   :  { %v3780_v21 = vpop.permute.xlu2 %3779 }
 0x786   :  { %v3782_v11 = vunpack.i.h.bf16 %v3780_v21  ;;  %v3781_v35 = vunpack.i.l.bf16 %v3780_v21 }
 0x788   :  { %v2562_v14 = vsel %vm631_vm5, %v5931_v47, %v3782_v11  ;;  %v2561_v24 = vsel %vm631_vm5, %v5925_v17, %v3781_v35 }
 0x789   :  { %v2460_v48 = vpop.f32.mrf.mxu2 }
 0x78a   :  { %v3818_v43 = vpack.i.bf16 %v2460_v48, %v2458_v19 }
 0x78b   :  { %v2246_v12 = vpop.f32.mrf.mxu3 }
 0x78c   :  { %v3813_v55 = vpack.i.bf16 %v2246_v12, %v2244_v27  ;;  %3819 = vrot.lane.b32.xlu0 %v3818_v43, %s4214_s14 }
 0x78e   :  { %3814 = vrot.lane.b32.xlu1 %v3813_v55, %s4213_s13 }
 0x7a5   :  { %v3770_v41 = vpop.permute.xlu1 %3769 }
 0x7a6   :  { %v3772_v58 = vunpack.i.h.bf16 %v3770_v41  ;;  %v3771_v32 = vunpack.i.l.bf16 %v3770_v41 }
 0x7a8   :  { %v2568_v52 = vsel %vm1577_vm7, %v2560_v30, %v3772_v58  ;;  %v2567_v10 = vsel %vm1577_vm7, %v2559_v34, %v3771_v32 }
 0x7c7   :  { %v2644_v38 = vpop.f32.mrf.mxu1 }
 0x7c8   :  { %v2645_v54 = vadd.f32 %v6002_v59, %v2644_v38  ;;  %v3795_v38 = vpop.permute.xlu2 %3794 }
 0x7c9   :  { %v3797_v41 = vunpack.i.h.bf16 %v3795_v38 }
 0x7ca   :  { %v6008_v16 = vadd.f32 %v4184_v51, %v2645_v54  ;;  %v3796_v54 = vunpack.i.l.bf16 %v3795_v38 }
 0x7cc   :  { %v2702_v53 = vsel %vm60_vm0, %v6008_v16, 0.0  ;;  %v2766_v3 = vmul.f32 %v6008_v16, %v6008_v16  ;;  %v2563_v30 = vsel %vm631_vm5, %v5936_v15, %v3796_v54  ;;  %v6690_v54 = vld [vmem:[#allocation2_spill] sm:$0xff] }
 0x7cd   :  { %v3775_v13 = vpop.permute.xlu0 %3774  ;;  %2703 = vadd.xlane.f32.xlu2 %v2702_v53 }
 0x7ce   :  { %v3777_v2 = vunpack.i.h.bf16 %v3775_v13  ;;  %v3776_v37 = vunpack.i.l.bf16 %v3775_v13  ;;  %v2782_v60 = vsel %vm60_vm0, %v2766_v3, 0.0  ;;  %v2564_v3 = vsel %vm631_vm5, %v5939_v0, %v3797_v41 }
 0x7cf   :  { %v2646_v36 = vpop.f32.mrf.mxu1  ;;  %2783 = vadd.xlane.f32.xlu0 %v2782_v60  ;;  %v4188_v60 = vld [vmem:[%s6628_s0 + $0x20] sm:$0xff] }
 0x7d0   :  { %v2576_v7 = vsel %vm1586_vm8, %v2568_v52, %v3777_v2  ;;  %v2575_v56 = vsel %vm1586_vm8, %v2567_v10, %v3776_v37  ;;  %v2647_v57 = vadd.f32 %v6002_v59, %v2646_v36 }
 0x7d1   :  { %v2587_v46 = vpack.c.bf16 %v2576_v7, %v2575_v56 }
 0x7d2   :  { %v6027_v49 = vadd.f32 %v4185_v26, %v2647_v57  ;;  %v3810_v26 = vpop.permute.xlu2 %3809 }
 0x7d3   :  { %3622 = vmatmul.msk.bf16.gmra.mxu1 %vm60_vm0, %v2587_v46  ;;  %v3811_v21 = vunpack.i.l.bf16 %v3810_v26 }
 0x7d4   :  { %v2705_v40 = vsel %vm60_vm0, %v6027_v49, 0.0  ;;  %v2767_v5 = vmul.f32 %v6027_v49, %v6027_v49 }
 0x7d5   :  { %2706 = vadd.xlane.f32.xlu1 %v2705_v40  ;;  %v4189_v40 = vld [vmem:[%s6628_s0 + $0x28] sm:$0xff] }
 0x7d6   :  { %v2785_v25 = vsel %vm60_vm0, %v2767_v5, 0.0 }
 0x7d7   :  { %v2649_v8 = vpop.f32.mrf.mxu1  ;;  %2786 = vadd.xlane.f32.xlu2 %v2785_v25 }
 0x7d8   :  { %v2650_v45 = vadd.f32 %v6002_v59, %v2649_v8 }
 0x7da   :  { %v6039_v9 = vadd.f32 %v4186_v31, %v2650_v45  ;;  %v3812_v45 = vunpack.i.h.bf16 %v3810_v26 }
 0x7dc   :  { %v2708_v44 = vsel %vm60_vm0, %v6039_v9, 0.0  ;;  %v2768_v18 = vmul.f32 %v6039_v9, %v6039_v9 }
 0x7dd   :  { %2709 = vadd.xlane.f32.xlu1 %v2708_v44  ;;  %v3790_v20 = vpop.permute.xlu0 %3789 }
 0x7de   :  { %v2788_v42 = vsel %vm60_vm0, %v2768_v18, 0.0  ;;  %v3792_v33 = vunpack.i.h.bf16 %v3790_v20  ;;  %v3791_v28 = vunpack.i.l.bf16 %v3790_v20 }
 0x7df   :  { %v2651_v29 = vpop.f32.mrf.mxu1  ;;  %2789 = vadd.xlane.f32.xlu2 %v2788_v42 }
 0x7e0   :  { %v3785_v4 = vpop.permute.xlu1 %3784  ;;  %v2652_v23 = vadd.f32 %v6002_v59, %v2651_v29  ;;  %v2566_v29 = vsel %vm631_vm5, %v5944_v39, %v3812_v45 }
 0x7e1   :  { %v3787_v22 = vunpack.i.h.bf16 %v3785_v4  ;;  %v3786_v1 = vunpack.i.l.bf16 %v3785_v4  ;;  %v2565_v4 = vsel %vm631_vm5, %v5941_v61, %v3811_v21 }
 0x7e2   :  { %v6054_v19 = vadd.f32 %v4187_v6, %v2652_v23 }
 0x7e3   :  { %v2570_v27 = vsel %vm1577_vm7, %v2562_v14, %v3787_v22  ;;  %v2569_v48 = vsel %vm1577_vm7, %v2561_v24, %v3786_v1  ;;  %v4190_v24 = vld [vmem:[%s6628_s0 + $0x30] sm:$0xff] }
 0x7e4   :  { %v2711_v47 = vsel %vm60_vm0, %v6054_v19, 0.0  ;;  %v2577_v43 = vsel %vm1586_vm8, %v2569_v48, %v3791_v28  ;;  %v2578_v12 = vsel %vm1586_vm8, %v2570_v27, %v3792_v33  ;;  %v2769_v17 = vmul.f32 %v6054_v19, %v6054_v19 }
 0x7e5   :  { %2712 = vadd.xlane.f32.xlu0 %v2711_v47  ;;  %v2588_v55 = vpack.c.bf16 %v2578_v12, %v2577_v43  ;;  %v4191_v12 = vld [vmem:[%s6628_s0 + $0x38] sm:$0xff] }
 0x7e6   :  { %v2791_v50 = vsel %vm60_vm0, %v2769_v17, 0.0 }
 0x7e7   :  { %3623 = vmatmul.msk.bf16.gmra.mxu1 %vm60_vm0, %v2588_v55  ;;  %2792 = vadd.xlane.f32.xlu1 %v2791_v50 }
 0x7ed   :  { %v3805_v63 = vpop.permute.xlu0 %3804 }
 0x7ee   :  { %v3807_v13 = vunpack.i.h.bf16 %v3805_v63  ;;  %v3806_v34 = vunpack.i.l.bf16 %v3805_v63 }
 0x7f0   :  { %v3800_v62 = vpop.permute.xlu1 %3799  ;;  %v2654_v51 = vpop.f32.mrf.mxu1 }
 0x7f1   :  { %v3802_v58 = vunpack.i.h.bf16 %v3800_v62  ;;  %v3801_v32 = vunpack.i.l.bf16 %v3800_v62  ;;  %v2655_v53 = vadd.f32 %v6002_v59, %v2654_v51 }
 0x7f3   :  { %v2572_v2 = vsel %vm1577_vm7, %v2564_v3, %v3802_v58  ;;  %v2571_v37 = vsel %vm1577_vm7, %v2563_v30, %v3801_v32  ;;  %v6076_v52 = vadd.f32 %v4188_v60, %v2655_v53  ;;  %v3679_v53 = vld [vmem:[%s6636_s8 + $0x8] sm:$0xff] }
 0x7f4   :  { %v2579_v10 = vsel %vm1586_vm8, %v2571_v37, %v3806_v34  ;;  %v2580_v36 = vsel %vm1586_vm8, %v2572_v2, %v3807_v13  ;;  %3182 = vmatpush.bf16.msra.mxu3 %v3679_v53  ;;  %v3678_v34 = vld [vmem:[%s6636_s8] sm:$0xff] }
 0x7f5   :  { %v2714_v0 = vsel %vm60_vm0, %v6076_v52, 0.0  ;;  %v2589_v15 = vpack.c.bf16 %v2580_v36, %v2579_v10  ;;  %v2770_v7 = vmul.f32 %v6076_v52, %v6076_v52 }
 0x7f6   :  { %2715 = vadd.xlane.f32.xlu0 %v2714_v0 }
 0x7f7   :  { %3624 = vmatmul.msk.bf16.gmra.mxu1 %vm60_vm0, %v2589_v15  ;;  %v2794_v56 = vsel %vm60_vm0, %v2770_v7, 0.0 }
 0x7f8   :  { %v2656_v57 = vpop.f32.mrf.mxu1  ;;  %2795 = vadd.xlane.f32.xlu1 %v2794_v56  ;;  %3183 = vmatpush.bf16.msra.mxu3 %v3678_v34 }
 0x7f9   :  { %v2657_v46 = vadd.f32 %v6002_v59, %v2656_v57 }
 0x7fb   :  { %v6090_v5 = vadd.f32 %v4189_v40, %v2657_v46 }
 0x7fd   :  { %v2717_v25 = vsel %vm60_vm0, %v6090_v5, 0.0  ;;  %v2771_v8 = vmul.f32 %v6090_v5, %v6090_v5 }
 0x7fe   :  { %2718 = vadd.xlane.f32.xlu2 %v2717_v25  ;;  %v3820_v31 = vpop.permute.xlu0 %3819  ;;  %v4192_v25 = vld [vmem:[%s6628_s0 + $0x40] sm:$0xff] }
 0x7ff   :  { %v2797_v44 = vsel %vm60_vm0, %v2771_v8, 0.0  ;;  %v3822_v23 = vunpack.i.h.bf16 %v3820_v31  ;;  %v3821_v14 = vunpack.i.l.bf16 %v3820_v31 }
 0x800   :  { %v3815_v18 = vpop.permute.xlu1 %3814  ;;  %v2659_v11 = vpop.f32.mrf.mxu1  ;;  %2798 = vadd.xlane.f32.xlu0 %v2797_v44 }
 0x801   :  { %v3817_v35 = vunpack.i.h.bf16 %v3815_v18  ;;  %v3816_v42 = vunpack.i.l.bf16 %v3815_v18  ;;  %v2660_v20 = vadd.f32 %v6002_v59, %v2659_v11 }
 0x803   :  { %v2574_v22 = vsel %vm1577_vm7, %v2566_v29, %v3817_v35  ;;  %v2573_v1 = vsel %vm1577_vm7, %v2565_v4, %v3816_v42  ;;  %v6107_v33 = vadd.f32 %v4190_v24, %v2660_v20 }
 0x804   :  { %v2581_v28 = vsel %vm1586_vm8, %v2573_v1, %v3821_v14  ;;  %v2582_v6 = vsel %vm1586_vm8, %v2574_v22, %v3822_v23 }
 0x805   :  { %v2720_v39 = vsel %vm60_vm0, %v6107_v33, 0.0  ;;  %v2590_v61 = vpack.c.bf16 %v2582_v6, %v2581_v28  ;;  %v2772_v27 = vmul.f32 %v6107_v33, %v6107_v33 }
 0x806   :  { %2721 = vadd.xlane.f32.xlu2 %v2720_v39  ;;  %v4193_v39 = vld [vmem:[%s6628_s0 + $0x48] sm:$0xff] }
 0x807   :  { %3625 = vmatmul.msk.bf16.gmra.mxu1 %vm60_vm0, %v2590_v61  ;;  %v2800_v48 = vsel %vm60_vm0, %v2772_v27, 0.0 }
 0x808   :  { %v2661_v47 = vpop.f32.mrf.mxu1  ;;  %2801 = vadd.xlane.f32.xlu0 %v2800_v48 }
 0x809   :  { %v2662_v43 = vadd.f32 %v6002_v59, %v2661_v47 }
 0x80b   :  { %v6121_v17 = vadd.f32 %v4191_v12, %v2662_v43 }
 0x80d   :  { %v2723_v55 = vsel %vm60_vm0, %v6121_v17, 0.0  ;;  %v2773_v50 = vmul.f32 %v6121_v17, %v6121_v17 }
 0x80e   :  { %2724 = vadd.xlane.f32.xlu1 %v2723_v55 }
 0x80f   :  { %v2803_v38 = vsel %vm60_vm0, %v2773_v50, 0.0 }
 0x810   :  { %2804 = vadd.xlane.f32.xlu2 %v2803_v38 }
 0x840   :  { %v2704_v41 = vpop.xlane.xlu2 %2703 }
 0x841   :  { %v6129_v63 = vmul.f32 %v2704_v41, %v6690_v54 }
 0x842   :  { %v2784_v62 = vpop.xlane.xlu0 %2783 }
 0x843   :  { %v2846_v51 = vmul.f32 %v6129_v63, %v6129_v63  ;;  %v2830_v58 = vmul.f32 %v2784_v62, %v6690_v54  ;;  %v2878_v50 = vsub.f32 %v6008_v16, %v6129_v63 }
 0x845   :  { %v2862_v32 = vsub.f32 %v2830_v58, %v2846_v51  ;;  %v6189_v58 = vld [vmem:[%s6634_s6] ss:$0 sm:$0xff] }
 0x847   :  { %v2894_v3 = vadd.f32 1e-05, %v2862_v32 }
 0x848   :  { %v2707_v30 = vpop.xlane.xlu1 %2706 }
 0x849   :  { %4120 = vrsqrt.f32 %v2894_v3  ;;  %v6138_v13 = vmul.f32 %v2707_v30, %v6690_v54  ;;  %vm2916_vm10 = vweird.f32 %v2894_v3 }
 0x84a   :  { %v2787_v2 = vpop.xlane.xlu2 %2786 }
 0x84b   :  { %v2847_v37 = vmul.f32 %v6138_v13, %v6138_v13  ;;  %v2831_v60 = vmul.f32 %v2787_v2, %v6690_v54  ;;  %v2879_v63 = vsub.f32 %v6027_v49, %v6138_v13 }
 0x84d   :  { %v2863_v10 = vsub.f32 %v2831_v60, %v2847_v37  ;;  %v6197_v60 = vld [vmem:[%s6635_s7] ss:$0 sm:$0xff] }
 0x84f   :  { %v4121_v36 = vpop.eup %4120  ;;  %v2895_v0 = vadd.f32 1e-05, %v2863_v10 }
 0x850   :  { %v2911_v15 = vmul.f32 %v4121_v36, %v2894_v3  ;;  %v2664_v7 = vpop.f32.mrf.mxu1  ;;  %v2710_v56 = vpop.xlane.xlu1 %2709  ;;  %vm2917_vm9 = vweird.f32 %v4121_v36 }
 0x851   :  { %4122 = vrsqrt.f32 %v2895_v0  ;;  %v2665_v57 = vadd.f32 %v6002_v59, %v2664_v7  ;;  %v6148_v46 = vmul.f32 %v2710_v56, %v6690_v54  ;;  %vm2918_vm11 = vmor %vm2916_vm10, %vm2917_vm9  ;;  %vm2926_vm13 = vweird.f32 %v2895_v0 }
 0x852   :  { %v2912_v26 = vmul.f32 %v4121_v36, %v2911_v15  ;;  %v2790_v40 = vpop.xlane.xlu2 %2789 }
 0x853   :  { %v6153_v8 = vadd.f32 %v4192_v25, %v2665_v57  ;;  %v2848_v45 = vmul.f32 %v6148_v46, %v6148_v46  ;;  %v2832_v21 = vmul.f32 %v2790_v40, %v6690_v54  ;;  %v4194_v57 = vld [vmem:[%s6628_s0 + $0x50] sm:$0xff] }
 0x854   :  { %v2913_v31 = vmul.f32 0.5, %v2912_v26 }
 0x855   :  { %v2864_v44 = vsub.f32 %v2832_v21, %v2848_v45  ;;  %v2726_v18 = vsel %vm60_vm0, %v6153_v8, 0.0  ;;  %v2774_v11 = vmul.f32 %v6153_v8, %v6153_v8 }
 0x856   :  { %v2914_v35 = vsub.f32 1.5, %v2913_v31  ;;  %2727 = vadd.xlane.f32.xlu1 %v2726_v18 }
 0x857   :  { %v4123_v42 = vpop.eup %4122  ;;  %v6162_v20 = vadd.f32 1e-05, %v2864_v44  ;;  %v2806_v29 = vsel %vm60_vm0, %v2774_v11, 0.0 }
 0x858   :  { %v2921_v4 = vmul.f32 %v4123_v42, %v2895_v0  ;;  %v2666_v23 = vpop.f32.mrf.mxu1  ;;  %2807 = vadd.xlane.f32.xlu2 %v2806_v29  ;;  %v2713_v14 = vpop.xlane.xlu0 %2712  ;;  %v2915_v22 = vmul.f32 %v4121_v36, %v2914_v35  ;;  %vm2927_vm12 = vweird.f32 %v4123_v42 }
 0x859   :  { %4124 = vrsqrt.f32 %v6162_v20  ;;  %v2667_v1 = vadd.f32 %v6002_v59, %v2666_v23  ;;  %v6168_v24 = vmul.f32 %v2713_v14, %v6690_v54  ;;  %vm2928_vm14 = vmor %vm2926_vm13, %vm2927_vm12  ;;  %vm2936_vm1 = vweird.f32 %v6162_v20 }
 0x85a   :  { %v2922_v28 = vmul.f32 %v4123_v42, %v2921_v4  ;;  %v2793_v6 = vpop.xlane.xlu1 %2792  ;;  %v2919_v43 = vsel %vm2918_vm11, %v4121_v36, %v2915_v22 }
 0x85b   :  { %v6173_v61 = vadd.f32 %v4193_v39, %v2667_v1  ;;  %v2849_v27 = vmul.f32 %v6168_v24, %v6168_v24  ;;  %v2833_v47 = vmul.f32 %v2793_v6, %v6690_v54  ;;  %v3070_v32 = vmul.f32 %v2919_v43, %v2878_v50 }
 0x85c   :  { %v2923_v48 = vmul.f32 0.5, %v2922_v28  ;;  %v2880_v39 = vsub.f32 %v6039_v9, %v6148_v46 }
 0x85d   :  { %v2729_v12 = vsel %vm60_vm0, %v6173_v61, 0.0  ;;  %v2775_v55 = vmul.f32 %v6173_v61, %v6173_v61  ;;  %v2865_v41 = vsub.f32 %v2833_v47, %v2849_v27  ;;  %v3089_v10 = vmul.f32 %v6189_v58, %v3070_v32  ;;  %v4195_v47 = vld [vmem:[%s6628_s0 + $0x58] sm:$0xff] }
 0x85e   :  { %v2924_v38 = vsub.f32 1.5, %v2923_v48  ;;  %2730 = vadd.xlane.f32.xlu0 %v2729_v12 }
 0x85f   :  { %v4125_v62 = vpop.eup %4124  ;;  %v2809_v51 = vsel %vm60_vm0, %v2775_v55, 0.0  ;;  %v2897_v30 = vadd.f32 1e-05, %v2865_v41  ;;  %v3108_v25 = vadd.f32 %v6197_v60, %v3089_v10 }
 0x860   :  { %v2925_v53 = vmul.f32 %v4123_v42, %v2924_v38  ;;  %v2931_v3 = vmul.f32 %v4125_v62, %v6162_v20  ;;  %2810 = vadd.xlane.f32.xlu1 %v2809_v51  ;;  %vm2937_vm15 = vweird.f32 %v4125_v62 }
 0x861   :  { %4126 = vrsqrt.f32 %v2897_v30  ;;  %vm6218_vm2 = vmor %vm2936_vm1, %vm2937_vm15  ;;  %vm2946_vm4 = vweird.f32 %v2897_v30 }
 0x862   :  { %v2929_v34 = vsel %vm2928_vm14, %v4123_v42, %v2925_v53  ;;  %v2932_v2 = vmul.f32 %v4125_v62, %v2931_v3 }
 0x863   :  { %v3071_v37 = vmul.f32 %v2929_v34, %v2879_v63 }
 0x864   :  { %v2933_v36 = vmul.f32 0.5, %v2932_v2  ;;  %v2669_v0 = vpop.f32.mrf.mxu1 }
 0x865   :  { %v3090_v15 = vmul.f32 %v6189_v58, %v3071_v37  ;;  %v2670_v7 = vadd.f32 %v6002_v59, %v2669_v0  ;;  %v4196_v0 = vld [vmem:[%s6628_s0 + $0x60] sm:$0xff] }
 0x866   :  { %v2934_v56 = vsub.f32 1.5, %v2933_v36 }
 0x867   :  { %v3109_v13 = vadd.f32 %v6197_v60, %v3090_v15  ;;  %v6206_v26 = vadd.f32 %v4194_v57, %v2670_v7  ;;  %v4127_v40 = vpop.eup %4126 }
 0x868   :  { %v2935_v45 = vmul.f32 %v4125_v62, %v2934_v56  ;;  %v2941_v21 = vmul.f32 %v4127_v40, %v2897_v30  ;;  %vm2947_vm3 = vweird.f32 %v4127_v40 }
 0x869   :  { %v2716_v31 = vpop.xlane.xlu0 %2715  ;;  %v2732_v44 = vsel %vm60_vm0, %v6206_v26, 0.0  ;;  %v2776_v18 = vmul.f32 %v6206_v26, %v6206_v26  ;;  %v3124_v35 = vpack.c.bf16 %v3109_v13, %v3108_v25  ;;  %vm2948_vm5 = vmor %vm2946_vm4, %vm2947_vm3 }
 0x86a   :  { %v6214_v11 = vmul.f32 %v2716_v31, %v6690_v54  ;;  %2733 = vadd.xlane.f32.xlu0 %v2732_v44  ;;  %v2942_v42 = vmul.f32 %v4127_v40, %v2941_v21  ;;  %v2939_v20 = vsel %vm6218_vm2, %v4125_v62, %v2935_v45  ;;  %v2881_v62 = vsub.f32 %v6054_v19, %v6168_v24 }
 0x86b   :  { %v2796_v29 = vpop.xlane.xlu1 %2795  ;;  %v2812_v4 = vsel %vm60_vm0, %v2776_v18, 0.0  ;;  %3634 = vmatmul.msk.bf16.vlgmr.msra.gmra.mxu3 %vm60_vm0, %v3124_v35  ;;  %v3072_v12 = vmul.f32 %v2939_v20, %v2880_v39 }
 0x86c   :  { %v2850_v14 = vmul.f32 %v6214_v11, %v6214_v11  ;;  %v2834_v22 = vmul.f32 %v2796_v29, %v6690_v54  ;;  %v2671_v1 = vpop.f32.mrf.mxu1  ;;  %2813 = vadd.xlane.f32.xlu1 %v2812_v4  ;;  %v2943_v28 = vmul.f32 0.5, %v2942_v42 }
 0x86d   :  { %v2672_v6 = vadd.f32 %v6002_v59, %v2671_v1  ;;  %v3091_v24 = vmul.f32 %v6189_v58, %v3072_v12 }
 0x86e   :  { %v2866_v27 = vsub.f32 %v2834_v22, %v2850_v14  ;;  %v2944_v48 = vsub.f32 1.5, %v2943_v28  ;;  %v4197_v28 = vld [vmem:[%s6628_s0 + $0x68] sm:$0xff] }
 0x86f   :  { %v6234_v43 = vadd.f32 %v4195_v47, %v2672_v6  ;;  %v3110_v13 = vadd.f32 %v6197_v60, %v3091_v24  ;;  %v2882_v24 = vsub.f32 %v6076_v52, %v6214_v11 }
 0x870   :  { %v6236_v55 = vadd.f32 1e-05, %v2866_v27  ;;  %v2945_v50 = vmul.f32 %v4127_v40, %v2944_v48 }
 0x871   :  { %v2719_v38 = vpop.xlane.xlu2 %2718  ;;  %v2735_v41 = vsel %vm60_vm0, %v6234_v43, 0.0  ;;  %v2777_v46 = vmul.f32 %v6234_v43, %v6234_v43 }
 0x872   :  { %4128 = vrsqrt.f32 %v6236_v55  ;;  %v6246_v51 = vmul.f32 %v2719_v38, %v6690_v54  ;;  %2736 = vadd.xlane.f32.xlu2 %v2735_v41  ;;  %v2949_v32 = vsel %vm2948_vm5, %v4127_v40, %v2945_v50  ;;  %vm2956_vm7 = vweird.f32 %v6236_v55 }
 0x873   :  { %v2799_v53 = vpop.xlane.xlu0 %2798  ;;  %v2815_v3 = vsel %vm60_vm0, %v2777_v46, 0.0  ;;  %v3073_v30 = vmul.f32 %v2949_v32, %v2881_v62 }
 0x874   :  { %v2851_v63 = vmul.f32 %v6246_v51, %v6246_v51  ;;  %v2835_v34 = vmul.f32 %v2799_v53, %v6690_v54  ;;  %v2674_v2 = vpop.f32.mrf.mxu1  ;;  %2816 = vadd.xlane.f32.xlu0 %v2815_v3 }
 0x875   :  { %v2675_v37 = vadd.f32 %v6002_v59, %v2674_v2  ;;  %v3092_v36 = vmul.f32 %v6189_v58, %v3073_v30 }
 0x876   :  { %v2867_v10 = vsub.f32 %v2835_v34, %v2851_v63 }
 0x877   :  { %v6258_v15 = vadd.f32 %v4196_v0, %v2675_v37  ;;  %v3111_v57 = vadd.f32 %v6197_v60, %v3092_v36  ;;  %v4198_v36 = vld [vmem:[%s6628_s0 + $0x70] sm:$0xff] }
 0x878   :  { %v4129_v7 = vpop.eup %4128  ;;  %v2899_v56 = vadd.f32 1e-05, %v2867_v10 }
 0x879   :  { %v2951_v40 = vmul.f32 %v4129_v7, %v6236_v55  ;;  %v2722_v25 = vpop.xlane.xlu2 %2721  ;;  %v2738_v45 = vsel %vm60_vm0, %v6258_v15, 0.0  ;;  %v2778_v21 = vmul.f32 %v6258_v15, %v6258_v15  ;;  %v3125_v44 = vpack.c.bf16 %v3111_v57, %v3110_v13 }
 0x87a   :  { %4130 = vrsqrt.f32 %v2899_v56  ;;  %v6268_v31 = vmul.f32 %v2722_v25, %v6690_v54  ;;  %2739 = vadd.xlane.f32.xlu2 %v2738_v45  ;;  %vm2957_vm6 = vweird.f32 %v4129_v7  ;;  %vm2966_vm10 = vweird.f32 %v2899_v56 }
 0x87b   :  { %v2952_v18 = vmul.f32 %v4129_v7, %v2951_v40  ;;  %v2802_v35 = vpop.xlane.xlu0 %2801  ;;  %v2818_v42 = vsel %vm60_vm0, %v2778_v21, 0.0  ;;  %3635 = vmatmul.msk.bf16.gmra.mxu3 %vm60_vm0, %v3125_v44  ;;  %vm6292_vm8 = vmor %vm2956_vm7, %vm2957_vm6  ;;  %v2883_v45 = vsub.f32 %v6090_v5, %v6246_v51 }
 0x87c   :  { %v2852_v29 = vmul.f32 %v6268_v31, %v6268_v31  ;;  %v2836_v4 = vmul.f32 %v2802_v35, %v6690_v54  ;;  %v2676_v23 = vpop.f32.mrf.mxu1  ;;  %2819 = vadd.xlane.f32.xlu0 %v2818_v42 }
 0x87d   :  { %v2953_v14 = vmul.f32 0.5, %v2952_v18  ;;  %v2677_v22 = vadd.f32 %v6002_v59, %v2676_v23 }
 0x87e   :  { %v2868_v1 = vsub.f32 %v2836_v4, %v2852_v29 }
 0x87f   :  { %v2954_v20 = vsub.f32 1.5, %v2953_v14  ;;  %v6279_v6 = vadd.f32 %v4197_v28, %v2677_v22  ;;  %v4199_v22 = vld [vmem:[%s6628_s0 + $0x78] sm:$0xff] }
 0x880   :  { %v4131_v39 = vpop.eup %4130  ;;  %v6281_v27 = vadd.f32 1e-05, %v2868_v1 }
 0x881   :  { %v2955_v48 = vmul.f32 %v4129_v7, %v2954_v20  ;;  %v2961_v47 = vmul.f32 %v4131_v39, %v2899_v56  ;;  %v2725_v12 = vpop.xlane.xlu1 %2724  ;;  %v2741_v50 = vsel %vm60_vm0, %v6279_v6, 0.0  ;;  %v2779_v41 = vmul.f32 %v6279_v6, %v6279_v6 }
 0x882   :  { %4132 = vrsqrt.f32 %v6281_v27  ;;  %v6287_v38 = vmul.f32 %v2725_v12, %v6690_v54  ;;  %2742 = vadd.xlane.f32.xlu1 %v2741_v50  ;;  %vm2967_vm9 = vweird.f32 %v4131_v39  ;;  %vm2976_vm13 = vweird.f32 %v6281_v27 }
 0x883   :  { %v2962_v46 = vmul.f32 %v4131_v39, %v2961_v47  ;;  %v2805_v62 = vpop.xlane.xlu2 %2804  ;;  %v2959_v63 = vsel %vm6292_vm8, %v4129_v7, %v2955_v48  ;;  %v2821_v55 = vsel %vm60_vm0, %v2779_v41, 0.0  ;;  %vm2968_vm11 = vmor %vm2966_vm10, %vm2967_vm9 }
 0x884   :  { %v2853_v53 = vmul.f32 %v6287_v38, %v6287_v38  ;;  %v2837_v3 = vmul.f32 %v2805_v62, %v6690_v54  ;;  %v2679_v30 = vpop.f32.mrf.mxu1  ;;  %2822 = vadd.xlane.f32.xlu2 %v2821_v55  ;;  %v3074_v7 = vmul.f32 %v2959_v63, %v2882_v24 }
 0x885   :  { %v2963_v34 = vmul.f32 0.5, %v2962_v46  ;;  %v2680_v2 = vadd.f32 %v6002_v59, %v2679_v30 }
 0x886   :  { %v2869_v37 = vsub.f32 %v2837_v3, %v2853_v53  ;;  %v3093_v29 = vmul.f32 %v6189_v58, %v3074_v7  ;;  %v2884_v53 = vsub.f32 %v6107_v33, %v6268_v31 }
 0x887   :  { %v2964_v10 = vsub.f32 1.5, %v2963_v34  ;;  %v6308_v0 = vadd.f32 %v4198_v36, %v2680_v2 }
 0x888   :  { %v4133_v13 = vpop.eup %4132  ;;  %v2901_v57 = vadd.f32 1e-05, %v2869_v37  ;;  %v3112_v28 = vadd.f32 %v6197_v60, %v3093_v29 }
 0x889   :  { %v2965_v40 = vmul.f32 %v4131_v39, %v2964_v10  ;;  %v2971_v25 = vmul.f32 %v4133_v13, %v6281_v27  ;;  %v2744_v11 = vsel %vm60_vm0, %v6308_v0, 0.0  ;;  %v2780_v21 = vmul.f32 %v6308_v0, %v6308_v0 }
 0x88a   :  { %4134 = vrsqrt.f32 %v2901_v57  ;;  %2745 = vadd.xlane.f32.xlu1 %v2744_v11  ;;  %vm2977_vm12 = vweird.f32 %v4133_v13  ;;  %vm2986_vm1 = vweird.f32 %v2901_v57  ;;  %v2885_v27 = vsub.f32 %v6121_v17, %v6287_v38 }
 0x88b   :  { %v2969_v44 = vsel %vm2968_vm11, %v4131_v39, %v2965_v40  ;;  %v2972_v18 = vmul.f32 %v4133_v13, %v2971_v25  ;;  %v2824_v56 = vsel %vm60_vm0, %v2780_v21, 0.0  ;;  %vm2978_vm14 = vmor %vm2976_vm13, %vm2977_vm12 }
 0x88c   :  { %v3075_v35 = vmul.f32 %v2969_v44, %v2883_v45  ;;  %v2681_v42 = vpop.f32.mrf.mxu1  ;;  %2825 = vadd.xlane.f32.xlu2 %v2824_v56 }
 0x88d   :  { %v2973_v4 = vmul.f32 0.5, %v2972_v18  ;;  %v2682_v23 = vadd.f32 %v6002_v59, %v2681_v42 }
 0x88e   :  { %v3094_v51 = vmul.f32 %v6189_v58, %v3075_v35  ;;  %v3687_v35 = vld [vmem:[%s6638_s10 + $0x38] sm:$0xff] }
 0x88f   :  { %v2974_v14 = vsub.f32 1.5, %v2973_v4  ;;  %v6324_v1 = vadd.f32 %v4199_v22, %v2682_v23  ;;  %3445 = vmatpush.bf16.msrb.mxu0 %v3687_v35  ;;  %v3686_v4 = vld [vmem:[%s6638_s10 + $0x30] sm:$0xff] }
 0x890   :  { %v4135_v20 = vpop.eup %4134  ;;  %v3113_v39 = vadd.f32 %v6197_v60, %v3094_v51 }
 0x891   :  { %v2975_v48 = vmul.f32 %v4133_v13, %v2974_v14  ;;  %v2981_v47 = vmul.f32 %v4135_v20, %v2901_v57  ;;  %v2747_v59 = vsel %vm60_vm0, %v6324_v1, 0.0  ;;  %v2781_v12 = vmul.f32 %v6324_v1, %v6324_v1  ;;  %v3685_v14 = vld [vmem:[%s6638_s10 + $0x28] sm:$0xff] }
 0x892   :  { %2748 = vadd.xlane.f32.xlu0 %v2747_v59  ;;  %v3126_v50 = vpack.c.bf16 %v3113_v39, %v3112_v28  ;;  %vm2987_vm15 = vweird.f32 %v4135_v20 }
 0x893   :  { %v2982_v41 = vmul.f32 %v4135_v20, %v2981_v47  ;;  %v2827_v46 = vsel %vm60_vm0, %v2781_v12, 0.0  ;;  %v2979_v62 = vsel %vm2978_vm14, %v4133_v13, %v2975_v48  ;;  %vm2988_vm2 = vmor %vm2986_vm1, %vm2987_vm15  ;;  %3446 = vmatpush.bf16.msrb.mxu0 %v3686_v4 }
 0x894   :  { %3636 = vmatmul.msk.bf16.gmra.mxu3 %vm60_vm0, %v3126_v50  ;;  %2828 = vadd.xlane.f32.xlu1 %v2827_v46  ;;  %v3076_v30 = vmul.f32 %v2979_v62, %v2884_v53  ;;  %v3684_v50 = vld [vmem:[%s6638_s10 + $0x20] sm:$0xff] }
 0x895   :  { %v2983_v32 = vmul.f32 0.5, %v2982_v41 }
 0x896   :  { %v3095_v55 = vmul.f32 %v6189_v58, %v3076_v30 }
 0x897   :  { %v2984_v3 = vsub.f32 1.5, %v2983_v32  ;;  %3447 = vmatpush.bf16.msrb.mxu0 %v3685_v14 }
 0x898   :  { %v3114_v37 = vadd.f32 %v6197_v60, %v3095_v55 }
 0x899   :  { %v2985_v63 = vmul.f32 %v4135_v20, %v2984_v3  ;;  %v3683_v3 = vld [vmem:[%s6638_s10 + $0x18] sm:$0xff] }
 0x89b   :  { %v2989_v34 = vsel %vm2988_vm2, %v4135_v20, %v2985_v63  ;;  %3448 = vmatpush.bf16.msrb.mxu0 %v3684_v50 }
 0x89c   :  { %v3077_v2 = vmul.f32 %v2989_v34, %v2885_v27 }
 0x89e   :  { %v3096_v24 = vmul.f32 %v6189_v58, %v3077_v2 }
 0x89f   :  { %3449 = vmatpush.bf16.msrb.mxu0 %v3683_v3 }
 0x8a0   :  { %v3115_v10 = vadd.f32 %v6197_v60, %v3096_v24 }
 0x8a2   :  { %v3127_v31 = vpack.c.bf16 %v3115_v10, %v3114_v37 }
 0x8a4   :  { %3637 = vmatmul.msk.bf16.gmra.mxu3 %vm60_vm0, %v3127_v31  ;;  %v3682_v31 = vld [vmem:[%s6638_s10 + $0x10] sm:$0xff] }
 0x8a5   :  { %3450 = vmatpush.bf16.msrb.mxu0 %v3682_v31 }
 0x8c9   :  { %v2728_v36 = vpop.xlane.xlu1 %2727 }
 0x8ca   :  { %v2758_v13 = vmul.f32 %v2728_v36, %v6690_v54 }
 0x8cb   :  { %v2808_v7 = vpop.xlane.xlu2 %2807 }
 0x8cc   :  { %v2854_v57 = vmul.f32 %v2758_v13, %v2758_v13  ;;  %v2838_v38 = vmul.f32 %v2808_v7, %v6690_v54  ;;  %v2886_v2 = vsub.f32 %v6153_v8, %v2758_v13 }
 0x8ce   :  { %v2870_v40 = vsub.f32 %v2838_v38, %v2854_v57 }
 0x8d0   :  { %v2902_v25 = vadd.f32 1e-05, %v2870_v40 }
 0x8d1   :  { %v2731_v11 = vpop.xlane.xlu0 %2730 }
 0x8d2   :  { %4136 = vrsqrt.f32 %v2902_v25  ;;  %v2759_v45 = vmul.f32 %v2731_v11, %v6690_v54  ;;  %vm2996_vm4 = vweird.f32 %v2902_v25 }
 0x8d3   :  { %v2811_v21 = vpop.xlane.xlu1 %2810 }
 0x8d4   :  { %v2855_v44 = vmul.f32 %v2759_v45, %v2759_v45  ;;  %v2839_v18 = vmul.f32 %v2811_v21, %v6690_v54  ;;  %v2887_v57 = vsub.f32 %v6173_v61, %v2759_v45  ;;  %v6386_v21 = vld [vmem:[%s6637_s9] ss:$0 sm:$0xff] }
 0x8d6   :  { %v2871_v42 = vsub.f32 %v2839_v18, %v2855_v44  ;;  %v3681_v44 = vld [vmem:[%s6638_s10 + $0x8] sm:$0xff] }
 0x8d7   :  { %3451 = vmatpush.bf16.msrb.mxu0 %v3681_v44 }
 0x8d8   :  { %v4137_v56 = vpop.eup %4136  ;;  %v2903_v29 = vadd.f32 1e-05, %v2871_v42 }
 0x8d9   :  { %v2991_v23 = vmul.f32 %v4137_v56, %v2902_v25  ;;  %vm2997_vm3 = vweird.f32 %v4137_v56 }
 0x8da   :  { %4138 = vrsqrt.f32 %v2903_v29  ;;  %vm2998_vm5 = vmor %vm2996_vm4, %vm2997_vm3  ;;  %vm3006_vm7 = vweird.f32 %v2903_v29 }
 0x8db   :  { %v2992_v51 = vmul.f32 %v4137_v56, %v2991_v23 }
 0x8dd   :  { %v2993_v22 = vmul.f32 0.5, %v2992_v51  ;;  %v2734_v20 = vpop.xlane.xlu0 %2733 }
 0x8de   :  { %v6358_v28 = vmul.f32 %v2734_v20, %v6690_v54  ;;  %v3680_v20 = vld [vmem:[%s6638_s10] sm:$0xff] }
 0x8df   :  { %v2994_v39 = vsub.f32 1.5, %v2993_v22  ;;  %v2814_v48 = vpop.xlane.xlu1 %2813  ;;  %3452 = vmatpush.bf16.msrb.mxu0 %v3680_v20 }
 0x8e0   :  { %v4139_v47 = vpop.eup %4138  ;;  %v2856_v59 = vmul.f32 %v6358_v28, %v6358_v28  ;;  %v2840_v12 = vmul.f32 %v2814_v48, %v6690_v54 }
 0x8e1   :  { %v3001_v41 = vmul.f32 %v4139_v47, %v2903_v29  ;;  %v2995_v46 = vmul.f32 %v4137_v56, %v2994_v39  ;;  %vm3007_vm6 = vweird.f32 %v4139_v47 }
 0x8e2   :  { %v2872_v62 = vsub.f32 %v2840_v12, %v2856_v59  ;;  %vm3008_vm8 = vmor %vm3006_vm7, %vm3007_vm6 }
 0x8e3   :  { %v3002_v32 = vmul.f32 %v4139_v47, %v3001_v41  ;;  %v2999_v27 = vsel %vm2998_vm5, %v4137_v56, %v2995_v46 }
 0x8e4   :  { %v6366_v53 = vadd.f32 1e-05, %v2872_v62  ;;  %v3078_v36 = vmul.f32 %v2999_v27, %v2886_v2 }
 0x8e5   :  { %v3003_v30 = vmul.f32 0.5, %v3002_v32  ;;  %v2737_v63 = vpop.xlane.xlu2 %2736 }
 0x8e6   :  { %4140 = vrsqrt.f32 %v6366_v53  ;;  %v6373_v34 = vmul.f32 %v2737_v63, %v6690_v54  ;;  %v3097_v45 = vmul.f32 %v6189_v58, %v3078_v36  ;;  %vm3016_vm10 = vweird.f32 %v6366_v53 }
 0x8e7   :  { %v3004_v55 = vsub.f32 1.5, %v3003_v30  ;;  %v2817_v24 = vpop.xlane.xlu0 %2816 }
 0x8e8   :  { %v2857_v37 = vmul.f32 %v6373_v34, %v6373_v34  ;;  %v2841_v10 = vmul.f32 %v2817_v24, %v6690_v54  ;;  %v3116_v48 = vadd.f32 %v6197_v60, %v3097_v45 }
 0x8e9   :  { %v3005_v7 = vmul.f32 %v4139_v47, %v3004_v55 }
 0x8ea   :  { %v2873_v38 = vsub.f32 %v2841_v10, %v2857_v37 }
 0x8eb   :  { %v3009_v13 = vsel %vm3008_vm8, %v4139_v47, %v3005_v7 }
 0x8ec   :  { %v4141_v40 = vpop.eup %4140  ;;  %v3079_v25 = vmul.f32 %v3009_v13, %v2887_v57  ;;  %v2905_v11 = vadd.f32 1e-05, %v2873_v38  ;;  %v2888_v38 = vsub.f32 %v6206_v26, %v6358_v28 }
 0x8ed   :  { %v3011_v18 = vmul.f32 %v4141_v40, %v6366_v53  ;;  %v2740_v35 = vpop.xlane.xlu2 %2739  ;;  %vm3017_vm9 = vweird.f32 %v4141_v40 }
 0x8ee   :  { %4142 = vrsqrt.f32 %v2905_v11  ;;  %v6394_v42 = vmul.f32 %v2740_v35, %v6690_v54  ;;  %v3098_v56 = vmul.f32 %v6189_v58, %v3079_v25  ;;  %v3185_v23 = vpop.f32.mrf.mxu3  ;;  %vm3018_vm11 = vmor %vm3016_vm10, %vm3017_vm9  ;;  %vm3026_vm13 = vweird.f32 %v2905_v11 }
 0x8ef   :  { %v3012_v29 = vmul.f32 %v4141_v40, %v3011_v18  ;;  %v2820_v4 = vpop.xlane.xlu0 %2819  ;;  %v6401_v22 = vadd.f32 %v6386_v21, %v3185_v23 }
 0x8f0   :  { %v2858_v51 = vmul.f32 %v6394_v42, %v6394_v42  ;;  %v2842_v14 = vmul.f32 %v2820_v4, %v6690_v54  ;;  %v3117_v47 = vadd.f32 %v6197_v60, %v3098_v56  ;;  %v2889_v4 = vsub.f32 %v6234_v43, %v6373_v34 }
 0x8f1   :  { %v3013_v39 = vmul.f32 0.5, %v3012_v29  ;;  %v3225_v12 = vmul.f32 %v6401_v22, %v6401_v22 }
 0x8f2   :  { %v2874_v59 = vsub.f32 %v2842_v14, %v2858_v51  ;;  %v3128_v41 = vpack.c.bf16 %v3117_v47, %v3116_v48 }
 0x8f3   :  { %v3014_v50 = vsub.f32 1.5, %v3013_v39  ;;  %v3241_v32 = vmul.f32 %v3225_v12, %v6401_v22 }
 0x8f4   :  { %v4143_v46 = vpop.eup %4142  ;;  %v6410_v62 = vadd.f32 1e-05, %v2874_v59  ;;  %3638 = vmatmul.msk.bf16.gmra.mxu3 %vm60_vm0, %v3128_v41 }
 0x8f5   :  { %v3015_v3 = vmul.f32 %v4141_v40, %v3014_v50  ;;  %v3021_v30 = vmul.f32 %v4143_v46, %v2905_v11  ;;  %v2743_v63 = vpop.xlane.xlu1 %2742  ;;  %v3257_v27 = vmul.f32 0.044715, %v3241_v32  ;;  %vm3027_vm12 = vweird.f32 %v4143_v46 }
 0x8f6   :  { %4144 = vrsqrt.f32 %v6410_v62  ;;  %v6416_v2 = vmul.f32 %v2743_v63, %v6690_v54  ;;  %v3187_v24 = vpop.f32.mrf.mxu3  ;;  %vm3028_vm14 = vmor %vm3026_vm13, %vm3027_vm12  ;;  %vm3036_vm1 = vweird.f32 %v6410_v62 }
 0x8f7   :  { %v3022_v55 = vmul.f32 %v4143_v46, %v3021_v30  ;;  %v3273_v37 = vadd.f32 %v3257_v27, %v6401_v22  ;;  %v3019_v31 = vsel %vm3018_vm11, %v4141_v40, %v3015_v3  ;;  %v6423_v7 = vadd.f32 %v6386_v21, %v3187_v24  ;;  %v2823_v57 = vpop.xlane.xlu2 %2822 }
 0x8f8   :  { %v2859_v10 = vmul.f32 %v6416_v2, %v6416_v2  ;;  %v2843_v13 = vmul.f32 %v2823_v57, %v6690_v54  ;;  %v3080_v35 = vmul.f32 %v3019_v31, %v2888_v38 }
 0x8f9   :  { %v3023_v36 = vmul.f32 0.5, %v3022_v55  ;;  %v3289_v25 = vmul.f32 0.7978846, %v3273_v37  ;;  %v3226_v44 = vmul.f32 %v6423_v7, %v6423_v7 }
 0x8fa   :  { %v2875_v40 = vsub.f32 %v2843_v13, %v2859_v10  ;;  %v3099_v34 = vmul.f32 %v6189_v58, %v3080_v35 }
 0x8fb   :  { %v3024_v53 = vsub.f32 1.5, %v3023_v36  ;;  %v3242_v29 = vmul.f32 %v3226_v44, %v6423_v7  ;;  %4146 = vtanh.f32 %v3289_v25 }
 0x8fc   :  { %v6430_v18 = vpop.eup %4144  ;;  %v6437_v23 = vadd.f32 1e-05, %v2875_v40  ;;  %v3118_v55 = vadd.f32 %v6197_v60, %v3099_v34 }
 0x8fd   :  { %v3025_v45 = vmul.f32 %v4143_v46, %v3024_v53  ;;  %v3031_v56 = vmul.f32 %v6430_v18, %v6410_v62  ;;  %v2746_v28 = vpop.xlane.xlu1 %2745  ;;  %v3258_v11 = vmul.f32 0.044715, %v3242_v29  ;;  %vm3037_vm15 = vweird.f32 %v6430_v18 }
 0x8fe   :  { %v6440_v51 = vmul.f32 %v2746_v28, %v6690_v54  ;;  %v3190_v39 = vpop.f32.mrf.mxu3  ;;  %4148 = vrsqrt.f32 %v6437_v23  ;;  %vm3038_vm2 = vmor %vm3036_vm1, %vm3037_vm15  ;;  %vm3046_vm4 = vweird.f32 %v6437_v23 }
 0x8ff   :  { %v3029_v14 = vsel %vm3028_vm14, %v4143_v46, %v3025_v45  ;;  %v3032_v20 = vmul.f32 %v6430_v18, %v3031_v56  ;;  %v3274_v12 = vadd.f32 %v3258_v11, %v6423_v7  ;;  %v6449_v50 = vadd.f32 %v6386_v21, %v3190_v39  ;;  %v2826_v41 = vpop.xlane.xlu2 %2825 }
 0x900   :  { %v3081_v48 = vmul.f32 %v3029_v14, %v2889_v4  ;;  %v2860_v47 = vmul.f32 %v6440_v51, %v6440_v51  ;;  %v2844_v46 = vmul.f32 %v2826_v41, %v6690_v54  ;;  %v2890_v11 = vsub.f32 %v6258_v15, %v6394_v42 }
 0x901   :  { %v3033_v59 = vmul.f32 0.5, %v3032_v20  ;;  %v3290_v30 = vmul.f32 0.7978846, %v3274_v12  ;;  %v3227_v63 = vmul.f32 %v6449_v50, %v6449_v50  ;;  %v4147_v37 = vpop.eup %4146 }
 0x902   :  { %v3100_v32 = vmul.f32 %v6189_v58, %v3081_v48  ;;  %v2876_v27 = vsub.f32 %v2844_v46, %v2860_v47  ;;  %v3321_v35 = vadd.f32 1.0, %v4147_v37 }
 0x903   :  { %v3034_v3 = vsub.f32 1.5, %v3033_v59  ;;  %4150 = vtanh.f32 %v3290_v30  ;;  %v3243_v10 = vmul.f32 %v3227_v63, %v6449_v50 }
 0x904   :  { %v3119_v24 = vadd.f32 %v6197_v60, %v3100_v32  ;;  %v4149_v36 = vpop.eup %4148  ;;  %v6460_v38 = vadd.f32 1e-05, %v2876_v27  ;;  %v3337_v47 = vmul.f32 0.5, %v3321_v35  ;;  %v2891_v32 = vsub.f32 %v6279_v6, %v6416_v2 }
 0x905   :  { %v2749_v31 = vpop.xlane.xlu0 %2748  ;;  %v3035_v57 = vmul.f32 %v6430_v18, %v3034_v3  ;;  %v3041_v25 = vmul.f32 %v4149_v36, %v6437_v23  ;;  %v3259_v40 = vmul.f32 0.044715, %v3243_v10  ;;  %vm3047_vm3 = vweird.f32 %v4149_v36 }
 0x906   :  { %v6463_v13 = vmul.f32 %v2749_v31, %v6690_v54  ;;  %v3129_v53 = vpack.c.bf16 %v3119_v24, %v3118_v55  ;;  %v3192_v44 = vpop.f32.mrf.mxu3  ;;  %4152 = vrsqrt.f32 %v6460_v38  ;;  %v3353_v27 = vmul.f32 %v3337_v47, %v6401_v22  ;;  %vm3048_vm5 = vmor %vm3046_vm4, %vm3047_vm3 }
 0x907   :  { %v2829_v45 = vpop.xlane.xlu1 %2828  ;;  %v3042_v56 = vmul.f32 %v4149_v36, %v3041_v25  ;;  %v3039_v4 = vsel %vm3038_vm2, %v6430_v18, %v3035_v57  ;;  %v3275_v62 = vadd.f32 %v3259_v40, %v6449_v50  ;;  %v6477_v14 = vadd.f32 %v6386_v21, %v3192_v44 }
 0x908   :  { %3639 = vmatmul.msk.bf16.gmra.mxu3 %vm60_vm0, %v3129_v53  ;;  %v2861_v29 = vmul.f32 %v6463_v13, %v6463_v13  ;;  %v2845_v28 = vmul.f32 %v2829_v45, %v6690_v54  ;;  %v3082_v54 = vmul.f32 %v3039_v4, %v2890_v11  ;;  %vm3056_vm7 = vweird.f32 %v6460_v38 }
 0x909   :  { %v4151_v20 = vpop.eup %4150  ;;  %v3043_v39 = vmul.f32 0.5, %v3042_v56  ;;  %v3291_v59 = vmul.f32 0.7978846, %v3275_v62  ;;  %v3228_v12 = vmul.f32 %v6477_v14, %v6477_v14  ;;  %v2892_v47 = vsub.f32 %v6308_v0, %v6440_v51 }
 0x90a   :  { %v2877_v48 = vsub.f32 %v2845_v28, %v2861_v29  ;;  %v3322_v34 = vadd.f32 1.0, %v4151_v20  ;;  %v3101_v2 = vmul.f32 %v6189_v58, %v3082_v54 }
 0x90b   :  { %v3044_v41 = vsub.f32 1.5, %v3043_v39  ;;  %v3244_v30 = vmul.f32 %v3228_v12, %v6477_v14 }
 0x90c   :  { %v2909_v18 = vadd.f32 1e-05, %v2877_v48  ;;  %v4153_v46 = vpop.eup %4152  ;;  %v3338_v3 = vmul.f32 0.5, %v3322_v34 }
 0x90d   :  { %v3045_v42 = vmul.f32 %v4149_v36, %v3044_v41  ;;  %v3051_v63 = vmul.f32 %v4153_v46, %v6460_v38  ;;  %v3260_v24 = vmul.f32 0.044715, %v3244_v30  ;;  %vm3057_vm6 = vweird.f32 %v4153_v46 }
 0x90e   :  { %4154 = vrsqrt.f32 %v2909_v18  ;;  %v3354_v55 = vmul.f32 %v3338_v3, %v6423_v7  ;;  %v3120_v7 = vadd.f32 %v6197_v60, %v3101_v2  ;;  %vm3058_vm8 = vmor %vm3056_vm7, %vm3057_vm6  ;;  %vm3066_vm10 = vweird.f32 %v2909_v18 }
 0x90f   :  { %4156 = vtanh.f32 %v3291_v59  ;;  %v3049_v37 = vsel %vm3048_vm5, %v4149_v36, %v3045_v42  ;;  %v3052_v10 = vmul.f32 %v4153_v46, %v3051_v63  ;;  %v3276_v53 = vadd.f32 %v3260_v24, %v6477_v14 }
 0x910   :  { %v3369_v31 = vpack.c.bf16 %v3354_v55, %v3353_v27  ;;  %v3083_v57 = vmul.f32 %v3049_v37, %v2891_v32  ;;  %v2893_v3 = vsub.f32 %v6324_v1, %v6463_v13 }
 0x911   :  { %v3053_v25 = vmul.f32 0.5, %v3052_v10  ;;  %v3292_v23 = vmul.f32 0.7978846, %v3276_v53 }
 0x912   :  { %3453 = vmatmul.bf16.vlgmr.msrb.gmra.mxu0 %v3369_v31  ;;  %v3102_v44 = vmul.f32 %v6189_v58, %v3083_v57 }
 0x913   :  { %v3054_v22 = vsub.f32 1.5, %v3053_v25  ;;  %4158 = vtanh.f32 %v3292_v23 }
 0x914   :  { %v4155_v35 = vpop.eup %4154  ;;  %v3121_v36 = vadd.f32 %v6197_v60, %v3102_v44 }
 0x915   :  { %v4157_v40 = vpop.eup %4156  ;;  %v3061_v45 = vmul.f32 %v4155_v35, %v2909_v18  ;;  %v3055_v56 = vmul.f32 %v4153_v46, %v3054_v22  ;;  %vm3067_vm9 = vweird.f32 %v4155_v35 }
 0x916   :  { %v3130_v62 = vpack.c.bf16 %v3121_v36, %v3120_v7  ;;  %v3323_v20 = vadd.f32 1.0, %v4157_v40  ;;  %vm3068_vm11 = vmor %vm3066_vm10, %vm3067_vm9 }
 0x917   :  { %v3195_v29 = vpop.f32.mrf.mxu3  ;;  %v3062_v28 = vmul.f32 %v4155_v35, %v3061_v45  ;;  %v3059_v11 = vsel %vm3058_vm8, %v4153_v46, %v3055_v56 }
 0x918   :  { %v6497_v4 = vadd.f32 %v6386_v21, %v3195_v29  ;;  %3640 = vmatmul.msk.bf16.gmra.mxu3 %vm60_vm0, %v3130_v62  ;;  %v3084_v12 = vmul.f32 %v3059_v11, %v2892_v47  ;;  %v3339_v41 = vmul.f32 0.5, %v3323_v20 }
 0x919   :  { %v3063_v39 = vmul.f32 0.5, %v3062_v28  ;;  %v4159_v34 = vpop.eup %4158 }
 0x91a   :  { %v3229_v48 = vmul.f32 %v6497_v4, %v6497_v4  ;;  %v3324_v54 = vadd.f32 1.0, %v4159_v34  ;;  %v3355_v24 = vmul.f32 %v3339_v41, %v6449_v50  ;;  %v3103_v10 = vmul.f32 %v6189_v58, %v3084_v12 }
 0x91b   :  { %v3064_v59 = vsub.f32 1.5, %v3063_v39 }
 0x91c   :  { %v3245_v38 = vmul.f32 %v3229_v48, %v6497_v4  ;;  %v3340_v42 = vmul.f32 0.5, %v3324_v54  ;;  %v3122_v53 = vadd.f32 %v6197_v60, %v3103_v10 }
 0x91d   :  { %v3065_v32 = vmul.f32 %v4155_v35, %v3064_v59 }
 0x91e   :  { %v3261_v46 = vmul.f32 0.044715, %v3245_v38  ;;  %v3356_v37 = vmul.f32 %v3340_v42, %v6477_v14 }
 0x91f   :  { %v3197_v30 = vpop.f32.mrf.mxu3  ;;  %v3069_v63 = vsel %vm3068_vm11, %v4155_v35, %v3065_v32 }
 0x920   :  { %v3277_v51 = vadd.f32 %v3261_v46, %v6497_v4  ;;  %v3198_v27 = vadd.f32 %v6386_v21, %v3197_v30  ;;  %v3085_v55 = vmul.f32 %v3069_v63, %v2893_v3  ;;  %v3370_v31 = vpack.c.bf16 %v3356_v37, %v3355_v24 }
 0x922   :  { %v3293_v18 = vmul.f32 0.7978846, %v3277_v51  ;;  %v3230_v2 = vmul.f32 %v3198_v27, %v3198_v27  ;;  %v3104_v13 = vmul.f32 %v6189_v58, %v3085_v55  ;;  %3458 = vmatmul.bf16.gmra.mxu0 %v3370_v31 }
 0x924   :  { %v3246_v57 = vmul.f32 %v3230_v2, %v3198_v27  ;;  %v3123_v25 = vadd.f32 %v6197_v60, %v3104_v13  ;;  %4160 = vtanh.f32 %v3293_v18 }
 0x926   :  { %v3262_v23 = vmul.f32 0.044715, %v3246_v57  ;;  %v3131_v35 = vpack.c.bf16 %v3123_v25, %v3122_v53 }
 0x927   :  { %v3200_v44 = vpop.f32.mrf.mxu3 }
 0x928   :  { %v3278_v50 = vadd.f32 %v3262_v23, %v3198_v27  ;;  %v3201_v14 = vadd.f32 %v6386_v21, %v3200_v44  ;;  %3641 = vmatmul.msk.bf16.gmra.mxu3 %vm60_vm0, %v3131_v35 }
 0x92a   :  { %v3294_v22 = vmul.f32 0.7978846, %v3278_v50  ;;  %v3231_v7 = vmul.f32 %v3201_v14, %v3201_v14  ;;  %v4161_v40 = vpop.eup %4160 }
 0x92b   :  { %v3325_v56 = vadd.f32 1.0, %v4161_v40  ;;  %v6525_v40 = vld [vmem:[%s6639_s11] ss:$0 sm:$0xff] }
 0x92c   :  { %4162 = vtanh.f32 %v3294_v22  ;;  %v3247_v58 = vmul.f32 %v3231_v7, %v3201_v14 }
 0x92d   :  { %v3341_v39 = vmul.f32 0.5, %v3325_v56 }
 0x92e   :  { %v3263_v45 = vmul.f32 0.044715, %v3247_v58 }
 0x92f   :  { %v3202_v36 = vpop.f32.mrf.mxu3  ;;  %v3357_v59 = vmul.f32 %v3341_v39, %v6497_v4 }
 0x930   :  { %v3279_v29 = vadd.f32 %v3263_v45, %v3201_v14  ;;  %v3203_v60 = vadd.f32 %v6386_v21, %v3202_v36 }
 0x932   :  { %v4163_v28 = vpop.eup %4162  ;;  %v3295_v62 = vmul.f32 0.7978846, %v3279_v29  ;;  %v3232_v20 = vmul.f32 %v3203_v60, %v3203_v60 }
 0x933   :  { %v3326_v11 = vadd.f32 1.0, %v4163_v28 }
 0x934   :  { %v3248_v48 = vmul.f32 %v3232_v20, %v3203_v60  ;;  %4164 = vtanh.f32 %v3295_v62 }
 0x935   :  { %v3342_v47 = vmul.f32 0.5, %v3326_v11 }
 0x936   :  { %v3264_v34 = vmul.f32 0.044715, %v3248_v48 }
 0x937   :  { %v3358_v38 = vmul.f32 %v3342_v47, %v3198_v27 }
 0x938   :  { %v3280_v12 = vadd.f32 %v3264_v34, %v3203_v60 }
 0x939   :  { %v3371_v54 = vpack.c.bf16 %v3358_v38, %v3357_v59 }
 0x93a   :  { %v3296_v41 = vmul.f32 0.7978846, %v3280_v12  ;;  %v4165_v32 = vpop.eup %4164 }
 0x93b   :  { %3463 = vmatmul.bf16.gmra.mxu0 %v3371_v54  ;;  %v3327_v46 = vadd.f32 1.0, %v4165_v32 }
 0x93c   :  { %4166 = vtanh.f32 %v3296_v41 }
 0x93d   :  { %v3343_v42 = vmul.f32 0.5, %v3327_v46 }
 0x93f   :  { %v3359_v51 = vmul.f32 %v3343_v42, %v3201_v14 }
 0x942   :  { %v4167_v3 = vpop.eup %4166 }
 0x943   :  { %v3328_v30 = vadd.f32 1.0, %v4167_v3 }
 0x945   :  { %v3344_v63 = vmul.f32 0.5, %v3328_v30 }
 0x947   :  { %v3360_v55 = vmul.f32 %v3344_v63, %v3203_v60 }
 0x949   :  { %v3372_v24 = vpack.c.bf16 %v3360_v55, %v3359_v51 }
 0x94b   :  { %3468 = vmatmul.bf16.gmra.mxu0 %v3372_v24 }
 0x977   :  { %v3205_v37 = vpop.f32.mrf.mxu3 }
 0x978   :  { %v3206_v10 = vadd.f32 %v6386_v21, %v3205_v37 }
 0x97a   :  { %v3233_v4 = vmul.f32 %v3206_v10, %v3206_v10 }
 0x97c   :  { %v3249_v27 = vmul.f32 %v3233_v4, %v3206_v10 }
 0x97e   :  { %v3265_v18 = vmul.f32 0.044715, %v3249_v27 }
 0x97f   :  { %v3207_v2 = vpop.f32.mrf.mxu3 }
 0x980   :  { %v3281_v31 = vadd.f32 %v3265_v18, %v3206_v10  ;;  %v3208_v13 = vadd.f32 %v6386_v21, %v3207_v2 }
 0x982   :  { %v3297_v57 = vmul.f32 0.7978846, %v3281_v31  ;;  %v3234_v53 = vmul.f32 %v3208_v13, %v3208_v13 }
 0x984   :  { %v3250_v25 = vmul.f32 %v3234_v53, %v3208_v13  ;;  %4168 = vtanh.f32 %v3297_v57 }
 0x986   :  { %v3266_v23 = vmul.f32 0.044715, %v3250_v25 }
 0x988   :  { %v3282_v44 = vadd.f32 %v3266_v23, %v3208_v13 }
 0x98a   :  { %v3298_v35 = vmul.f32 0.7978846, %v3282_v44  ;;  %v4169_v14 = vpop.eup %4168 }
 0x98b   :  { %v3210_v50 = vpop.f32.mrf.mxu3  ;;  %v3329_v58 = vadd.f32 1.0, %v4169_v14 }
 0x98c   :  { %v3211_v22 = vadd.f32 %v6386_v21, %v3210_v50  ;;  %4170 = vtanh.f32 %v3298_v35 }
 0x98d   :  { %v3345_v62 = vmul.f32 0.5, %v3329_v58 }
 0x98e   :  { %v3235_v7 = vmul.f32 %v3211_v22, %v3211_v22 }
 0x98f   :  { %v3454_v36 = vpop.f32.mrf.mxu0  ;;  %v3361_v12 = vmul.f32 %v3345_v62, %v3206_v10 }
 0x990   :  { %v3251_v45 = vmul.f32 %v3235_v7, %v3211_v22  ;;  %v3455_v29 = vadd.f32 %v6525_v40, %v3454_v36 }
 0x992   :  { %v3267_v56 = vmul.f32 0.044715, %v3251_v45  ;;  %v4171_v60 = vpop.eup %4170  ;;  %v3494_v11 = vadd.f32 %v3455_v29, %v6008_v16 }
 0x993   :  { %v3212_v28 = vpop.f32.mrf.mxu3  ;;  %v3330_v48 = vadd.f32 1.0, %v4171_v60 }
 0x994   :  { %v3283_v20 = vadd.f32 %v3267_v56, %v3211_v22  ;;  %v3213_v39 = vadd.f32 %v6386_v21, %v3212_v28  ;;  %3510 = vst.msk [vmem:[%s6640_s12] sm:$0xff] %vm60_vm0, %v3494_v11 }
 0x995   :  { %v3346_v59 = vmul.f32 0.5, %v3330_v48 }
 0x996   :  { %v3299_v47 = vmul.f32 0.7978846, %v3283_v20  ;;  %v3236_v34 = vmul.f32 %v3213_v39, %v3213_v39 }
 0x997   :  { %v3362_v54 = vmul.f32 %v3346_v59, %v3208_v13  ;;  %v3456_v41 = vpop.f32.mrf.mxu0 }
 0x998   :  { %v3252_v38 = vmul.f32 %v3236_v34, %v3213_v39  ;;  %4172 = vtanh.f32 %v3299_v47  ;;  %v3457_v46 = vadd.f32 %v6525_v40, %v3456_v41 }
 0x999   :  { %v3373_v16 = vpack.c.bf16 %v3362_v54, %v3361_v12 }
 0x99a   :  { %v3268_v32 = vmul.f32 0.044715, %v3252_v38  ;;  %v3495_v30 = vadd.f32 %v3457_v46, %v6027_v49 }
 0x99b   :  { %3473 = vmatmul.bf16.gmra.mxu0 %v3373_v16  ;;  %v3215_v42 = vpop.f32.mrf.mxu3 }
 0x99c   :  { %v3284_v3 = vadd.f32 %v3268_v32, %v3213_v39  ;;  %3511 = vst.msk [vmem:[%s6640_s12 + $0x8] sm:$0xff] %vm60_vm0, %v3495_v30  ;;  %v3216_v51 = vadd.f32 %v6386_v21, %v3215_v42 }
 0x99e   :  { %v3300_v63 = vmul.f32 0.7978846, %v3284_v3  ;;  %v4173_v55 = vpop.eup %4172  ;;  %v3237_v24 = vmul.f32 %v3216_v51, %v3216_v51 }
 0x99f   :  { %v3459_v10 = vpop.f32.mrf.mxu0  ;;  %v3331_v27 = vadd.f32 1.0, %v4173_v55 }
 0x9a0   :  { %4174 = vtanh.f32 %v3300_v63  ;;  %v3253_v37 = vmul.f32 %v3237_v24, %v3216_v51  ;;  %v3460_v4 = vadd.f32 %v6525_v40, %v3459_v10 }
 0x9a1   :  { %v3347_v25 = vmul.f32 0.5, %v3331_v27 }
 0x9a2   :  { %v3269_v18 = vmul.f32 0.044715, %v3253_v37  ;;  %v3496_v49 = vadd.f32 %v3460_v4, %v6039_v9 }
 0x9a3   :  { %v3217_v2 = vpop.f32.mrf.mxu3  ;;  %v3363_v9 = vmul.f32 %v3347_v25, %v3211_v22 }
 0x9a4   :  { %v3285_v13 = vadd.f32 %v3269_v18, %v3216_v51  ;;  %v3218_v57 = vadd.f32 %v6386_v21, %v3217_v2  ;;  %3512 = vst.msk [vmem:[%s6640_s12 + $0x10] sm:$0xff] %vm60_vm0, %v3496_v49 }
 0x9a6   :  { %v4175_v31 = vpop.eup %4174  ;;  %v3301_v23 = vmul.f32 0.7978846, %v3285_v13  ;;  %v3238_v44 = vmul.f32 %v3218_v57, %v3218_v57 }
 0x9a7   :  { %v3332_v53 = vadd.f32 1.0, %v4175_v31  ;;  %v3461_v14 = vpop.f32.mrf.mxu0 }
 0x9a8   :  { %v3254_v50 = vmul.f32 %v3238_v44, %v3218_v57  ;;  %v3462_v7 = vadd.f32 %v6525_v40, %v3461_v14  ;;  %4176 = vtanh.f32 %v3301_v23 }
 0x9a9   :  { %v3348_v35 = vmul.f32 0.5, %v3332_v53 }
 0x9aa   :  { %v3270_v45 = vmul.f32 0.044715, %v3254_v50  ;;  %v3497_v36 = vadd.f32 %v3462_v7, %v6054_v19 }
 0x9ab   :  { %v3364_v58 = vmul.f32 %v3348_v35, %v3213_v39  ;;  %v3220_v56 = vpop.f32.mrf.mxu3 }
 0x9ac   :  { %v3286_v60 = vadd.f32 %v3270_v45, %v3218_v57  ;;  %v3221_v28 = vadd.f32 %v6386_v21, %v3220_v56  ;;  %3513 = vst.msk [vmem:[%s6640_s12 + $0x18] sm:$0xff] %vm60_vm0, %v3497_v36 }
 0x9ad   :  { %v3374_v29 = vpack.c.bf16 %v3364_v58, %v3363_v9 }
 0x9ae   :  { %v3302_v62 = vmul.f32 0.7978846, %v3286_v60  ;;  %v3239_v20 = vmul.f32 %v3221_v28, %v3221_v28  ;;  %v4177_v11 = vpop.eup %4176 }
 0x9af   :  { %3478 = vmatmul.bf16.gmra.mxu0 %v3374_v29  ;;  %v3333_v47 = vadd.f32 1.0, %v4177_v11 }
 0x9b0   :  { %4178 = vtanh.f32 %v3302_v62  ;;  %v3255_v22 = vmul.f32 %v3239_v20, %v3221_v28 }
 0x9b1   :  { %v3349_v46 = vmul.f32 0.5, %v3333_v47 }
 0x9b2   :  { %v3271_v39 = vmul.f32 0.044715, %v3255_v22 }
 0x9b3   :  { %v3222_v48 = vpop.f32.mrf.mxu3 }
 0x9b4   :  { %v3287_v19 = vadd.f32 %v3271_v39, %v3221_v28  ;;  %v3223_v34 = vadd.f32 %v6386_v21, %v3222_v48  ;;  %v3365_v21 = vmul.f32 %v3349_v46, %v3216_v51 }
 0x9b6   :  { %v4179_v59 = vpop.eup %4178  ;;  %v3303_v38 = vmul.f32 0.7978846, %v3287_v19  ;;  %v3240_v12 = vmul.f32 %v3223_v34, %v3223_v34 }
 0x9b7   :  { %v3334_v32 = vadd.f32 1.0, %v4179_v59 }
 0x9b8   :  { %v3464_v54 = vpop.f32.mrf.mxu0  ;;  %v3256_v16 = vmul.f32 %v3240_v12, %v3223_v34  ;;  %4180 = vtanh.f32 %v3303_v38 }
 0x9b9   :  { %v3465_v41 = vadd.f32 %v6525_v40, %v3464_v54  ;;  %v3350_v30 = vmul.f32 0.5, %v3334_v32 }
 0x9ba   :  { %v3272_v42 = vmul.f32 0.044715, %v3256_v16 }
 0x9bb   :  { %v3498_v3 = vadd.f32 %v3465_v41, %v6076_v52  ;;  %v3366_v63 = vmul.f32 %v3350_v30, %v3218_v57 }
 0x9bc   :  { %v3288_v55 = vadd.f32 %v3272_v42, %v3223_v34 }
 0x9bd   :  { %3514 = vst.msk [vmem:[%s6640_s12 + $0x20] sm:$0xff] %vm60_vm0, %v3498_v3  ;;  %v3375_v24 = vpack.c.bf16 %v3366_v63, %v3365_v21 }
 0x9be   :  { %v3304_v37 = vmul.f32 0.7978846, %v3288_v55  ;;  %v4181_v27 = vpop.eup %4180 }
 0x9bf   :  { %3483 = vmatmul.bf16.gmra.mxu0 %v3375_v24  ;;  %v3335_v18 = vadd.f32 1.0, %v4181_v27 }
 0x9c0   :  { %v3466_v10 = vpop.f32.mrf.mxu0  ;;  %4182 = vtanh.f32 %v3304_v37 }
 0x9c1   :  { %v3467_v4 = vadd.f32 %v6525_v40, %v3466_v10  ;;  %v3351_v13 = vmul.f32 0.5, %v3335_v18 }
 0x9c3   :  { %v3499_v52 = vadd.f32 %v3467_v4, %v6090_v5  ;;  %v3367_v5 = vmul.f32 %v3351_v13, %v3221_v28 }
 0x9c5   :  { %3515 = vst.msk [vmem:[%s6640_s12 + $0x28] sm:$0xff] %vm60_vm0, %v3499_v52 }
 0x9c6   :  { %v4183_v49 = vpop.eup %4182 }
 0x9c7   :  { %v3336_v31 = vadd.f32 1.0, %v4183_v49 }
 0x9c8   :  { %v3469_v51 = vpop.f32.mrf.mxu0 }
 0x9c9   :  { %v3470_v2 = vadd.f32 %v6525_v40, %v3469_v51  ;;  %v3352_v53 = vmul.f32 0.5, %v3336_v31 }
 0x9cb   :  { %v3500_v57 = vadd.f32 %v3470_v2, %v6107_v33  ;;  %v3368_v25 = vmul.f32 %v3352_v53, %v3223_v34 }
 0x9cd   :  { %3516 = vst.msk [vmem:[%s6640_s12 + $0x30] sm:$0xff] %vm60_vm0, %v3500_v57  ;;  %v3376_v23 = vpack.c.bf16 %v3368_v25, %v3367_v5 }
 0x9cf   :  { %3488 = vmatmul.bf16.gmra.mxu0 %v3376_v23 }
 0x9d0   :  { %v3471_v44 = vpop.f32.mrf.mxu0 }
 0x9d1   :  { %v3472_v35 = vadd.f32 %v6525_v40, %v3471_v44 }
 0x9d3   :  { %v3501_v50 = vadd.f32 %v3472_v35, %v6121_v17 }
 0x9d5   :  { %3517 = vst.msk [vmem:[%s6640_s12 + $0x38] sm:$0xff] %vm60_vm0, %v3501_v50 }
 0xa18   :  { %v3474_v33 = vpop.f32.mrf.mxu0 }
 0xa19   :  { %v3475_v14 = vadd.f32 %v6525_v40, %v3474_v33 }
 0xa1b   :  { %v3502_v7 = vadd.f32 %v3475_v14, %v6153_v8 }
 0xa1d   :  { %3518 = vst.msk [vmem:[%s6640_s12 + $0x40] sm:$0xff] %vm60_vm0, %v3502_v7 }
 0xa20   :  { %v3476_v9 = vpop.f32.mrf.mxu0 }
 0xa21   :  { %v3477_v58 = vadd.f32 %v6525_v40, %v3476_v9 }
 0xa23   :  { %v3503_v17 = vadd.f32 %v3477_v58, %v6173_v61 }
 0xa25   :  { %3519 = vst.msk [vmem:[%s6640_s12 + $0x48] sm:$0xff] %vm60_vm0, %v3503_v17 }
 0xa2c   :  { %v3479_v45 = vpop.f32.mrf.mxu0 }
 0xa2d   :  { %v3480_v36 = vadd.f32 %v6525_v40, %v3479_v45 }
 0xa2f   :  { %v3504_v8 = vadd.f32 %v3480_v36, %v6206_v26 }
 0xa31   :  { %3520 = vst.msk [vmem:[%s6640_s12 + $0x50] sm:$0xff] %vm60_vm0, %v3504_v8 }
 0xa34   :  { %v3481_v56 = vpop.f32.mrf.mxu0 }
 0xa35   :  { %v3482_v29 = vadd.f32 %v6525_v40, %v3481_v56 }
 0xa37   :  { %v3505_v61 = vadd.f32 %v3482_v29, %v6234_v43 }
 0xa39   :  { %3521 = vst.msk [vmem:[%s6640_s12 + $0x58] sm:$0xff] %vm60_vm0, %v3505_v61 }
 0xa3c   :  { %v3484_v60 = vpop.f32.mrf.mxu0 }
 0xa3d   :  { %v3485_v28 = vadd.f32 %v6525_v40, %v3484_v60 }
 0xa3f   :  { %v3506_v26 = vadd.f32 %v3485_v28, %v6258_v15 }
 0xa41   :  { %3522 = vst.msk [vmem:[%s6640_s12 + $0x60] sm:$0xff] %vm60_vm0, %v3506_v26 }
 0xa44   :  { %v3486_v62 = vpop.f32.mrf.mxu0 }
 0xa45   :  { %v3487_v20 = vadd.f32 %v6525_v40, %v3486_v62 }
 0xa47   :  { %v3507_v43 = vadd.f32 %v3487_v20, %v6279_v6 }
 0xa49   :  { %3523 = vst.msk [vmem:[%s6640_s12 + $0x68] sm:$0xff] %vm60_vm0, %v3507_v43 }
 0xa4c   :  { %v3489_v11 = vpop.f32.mrf.mxu0 }
 0xa4d   :  { %v3490_v22 = vadd.f32 %v6525_v40, %v3489_v11 }
 0xa4f   :  { %v3508_v15 = vadd.f32 %v3490_v22, %v6308_v0 }
 0xa51   :  { %3524 = vst.msk [vmem:[%s6640_s12 + $0x70] sm:$0xff] %vm60_vm0, %v3508_v15 }
 0xa54   :  { %v3491_v39 = vpop.f32.mrf.mxu0 }
 0xa55   :  { %v3492_v48 = vadd.f32 %v6525_v40, %v3491_v39 }
 0xa57   :  { %v3509_v6 = vadd.f32 %v3492_v48, %v6324_v1 }
 0xa59   :  { %3525 = vst.msk [vmem:[%s6640_s12 + $0x78] sm:$0xff] %vm60_vm0, %v3509_v6 }

</bundles_post_ra>
